<compile_context>
chip_gen: v5e
topology: v5e:2x2
jax: 0.10.0
libtpu: 0.0.40
codegen_flags: <defaults>
</compile_context>

<pallas_src>
import numpy as np
import jax
import jax.numpy as jnp
from jax.experimental import pallas as pl
from jax.experimental.pallas import tpu as pltpu

EPS = 1e-5                   # PyTorch GroupNorm default eps
MXU_DTYPE = jnp.bfloat16     # matmul operand dtype (f32 accumulation on the MXU)


# ---------------------------------------------------------------------------
# Fused Pallas kernel: conv_block2 for one block of TB batch samples.
# grid = (N // TB,)
# ---------------------------------------------------------------------------
def _conv_block2_kernel(x_ref,       # (TB, D, HWC) f32
                        vec_ref,     # (12, HWC)    f32   gamma/beta/bias rows
                        wb_ref,      # (12, HWC, HWC) bf16 band weights (4 convs x 3 kd taps)
                        out_ref):    # (TB, D, HWC) f32
    TB, D, HWC = x_ref.shape
    M = TB * D
    inv_n = 1.0 / (D * HWC)

    # Validity masks for the shifted kd taps: zero contributions that would cross
    # a D edge or a sample boundary inside the TB-sample batch block.
    d_idx = jax.lax.broadcasted_iota(jnp.int32, (M, 1), 0) % D
    m_dn = (d_idx != (D - 1)).astype(jnp.float32)   # input depth d feeds output d+1
    m_up = (d_idx != 0).astype(jnp.float32)         # input depth d feeds output d-1
    zero_row = jnp.zeros((1, HWC), jnp.float32)

    def vec_row(i):                                  # (1, HWC) parameter row (static slice)
        return vec_ref[i:i + 1, :]

    def gn_relu_cast(y3, gi, bi):
        # GroupNorm(num_groups=1): per-sample two-pass stats over D*H*W*C
        # (centered variance -> no E[x^2]-mean^2 cancellation), per-channel
        # affine, ReLU.  Cast to the MXU dtype exactly ONCE here.
        s = jnp.sum(y3, axis=2, keepdims=True)               # (TB, D, 1)   lane reduce
        mean = jnp.sum(s, axis=1, keepdims=True) * inv_n     # (TB, 1, 1)   sublane reduce
        xc = y3 - mean
        s2 = jnp.sum(xc * xc, axis=2, keepdims=True)
        var = jnp.sum(s2, axis=1, keepdims=True) * inv_n
        xn = xc * jax.lax.rsqrt(var + EPS)
        g = vec_row(gi).reshape(1, 1, HWC)
        b = vec_row(bi).reshape(1, 1, HWC)
        h = jnp.maximum(xn * g + b, 0.0)
        return h.reshape(M, HWC).astype(MXU_DTYPE)           # lane-dense MXU operand

    def conv3d(hb, ci, bias_i):
        # 3x3x3 'same' conv = three accumulating (M,HWC)x(HWC,HWC) MXU dots,
        # one per kd tap, against the (kh,kw,cin)-banded weights.  H/W padding
        # is encoded in the band; D / sample-boundary padding is a masked
        # one-row sublane shift of the dot outputs (no patch materialization).
        acc = jnp.dot(hb, wb_ref[3 * ci + 1], preferred_element_type=jnp.float32)
        t = jnp.dot(hb, wb_ref[3 * ci + 0], preferred_element_type=jnp.float32) * m_dn
        acc = acc + jnp.concatenate([zero_row, t[:M - 1, :]], axis=0)
        t = jnp.dot(hb, wb_ref[3 * ci + 2], preferred_element_type=jnp.float32) * m_up
        acc = acc + jnp.concatenate([t[1:, :], zero_row], axis=0)
        return (acc + vec_row(bias_i)).reshape(TB, D, HWC)

    def conv_block(y3, k):                                   # residual sub-block k in {0,1}
        h = gn_relu_cast(y3, 6 * k + 0, 6 * k + 1)
        h3 = conv3d(h, 2 * k + 0, 6 * k + 2)
        h = gn_relu_cast(h3, 6 * k + 3, 6 * k + 4)
        h3 = conv3d(h, 2 * k + 1, 6 * k + 5)
        return h3 + y3                                       # residual

    y3 = x_ref[...].astype(jnp.float32)
    y3 = conv_block(y3, 0)
    y3 = conv_block(y3, 1)
    out_ref[...] = y3.astype(out_ref.dtype)


# ---------------------------------------------------------------------------
# Tiling / VMEM heuristics.
# ---------------------------------------------------------------------------
def _pick_tb(n, d, target_m=256):
    """Largest divisor TB of n with TB*d <= target_m (fill the MXU M dim), while
    keeping >= 2 grid steps when n >= 2 so both v7x TensorCores get work
    (no-op on single-TC v5e/v6e)."""
    cap = max(1, target_m // max(d, 1))
    if n >= 2:
        cap = max(1, min(cap, n // 2))
    tb = 1
    for cand in range(2, cap + 1):
        if n % cand == 0:
            tb = cand
    return tb


def _vmem_limit_bytes():
    """~75% of physical VMEM per generation (~96 MiB v5e/v6e, ~48 MiB v7x),
    clamped to a known-safe window."""
    try:
        cap_mib = int(pltpu.get_tpu_info().vmem_capacity_bytes) >> 20
        return max(32, min(100, cap_mib * 3 // 4)) << 20
    except Exception:
        return 32 * 1024 * 1024


@jax.jit
def _conv_block2_forward(x3, vec, wb):
    """x3: (N, D, HWC) f32.  vec: (12, HWC) f32.  wb: (12, HWC, HWC) MXU_DTYPE."""
    N, D, HWC = x3.shape
    TB = _pick_tb(N, D)

    return pl.pallas_call(
        _conv_block2_kernel,
        out_shape=jax.ShapeDtypeStruct(x3.shape, x3.dtype),
        grid_spec=pltpu.PrefetchScalarGridSpec(
            num_scalar_prefetch=0,
            grid=(N // TB,),                              # batch blocks are independent
            in_specs=[
                pl.BlockSpec((TB, D, HWC), lambda n: (n, 0, 0)),
                # Grid-invariant parameters (constant index_map): the pipeline DMAs
                # them once and re-uses the resident buffer on later grid steps.
                # TODO(synk): single-buffer them (pl.Buffered(1)) for very large C on v7x.
                pl.BlockSpec((12, HWC), lambda n: (0, 0)),
                pl.BlockSpec((12, HWC, HWC), lambda n: (0, 0, 0)),
            ],
            out_specs=pl.BlockSpec((TB, D, HWC), lambda n: (n, 0, 0)),
        ),
        compiler_params=pltpu.CompilerParams(
            dimension_semantics=("parallel",),            # shard batch blocks across TCs
            vmem_limit_bytes=_vmem_limit_bytes(),
        ),
    )(x3, vec, wb)


# ---------------------------------------------------------------------------
# Weight preparation (done once, outside the kernel).
# ---------------------------------------------------------------------------
def _build_band_weights(w, H, W):
    """Fold the (kh, kw, cin) taps of a 3x3x3 DHWIO conv weight into three
    block-banded matrices, shape (3, H*W*Cin, H*W*Cout); plane kd pairs with the
    input row x[d + kd - 1].  Out-of-range (kh, kw) taps are dropped, which
    implements the H/W zero padding."""
    w = np.asarray(w, np.float32)
    kD, kH, kW, C, Co = w.shape
    HWC, HWCo = H * W * C, H * W * Co
    band = np.zeros((kD, HWC, HWCo), np.float32)
    for kd in range(kD):
        for ho in range(H):
            for wo in range(W):
                col = (ho * W + wo) * Co
                for kh in range(kH):
                    hi = ho + kh - 1
                    if hi < 0 or hi >= H:
                        continue
                    for kw in range(kW):
                        wi = wo + kw - 1
                        if wi < 0 or wi >= W:
                            continue
                        row = (hi * W + wi) * C
                        band[kd, row:row + C, col:col + Co] = w[kd, kh, kw]
    return band


def _prepare_params(params1, params2, H, W):
    """Pack both conv_blocks' params into two kernel operands:
       vec (12, HWC) f32 rows = [g1, be1, b1, g2, be2, b2] per block,
       wb  (12, HWC, HWC) bf16 planes = 3 kd taps per conv, 2 convs per block."""
    HW = H * W
    vec_rows, band_planes = [], []
    for (g1, be1, w1, b1, g2, be2, w2, b2) in (params1, params2):
        for v in (g1, be1, b1, g2, be2, b2):
            # (1, C) -> (1, H*W*C), matching the (h*W + w)*C + c element order
            vec_rows.append(np.tile(np.asarray(v, np.float32).reshape(1, -1), (1, HW)))
        band_planes.append(_build_band_weights(w1, H, W))
        band_planes.append(_build_band_weights(w2, H, W))
    vec = jnp.asarray(np.concatenate(vec_rows, axis=0), jnp.float32)
    wb = jnp.asarray(np.concatenate(band_planes, axis=0), MXU_DTYPE)
    return vec, wb


def conv_block2_pallas(x, params1, params2):
    """conv_block2 forward.  x: (N, D, H, W, C) float32 (NDHWC)."""
    N, D, H, W, C = x.shape
    vec, wb = _prepare_params(params1, params2, H, W)
    out = _conv_block2_forward(x.reshape(N, D, H * W * C), vec, wb)
    return out.reshape(N, D, H, W, C)


# ---------------------------------------------------------------------------
# Deterministic parameter initialization (synthetic; shapes from __init__).
# ---------------------------------------------------------------------------
def init_conv_block_params(key, C):
    kg1, kb1, kw1, kc1, kg2, kb2, kw2, kc2 = jax.random.split(key, 8)
    fan_in = C * 27

    def conv_w(k):
        return jax.random.normal(k, (3, 3, 3, C, C), jnp.float32) / np.sqrt(fan_in)

    g1 = 1.0 + 0.1 * jax.random.normal(kg1, (1, C), jnp.float32)
    be1 = 0.1 * jax.random.normal(kb1, (1, C), jnp.float32)
    w1 = conv_w(kw1)
    b1 = 0.1 * jax.random.normal(kc1, (1, C), jnp.float32)
    g2 = 1.0 + 0.1 * jax.random.normal(kg2, (1, C), jnp.float32)
    be2 = 0.1 * jax.random.normal(kb2, (1, C), jnp.float32)
    w2 = conv_w(kw2)
    b2 = 0.1 * jax.random.normal(kc2, (1, C), jnp.float32)
    return (g1, be1, w1, b1, g2, be2, w2, b2)


# ---------------------------------------------------------------------------
# Pure-JAX reference (mirrors the PyTorch forward) for correctness checking.
# ---------------------------------------------------------------------------
def _ref_gn_relu(x, g, b):
    mean = jnp.mean(x, axis=(1, 2, 3, 4), keepdims=True)
    var = jnp.mean(jnp.square(x - mean), axis=(1, 2, 3, 4), keepdims=True)
    xn = (x - mean) / jnp.sqrt(var + EPS)
    xn = xn * g.reshape(1, 1, 1, 1, -1) + b.reshape(1, 1, 1, 1, -1)
    return jnp.maximum(xn, 0.0)


def _ref_conv3d(x, w, b):
    out = jax.lax.conv_general_dilated(
        x, w, window_strides=(1, 1, 1),
        padding=((1, 1), (1, 1), (1, 1)),
        dimension_numbers=("NDHWC", "DHWIO", "NDHWC"),
        precision=jax.lax.Precision.HIGHEST)
    return out + b.reshape(1, 1, 1, 1, -1)


def _ref_conv_block(x, p):
    g1, be1, w1, b1, g2, be2, w2, b2 = p
    y = _ref_gn_relu(x, g1, be1)
    y = _ref_conv3d(y, w1, b1)
    y = _ref_gn_relu(y, g2, be2)
    y = _ref_conv3d(y, w2, b2)
    return y + x


def ref_conv_block2(x, p1, p2):
    return _ref_conv_block(_ref_conv_block(x, p1), p2)


if __name__ == "__main__":
    key = jax.random.PRNGKey(0)
    kx, k1, k2 = jax.random.split(key, 3)

    # Small shapes: batch=4 (exercises TB=2 batch-blocking + sample-boundary masks),
    # channels=4 (in_chan == ou_chan), volume 8x8x8.
    N, C, D, H, W = 4, 4, 8, 8, 8
    x = jax.random.normal(kx, (N, D, H, W, C), jnp.float32)  # NDHWC

    params1 = init_conv_block_params(k1, C)
    params2 = init_conv_block_params(k2, C)

    out = conv_block2_pallas(x, params1, params2)
    out = jax.block_until_ready(out)

    ref = ref_conv_block2(x, params1, params2)
    tol = 4e-2 if MXU_DTYPE == jnp.bfloat16 else 2e-3
    np.testing.assert_allclose(np.asarray(out), np.asarray(ref), rtol=tol, atol=tol)
    print("KERNEL_OK")
</pallas_src>

<mosaic_0001>
module attributes {stable_mosaic.version = 11 : i64} {
  func.func @_conv_block2_kernel(%arg0: i32, %arg1: memref<2x8x256xf32, #tpu.memory_space<vmem>>, %arg2: memref<12x256xf32, #tpu.memory_space<vmem>>, %arg3: memref<12x256x256xbf16, #tpu.memory_space<vmem>>, %arg4: memref<2x8x256xf32, #tpu.memory_space<vmem>>) attributes {dimension_semantics = [#tpu.dimension_semantics<parallel>], iteration_bounds = array<i64: 2>, scalar_prefetch = 0 : i64, scratch_operands = 0 : i64, tpu.core_type = #tpu.core_type<tc>, window_params = [{transform_indices = @transform_0, window_bounds = array<i64: 2, 8, 256>}, {pipeline_mode = #tpu.pipeline_mode<synchronous>, transform_indices = @transform_1, window_bounds = array<i64: 12, 256>}, {pipeline_mode = #tpu.pipeline_mode<synchronous>, transform_indices = @transform_2, window_bounds = array<i64: 12, 256, 256>}, {transform_indices = @transform_3, window_bounds = array<i64: 2, 8, 256>}]} {
    %0 = tpu.iota {dimensions = array<i32: 0>} : vector<16x1xi32>
    %c8_i32 = arith.constant 8 : i32
    %c0_i32 = arith.constant 0 : i32
    %1 = arith.cmpi eq, %c8_i32, %c0_i32 : i32
    %c1_i32 = arith.constant 1 : i32
    %2 = arith.select %1, %c1_i32, %c8_i32 : i32
    %3 = vector.broadcast %2 : i32 to vector<16x1xi32>
    %4 = arith.remsi %0, %3 : vector<16x1xi32>
    %c0_i32_0 = arith.constant 0 : i32
    %5 = vector.broadcast %c0_i32_0 : i32 to vector<16x1xi32>
    %6 = arith.cmpi ne, %4, %5 : vector<16x1xi32>
    %c0_i32_1 = arith.constant 0 : i32
    %7 = vector.broadcast %c0_i32_1 : i32 to vector<16x1xi32>
    %8 = arith.cmpi slt, %4, %7 : vector<16x1xi32>
    %c0_i32_2 = arith.constant 0 : i32
    %9 = arith.cmpi slt, %2, %c0_i32_2 : i32
    %10 = vector.broadcast %9 : i1 to vector<16x1xi1>
    %11 = vector.broadcast %10 : vector<16x1xi1> to vector<16x1xi1>
    %12 = arith.xori %8, %11 : vector<16x1xi1>
    %13 = arith.andi %12, %6 : vector<16x1xi1>
    %14 = vector.broadcast %2 : i32 to vector<16x1xi32>
    %15 = arith.addi %4, %14 : vector<16x1xi32>
    %16 = arith.select %13, %15, %4 : vector<16x1xi1>, vector<16x1xi32>
    %c7_i32 = arith.constant 7 : i32
    %17 = vector.broadcast %c7_i32 : i32 to vector<16x1xi32>
    %18 = arith.cmpi ne, %16, %17 : vector<16x1xi32>
    %19 = arith.extui %18 : vector<16x1xi1> to vector<16x1xi32>
    %20 = arith.sitofp %19 : vector<16x1xi32> to vector<16x1xf32>
    %c0_i32_3 = arith.constant 0 : i32
    %21 = vector.broadcast %c0_i32_3 : i32 to vector<16x1xi32>
    %22 = arith.cmpi ne, %16, %21 : vector<16x1xi32>
    %23 = arith.extui %22 : vector<16x1xi1> to vector<16x1xi32>
    %24 = arith.sitofp %23 : vector<16x1xi32> to vector<16x1xf32>
    %cst = arith.constant 0.000000e+00 : f32
    %25 = vector.broadcast %cst : f32 to vector<1x256xf32>
    %c0 = arith.constant 0 : index
    %c0_4 = arith.constant 0 : index
    %c0_5 = arith.constant 0 : index
    %26 = vector.load %arg1[%c0, %c0_4, %c0_5] : memref<2x8x256xf32, #tpu.memory_space<vmem>>, vector<2x8x256xf32>
    %cst_6 = arith.constant dense<0.000000e+00> : vector<2x8xf32>
    %27 = vector.multi_reduction <add>, %26, %cst_6 [2] : vector<2x8x256xf32> to vector<2x8xf32>
    %28 = vector.shape_cast %27 : vector<2x8xf32> to vector<2x8x1xf32>
    %cst_7 = arith.constant dense<0.000000e+00> : vector<2x1xf32>
    %29 = vector.multi_reduction <add>, %28, %cst_7 [1] : vector<2x8x1xf32> to vector<2x1xf32>
    %30 = vector.shape_cast %29 : vector<2x1xf32> to vector<2x1x1xf32>
    %cst_8 = arith.constant 4.8828125E-4 : f32
    %31 = vector.broadcast %cst_8 : f32 to vector<2x1x1xf32>
    %32 = arith.mulf %30, %31 : vector<2x1x1xf32>
    %33 = vector.broadcast %32 : vector<2x1x1xf32> to vector<2x8x256xf32>
    %34 = arith.subf %26, %33 : vector<2x8x256xf32>
    %35 = arith.mulf %34, %34 : vector<2x8x256xf32>
    %cst_9 = arith.constant dense<0.000000e+00> : vector<2x8xf32>
    %36 = vector.multi_reduction <add>, %35, %cst_9 [2] : vector<2x8x256xf32> to vector<2x8xf32>
    %37 = vector.shape_cast %36 : vector<2x8xf32> to vector<2x8x1xf32>
    %cst_10 = arith.constant dense<0.000000e+00> : vector<2x1xf32>
    %38 = vector.multi_reduction <add>, %37, %cst_10 [1] : vector<2x8x1xf32> to vector<2x1xf32>
    %39 = vector.shape_cast %38 : vector<2x1xf32> to vector<2x1x1xf32>
    %cst_11 = arith.constant 4.8828125E-4 : f32
    %40 = vector.broadcast %cst_11 : f32 to vector<2x1x1xf32>
    %41 = arith.mulf %39, %40 : vector<2x1x1xf32>
    %cst_12 = arith.constant 9.99999974E-6 : f32
    %42 = vector.broadcast %cst_12 : f32 to vector<2x1x1xf32>
    %43 = arith.addf %41, %42 : vector<2x1x1xf32>
    %44 = math.rsqrt %43 : vector<2x1x1xf32>
    %45 = vector.broadcast %44 : vector<2x1x1xf32> to vector<2x8x256xf32>
    %46 = arith.mulf %34, %45 : vector<2x8x256xf32>
    %c0_13 = arith.constant 0 : index
    %c0_14 = arith.constant 0 : index
    %47 = vector.load %arg2[%c0_13, %c0_14] : memref<12x256xf32, #tpu.memory_space<vmem>>, vector<1x256xf32>
    %48 = vector.shape_cast %47 : vector<1x256xf32> to vector<1x1x256xf32>
    %c1 = arith.constant 1 : index
    %c0_15 = arith.constant 0 : index
    %49 = vector.load %arg2[%c1, %c0_15] : memref<12x256xf32, #tpu.memory_space<vmem>>, vector<1x256xf32>
    %50 = vector.shape_cast %49 : vector<1x256xf32> to vector<1x1x256xf32>
    %51 = vector.broadcast %48 : vector<1x1x256xf32> to vector<2x8x256xf32>
    %52 = arith.mulf %46, %51 : vector<2x8x256xf32>
    %53 = vector.broadcast %50 : vector<1x1x256xf32> to vector<2x8x256xf32>
    %54 = arith.addf %52, %53 : vector<2x8x256xf32>
    %cst_16 = arith.constant 0.000000e+00 : f32
    %55 = vector.broadcast %cst_16 : f32 to vector<2x8x256xf32>
    %56 = arith.maximumf %54, %55 : vector<2x8x256xf32>
    %57 = vector.shape_cast %56 : vector<2x8x256xf32> to vector<16x256xf32>
    %58 = arith.truncf %57 : vector<16x256xf32> to vector<16x256xbf16>
    %c1_17 = arith.constant 1 : index
    %c0_18 = arith.constant 0 : index
    %c0_19 = arith.constant 0 : index
    %59 = vector.load %arg3[%c1_17, %c0_18, %c0_19] : memref<12x256x256xbf16, #tpu.memory_space<vmem>>, vector<1x256x256xbf16>
    %60 = vector.shape_cast %59 : vector<1x256x256xbf16> to vector<256x256xbf16>
    %cst_20 = arith.constant dense<0.000000e+00> : vector<16x256xf32>
    %61 = tpu.matmul %58, %60, %cst_20 {dimension_numbers = #tpu.dot_dimension_numbers<[1], [0], [0], [1], [0, 0, 1, 1], [], []>} : vector<16x256xbf16>, vector<256x256xbf16>, vector<16x256xf32> -> vector<16x256xf32>
    %c0_21 = arith.constant 0 : index
    %c0_22 = arith.constant 0 : index
    %c0_23 = arith.constant 0 : index
    %62 = vector.load %arg3[%c0_21, %c0_22, %c0_23] : memref<12x256x256xbf16, #tpu.memory_space<vmem>>, vector<1x256x256xbf16>
    %63 = vector.shape_cast %62 : vector<1x256x256xbf16> to vector<256x256xbf16>
    %cst_24 = arith.constant dense<0.000000e+00> : vector<16x256xf32>
    %64 = tpu.matmul %58, %63, %cst_24 {dimension_numbers = #tpu.dot_dimension_numbers<[1], [0], [0], [1], [0, 0, 1, 1], [], []>} : vector<16x256xbf16>, vector<256x256xbf16>, vector<16x256xf32> -> vector<16x256xf32>
    %65 = vector.broadcast %20 : vector<16x1xf32> to vector<16x256xf32>
    %66 = arith.mulf %64, %65 : vector<16x256xf32>
    %67 = vector.extract_strided_slice %66 {offsets = [0, 0], sizes = [15, 256], strides = [1, 1]} : vector<16x256xf32> to vector<15x256xf32>
    %68 = tpu.concatenate %25, %67 in 0 : vector<1x256xf32>, vector<15x256xf32> -> vector<16x256xf32>
    %69 = arith.addf %61, %68 : vector<16x256xf32>
    %c2 = arith.constant 2 : index
    %c0_25 = arith.constant 0 : index
    %c0_26 = arith.constant 0 : index
    %70 = vector.load %arg3[%c2, %c0_25, %c0_26] : memref<12x256x256xbf16, #tpu.memory_space<vmem>>, vector<1x256x256xbf16>
    %71 = vector.shape_cast %70 : vector<1x256x256xbf16> to vector<256x256xbf16>
    %cst_27 = arith.constant dense<0.000000e+00> : vector<16x256xf32>
    %72 = tpu.matmul %58, %71, %cst_27 {dimension_numbers = #tpu.dot_dimension_numbers<[1], [0], [0], [1], [0, 0, 1, 1], [], []>} : vector<16x256xbf16>, vector<256x256xbf16>, vector<16x256xf32> -> vector<16x256xf32>
    %73 = vector.broadcast %24 : vector<16x1xf32> to vector<16x256xf32>
    %74 = arith.mulf %72, %73 : vector<16x256xf32>
    %75 = vector.extract_strided_slice %74 {offsets = [1, 0], sizes = [15, 256], strides = [1, 1]} : vector<16x256xf32> to vector<15x256xf32>
    %76 = tpu.concatenate %75, %25 in 0 : vector<15x256xf32>, vector<1x256xf32> -> vector<16x256xf32>
    %77 = arith.addf %69, %76 : vector<16x256xf32>
    %c2_28 = arith.constant 2 : index
    %c0_29 = arith.constant 0 : index
    %78 = vector.load %arg2[%c2_28, %c0_29] : memref<12x256xf32, #tpu.memory_space<vmem>>, vector<1x256xf32>
    %79 = vector.broadcast %78 : vector<1x256xf32> to vector<16x256xf32>
    %80 = arith.addf %77, %79 : vector<16x256xf32>
    %81 = vector.shape_cast %80 : vector<16x256xf32> to vector<2x8x256xf32>
    %cst_30 = arith.constant dense<0.000000e+00> : vector<2x8xf32>
    %82 = vector.multi_reduction <add>, %81, %cst_30 [2] : vector<2x8x256xf32> to vector<2x8xf32>
    %83 = vector.shape_cast %82 : vector<2x8xf32> to vector<2x8x1xf32>
    %cst_31 = arith.constant dense<0.000000e+00> : vector<2x1xf32>
    %84 = vector.multi_reduction <add>, %83, %cst_31 [1] : vector<2x8x1xf32> to vector<2x1xf32>
    %85 = vector.shape_cast %84 : vector<2x1xf32> to vector<2x1x1xf32>
    %cst_32 = arith.constant 4.8828125E-4 : f32
    %86 = vector.broadcast %cst_32 : f32 to vector<2x1x1xf32>
    %87 = arith.mulf %85, %86 : vector<2x1x1xf32>
    %88 = vector.broadcast %87 : vector<2x1x1xf32> to vector<2x8x256xf32>
    %89 = arith.subf %81, %88 : vector<2x8x256xf32>
    %90 = arith.mulf %89, %89 : vector<2x8x256xf32>
    %cst_33 = arith.constant dense<0.000000e+00> : vector<2x8xf32>
    %91 = vector.multi_reduction <add>, %90, %cst_33 [2] : vector<2x8x256xf32> to vector<2x8xf32>
    %92 = vector.shape_cast %91 : vector<2x8xf32> to vector<2x8x1xf32>
    %cst_34 = arith.constant dense<0.000000e+00> : vector<2x1xf32>
    %93 = vector.multi_reduction <add>, %92, %cst_34 [1] : vector<2x8x1xf32> to vector<2x1xf32>
    %94 = vector.shape_cast %93 : vector<2x1xf32> to vector<2x1x1xf32>
    %cst_35 = arith.constant 4.8828125E-4 : f32
    %95 = vector.broadcast %cst_35 : f32 to vector<2x1x1xf32>
    %96 = arith.mulf %94, %95 : vector<2x1x1xf32>
    %cst_36 = arith.constant 9.99999974E-6 : f32
    %97 = vector.broadcast %cst_36 : f32 to vector<2x1x1xf32>
    %98 = arith.addf %96, %97 : vector<2x1x1xf32>
    %99 = math.rsqrt %98 : vector<2x1x1xf32>
    %100 = vector.broadcast %99 : vector<2x1x1xf32> to vector<2x8x256xf32>
    %101 = arith.mulf %89, %100 : vector<2x8x256xf32>
    %c3 = arith.constant 3 : index
    %c0_37 = arith.constant 0 : index
    %102 = vector.load %arg2[%c3, %c0_37] : memref<12x256xf32, #tpu.memory_space<vmem>>, vector<1x256xf32>
    %103 = vector.shape_cast %102 : vector<1x256xf32> to vector<1x1x256xf32>
    %c4 = arith.constant 4 : index
    %c0_38 = arith.constant 0 : index
    %104 = vector.load %arg2[%c4, %c0_38] : memref<12x256xf32, #tpu.memory_space<vmem>>, vector<1x256xf32>
    %105 = vector.shape_cast %104 : vector<1x256xf32> to vector<1x1x256xf32>
    %106 = vector.broadcast %103 : vector<1x1x256xf32> to vector<2x8x256xf32>
    %107 = arith.mulf %101, %106 : vector<2x8x256xf32>
    %108 = vector.broadcast %105 : vector<1x1x256xf32> to vector<2x8x256xf32>
    %109 = arith.addf %107, %108 : vector<2x8x256xf32>
    %cst_39 = arith.constant 0.000000e+00 : f32
    %110 = vector.broadcast %cst_39 : f32 to vector<2x8x256xf32>
    %111 = arith.maximumf %109, %110 : vector<2x8x256xf32>
    %112 = vector.shape_cast %111 : vector<2x8x256xf32> to vector<16x256xf32>
    %113 = arith.truncf %112 : vector<16x256xf32> to vector<16x256xbf16>
    %c4_40 = arith.constant 4 : index
    %c0_41 = arith.constant 0 : index
    %c0_42 = arith.constant 0 : index
    %114 = vector.load %arg3[%c4_40, %c0_41, %c0_42] : memref<12x256x256xbf16, #tpu.memory_space<vmem>>, vector<1x256x256xbf16>
    %115 = vector.shape_cast %114 : vector<1x256x256xbf16> to vector<256x256xbf16>
    %cst_43 = arith.constant dense<0.000000e+00> : vector<16x256xf32>
    %116 = tpu.matmul %113, %115, %cst_43 {dimension_numbers = #tpu.dot_dimension_numbers<[1], [0], [0], [1], [0, 0, 1, 1], [], []>} : vector<16x256xbf16>, vector<256x256xbf16>, vector<16x256xf32> -> vector<16x256xf32>
    %c3_44 = arith.constant 3 : index
    %c0_45 = arith.constant 0 : index
    %c0_46 = arith.constant 0 : index
    %117 = vector.load %arg3[%c3_44, %c0_45, %c0_46] : memref<12x256x256xbf16, #tpu.memory_space<vmem>>, vector<1x256x256xbf16>
    %118 = vector.shape_cast %117 : vector<1x256x256xbf16> to vector<256x256xbf16>
    %cst_47 = arith.constant dense<0.000000e+00> : vector<16x256xf32>
    %119 = tpu.matmul %113, %118, %cst_47 {dimension_numbers = #tpu.dot_dimension_numbers<[1], [0], [0], [1], [0, 0, 1, 1], [], []>} : vector<16x256xbf16>, vector<256x256xbf16>, vector<16x256xf32> -> vector<16x256xf32>
    %120 = vector.broadcast %20 : vector<16x1xf32> to vector<16x256xf32>
    %121 = arith.mulf %119, %120 : vector<16x256xf32>
    %122 = vector.extract_strided_slice %121 {offsets = [0, 0], sizes = [15, 256], strides = [1, 1]} : vector<16x256xf32> to vector<15x256xf32>
    %123 = tpu.concatenate %25, %122 in 0 : vector<1x256xf32>, vector<15x256xf32> -> vector<16x256xf32>
    %124 = arith.addf %116, %123 : vector<16x256xf32>
    %c5 = arith.constant 5 : index
    %c0_48 = arith.constant 0 : index
    %c0_49 = arith.constant 0 : index
    %125 = vector.load %arg3[%c5, %c0_48, %c0_49] : memref<12x256x256xbf16, #tpu.memory_space<vmem>>, vector<1x256x256xbf16>
    %126 = vector.shape_cast %125 : vector<1x256x256xbf16> to vector<256x256xbf16>
    %cst_50 = arith.constant dense<0.000000e+00> : vector<16x256xf32>
    %127 = tpu.matmul %113, %126, %cst_50 {dimension_numbers = #tpu.dot_dimension_numbers<[1], [0], [0], [1], [0, 0, 1, 1], [], []>} : vector<16x256xbf16>, vector<256x256xbf16>, vector<16x256xf32> -> vector<16x256xf32>
    %128 = vector.broadcast %24 : vector<16x1xf32> to vector<16x256xf32>
    %129 = arith.mulf %127, %128 : vector<16x256xf32>
    %130 = vector.extract_strided_slice %129 {offsets = [1, 0], sizes = [15, 256], strides = [1, 1]} : vector<16x256xf32> to vector<15x256xf32>
    %131 = tpu.concatenate %130, %25 in 0 : vector<15x256xf32>, vector<1x256xf32> -> vector<16x256xf32>
    %132 = arith.addf %124, %131 : vector<16x256xf32>
    %c5_51 = arith.constant 5 : index
    %c0_52 = arith.constant 0 : index
    %133 = vector.load %arg2[%c5_51, %c0_52] : memref<12x256xf32, #tpu.memory_space<vmem>>, vector<1x256xf32>
    %134 = vector.broadcast %133 : vector<1x256xf32> to vector<16x256xf32>
    %135 = arith.addf %132, %134 : vector<16x256xf32>
    %136 = vector.shape_cast %135 : vector<16x256xf32> to vector<2x8x256xf32>
    %137 = arith.addf %136, %26 : vector<2x8x256xf32>
    %cst_53 = arith.constant dense<0.000000e+00> : vector<2x8xf32>
    %138 = vector.multi_reduction <add>, %137, %cst_53 [2] : vector<2x8x256xf32> to vector<2x8xf32>
    %139 = vector.shape_cast %138 : vector<2x8xf32> to vector<2x8x1xf32>
    %cst_54 = arith.constant dense<0.000000e+00> : vector<2x1xf32>
    %140 = vector.multi_reduction <add>, %139, %cst_54 [1] : vector<2x8x1xf32> to vector<2x1xf32>
    %141 = vector.shape_cast %140 : vector<2x1xf32> to vector<2x1x1xf32>
    %cst_55 = arith.constant 4.8828125E-4 : f32
    %142 = vector.broadcast %cst_55 : f32 to vector<2x1x1xf32>
    %143 = arith.mulf %141, %142 : vector<2x1x1xf32>
    %144 = vector.broadcast %143 : vector<2x1x1xf32> to vector<2x8x256xf32>
    %145 = arith.subf %137, %144 : vector<2x8x256xf32>
    %146 = arith.mulf %145, %145 : vector<2x8x256xf32>
    %cst_56 = arith.constant dense<0.000000e+00> : vector<2x8xf32>
    %147 = vector.multi_reduction <add>, %146, %cst_56 [2] : vector<2x8x256xf32> to vector<2x8xf32>
    %148 = vector.shape_cast %147 : vector<2x8xf32> to vector<2x8x1xf32>
    %cst_57 = arith.constant dense<0.000000e+00> : vector<2x1xf32>
    %149 = vector.multi_reduction <add>, %148, %cst_57 [1] : vector<2x8x1xf32> to vector<2x1xf32>
    %150 = vector.shape_cast %149 : vector<2x1xf32> to vector<2x1x1xf32>
    %cst_58 = arith.constant 4.8828125E-4 : f32
    %151 = vector.broadcast %cst_58 : f32 to vector<2x1x1xf32>
    %152 = arith.mulf %150, %151 : vector<2x1x1xf32>
    %cst_59 = arith.constant 9.99999974E-6 : f32
    %153 = vector.broadcast %cst_59 : f32 to vector<2x1x1xf32>
    %154 = arith.addf %152, %153 : vector<2x1x1xf32>
    %155 = math.rsqrt %154 : vector<2x1x1xf32>
    %156 = vector.broadcast %155 : vector<2x1x1xf32> to vector<2x8x256xf32>
    %157 = arith.mulf %145, %156 : vector<2x8x256xf32>
    %c6 = arith.constant 6 : index
    %c0_60 = arith.constant 0 : index
    %158 = vector.load %arg2[%c6, %c0_60] : memref<12x256xf32, #tpu.memory_space<vmem>>, vector<1x256xf32>
    %159 = vector.shape_cast %158 : vector<1x256xf32> to vector<1x1x256xf32>
    %c7 = arith.constant 7 : index
    %c0_61 = arith.constant 0 : index
    %160 = vector.load %arg2[%c7, %c0_61] : memref<12x256xf32, #tpu.memory_space<vmem>>, vector<1x256xf32>
    %161 = vector.shape_cast %160 : vector<1x256xf32> to vector<1x1x256xf32>
    %162 = vector.broadcast %159 : vector<1x1x256xf32> to vector<2x8x256xf32>
    %163 = arith.mulf %157, %162 : vector<2x8x256xf32>
    %164 = vector.broadcast %161 : vector<1x1x256xf32> to vector<2x8x256xf32>
    %165 = arith.addf %163, %164 : vector<2x8x256xf32>
    %cst_62 = arith.constant 0.000000e+00 : f32
    %166 = vector.broadcast %cst_62 : f32 to vector<2x8x256xf32>
    %167 = arith.maximumf %165, %166 : vector<2x8x256xf32>
    %168 = vector.shape_cast %167 : vector<2x8x256xf32> to vector<16x256xf32>
    %169 = arith.truncf %168 : vector<16x256xf32> to vector<16x256xbf16>
    %c7_63 = arith.constant 7 : index
    %c0_64 = arith.constant 0 : index
    %c0_65 = arith.constant 0 : index
    %170 = vector.load %arg3[%c7_63, %c0_64, %c0_65] : memref<12x256x256xbf16, #tpu.memory_space<vmem>>, vector<1x256x256xbf16>
    %171 = vector.shape_cast %170 : vector<1x256x256xbf16> to vector<256x256xbf16>
    %cst_66 = arith.constant dense<0.000000e+00> : vector<16x256xf32>
    %172 = tpu.matmul %169, %171, %cst_66 {dimension_numbers = #tpu.dot_dimension_numbers<[1], [0], [0], [1], [0, 0, 1, 1], [], []>} : vector<16x256xbf16>, vector<256x256xbf16>, vector<16x256xf32> -> vector<16x256xf32>
    %c6_67 = arith.constant 6 : index
    %c0_68 = arith.constant 0 : index
    %c0_69 = arith.constant 0 : index
    %173 = vector.load %arg3[%c6_67, %c0_68, %c0_69] : memref<12x256x256xbf16, #tpu.memory_space<vmem>>, vector<1x256x256xbf16>
    %174 = vector.shape_cast %173 : vector<1x256x256xbf16> to vector<256x256xbf16>
    %cst_70 = arith.constant dense<0.000000e+00> : vector<16x256xf32>
    %175 = tpu.matmul %169, %174, %cst_70 {dimension_numbers = #tpu.dot_dimension_numbers<[1], [0], [0], [1], [0, 0, 1, 1], [], []>} : vector<16x256xbf16>, vector<256x256xbf16>, vector<16x256xf32> -> vector<16x256xf32>
    %176 = vector.broadcast %20 : vector<16x1xf32> to vector<16x256xf32>
    %177 = arith.mulf %175, %176 : vector<16x256xf32>
    %178 = vector.extract_strided_slice %177 {offsets = [0, 0], sizes = [15, 256], strides = [1, 1]} : vector<16x256xf32> to vector<15x256xf32>
    %179 = tpu.concatenate %25, %178 in 0 : vector<1x256xf32>, vector<15x256xf32> -> vector<16x256xf32>
    %180 = arith.addf %172, %179 : vector<16x256xf32>
    %c8 = arith.constant 8 : index
    %c0_71 = arith.constant 0 : index
    %c0_72 = arith.constant 0 : index
    %181 = vector.load %arg3[%c8, %c0_71, %c0_72] : memref<12x256x256xbf16, #tpu.memory_space<vmem>>, vector<1x256x256xbf16>
    %182 = vector.shape_cast %181 : vector<1x256x256xbf16> to vector<256x256xbf16>
    %cst_73 = arith.constant dense<0.000000e+00> : vector<16x256xf32>
    %183 = tpu.matmul %169, %182, %cst_73 {dimension_numbers = #tpu.dot_dimension_numbers<[1], [0], [0], [1], [0, 0, 1, 1], [], []>} : vector<16x256xbf16>, vector<256x256xbf16>, vector<16x256xf32> -> vector<16x256xf32>
    %184 = vector.broadcast %24 : vector<16x1xf32> to vector<16x256xf32>
    %185 = arith.mulf %183, %184 : vector<16x256xf32>
    %186 = vector.extract_strided_slice %185 {offsets = [1, 0], sizes = [15, 256], strides = [1, 1]} : vector<16x256xf32> to vector<15x256xf32>
    %187 = tpu.concatenate %186, %25 in 0 : vector<15x256xf32>, vector<1x256xf32> -> vector<16x256xf32>
    %188 = arith.addf %180, %187 : vector<16x256xf32>
    %c8_74 = arith.constant 8 : index
    %c0_75 = arith.constant 0 : index
    %189 = vector.load %arg2[%c8_74, %c0_75] : memref<12x256xf32, #tpu.memory_space<vmem>>, vector<1x256xf32>
    %190 = vector.broadcast %189 : vector<1x256xf32> to vector<16x256xf32>
    %191 = arith.addf %188, %190 : vector<16x256xf32>
    %192 = vector.shape_cast %191 : vector<16x256xf32> to vector<2x8x256xf32>
    %cst_76 = arith.constant dense<0.000000e+00> : vector<2x8xf32>
    %193 = vector.multi_reduction <add>, %192, %cst_76 [2] : vector<2x8x256xf32> to vector<2x8xf32>
    %194 = vector.shape_cast %193 : vector<2x8xf32> to vector<2x8x1xf32>
    %cst_77 = arith.constant dense<0.000000e+00> : vector<2x1xf32>
    %195 = vector.multi_reduction <add>, %194, %cst_77 [1] : vector<2x8x1xf32> to vector<2x1xf32>
    %196 = vector.shape_cast %195 : vector<2x1xf32> to vector<2x1x1xf32>
    %cst_78 = arith.constant 4.8828125E-4 : f32
    %197 = vector.broadcast %cst_78 : f32 to vector<2x1x1xf32>
    %198 = arith.mulf %196, %197 : vector<2x1x1xf32>
    %199 = vector.broadcast %198 : vector<2x1x1xf32> to vector<2x8x256xf32>
    %200 = arith.subf %192, %199 : vector<2x8x256xf32>
    %201 = arith.mulf %200, %200 : vector<2x8x256xf32>
    %cst_79 = arith.constant dense<0.000000e+00> : vector<2x8xf32>
    %202 = vector.multi_reduction <add>, %201, %cst_79 [2] : vector<2x8x256xf32> to vector<2x8xf32>
    %203 = vector.shape_cast %202 : vector<2x8xf32> to vector<2x8x1xf32>
    %cst_80 = arith.constant dense<0.000000e+00> : vector<2x1xf32>
    %204 = vector.multi_reduction <add>, %203, %cst_80 [1] : vector<2x8x1xf32> to vector<2x1xf32>
    %205 = vector.shape_cast %204 : vector<2x1xf32> to vector<2x1x1xf32>
    %cst_81 = arith.constant 4.8828125E-4 : f32
    %206 = vector.broadcast %cst_81 : f32 to vector<2x1x1xf32>
    %207 = arith.mulf %205, %206 : vector<2x1x1xf32>
    %cst_82 = arith.constant 9.99999974E-6 : f32
    %208 = vector.broadcast %cst_82 : f32 to vector<2x1x1xf32>
    %209 = arith.addf %207, %208 : vector<2x1x1xf32>
    %210 = math.rsqrt %209 : vector<2x1x1xf32>
    %211 = vector.broadcast %210 : vector<2x1x1xf32> to vector<2x8x256xf32>
    %212 = arith.mulf %200, %211 : vector<2x8x256xf32>
    %c9 = arith.constant 9 : index
    %c0_83 = arith.constant 0 : index
    %213 = vector.load %arg2[%c9, %c0_83] : memref<12x256xf32, #tpu.memory_space<vmem>>, vector<1x256xf32>
    %214 = vector.shape_cast %213 : vector<1x256xf32> to vector<1x1x256xf32>
    %c10 = arith.constant 10 : index
    %c0_84 = arith.constant 0 : index
    %215 = vector.load %arg2[%c10, %c0_84] : memref<12x256xf32, #tpu.memory_space<vmem>>, vector<1x256xf32>
    %216 = vector.shape_cast %215 : vector<1x256xf32> to vector<1x1x256xf32>
    %217 = vector.broadcast %214 : vector<1x1x256xf32> to vector<2x8x256xf32>
    %218 = arith.mulf %212, %217 : vector<2x8x256xf32>
    %219 = vector.broadcast %216 : vector<1x1x256xf32> to vector<2x8x256xf32>
    %220 = arith.addf %218, %219 : vector<2x8x256xf32>
    %cst_85 = arith.constant 0.000000e+00 : f32
    %221 = vector.broadcast %cst_85 : f32 to vector<2x8x256xf32>
    %222 = arith.maximumf %220, %221 : vector<2x8x256xf32>
    %223 = vector.shape_cast %222 : vector<2x8x256xf32> to vector<16x256xf32>
    %224 = arith.truncf %223 : vector<16x256xf32> to vector<16x256xbf16>
    %c10_86 = arith.constant 10 : index
    %c0_87 = arith.constant 0 : index
    %c0_88 = arith.constant 0 : index
    %225 = vector.load %arg3[%c10_86, %c0_87, %c0_88] : memref<12x256x256xbf16, #tpu.memory_space<vmem>>, vector<1x256x256xbf16>
    %226 = vector.shape_cast %225 : vector<1x256x256xbf16> to vector<256x256xbf16>
    %cst_89 = arith.constant dense<0.000000e+00> : vector<16x256xf32>
    %227 = tpu.matmul %224, %226, %cst_89 {dimension_numbers = #tpu.dot_dimension_numbers<[1], [0], [0], [1], [0, 0, 1, 1], [], []>} : vector<16x256xbf16>, vector<256x256xbf16>, vector<16x256xf32> -> vector<16x256xf32>
    %c9_90 = arith.constant 9 : index
    %c0_91 = arith.constant 0 : index
    %c0_92 = arith.constant 0 : index
    %228 = vector.load %arg3[%c9_90, %c0_91, %c0_92] : memref<12x256x256xbf16, #tpu.memory_space<vmem>>, vector<1x256x256xbf16>
    %229 = vector.shape_cast %228 : vector<1x256x256xbf16> to vector<256x256xbf16>
    %cst_93 = arith.constant dense<0.000000e+00> : vector<16x256xf32>
    %230 = tpu.matmul %224, %229, %cst_93 {dimension_numbers = #tpu.dot_dimension_numbers<[1], [0], [0], [1], [0, 0, 1, 1], [], []>} : vector<16x256xbf16>, vector<256x256xbf16>, vector<16x256xf32> -> vector<16x256xf32>
    %231 = vector.broadcast %20 : vector<16x1xf32> to vector<16x256xf32>
    %232 = arith.mulf %230, %231 : vector<16x256xf32>
    %233 = vector.extract_strided_slice %232 {offsets = [0, 0], sizes = [15, 256], strides = [1, 1]} : vector<16x256xf32> to vector<15x256xf32>
    %234 = tpu.concatenate %25, %233 in 0 : vector<1x256xf32>, vector<15x256xf32> -> vector<16x256xf32>
    %235 = arith.addf %227, %234 : vector<16x256xf32>
    %c11 = arith.constant 11 : index
    %c0_94 = arith.constant 0 : index
    %c0_95 = arith.constant 0 : index
    %236 = vector.load %arg3[%c11, %c0_94, %c0_95] : memref<12x256x256xbf16, #tpu.memory_space<vmem>>, vector<1x256x256xbf16>
    %237 = vector.shape_cast %236 : vector<1x256x256xbf16> to vector<256x256xbf16>
    %cst_96 = arith.constant dense<0.000000e+00> : vector<16x256xf32>
    %238 = tpu.matmul %224, %237, %cst_96 {dimension_numbers = #tpu.dot_dimension_numbers<[1], [0], [0], [1], [0, 0, 1, 1], [], []>} : vector<16x256xbf16>, vector<256x256xbf16>, vector<16x256xf32> -> vector<16x256xf32>
    %239 = vector.broadcast %24 : vector<16x1xf32> to vector<16x256xf32>
    %240 = arith.mulf %238, %239 : vector<16x256xf32>
    %241 = vector.extract_strided_slice %240 {offsets = [1, 0], sizes = [15, 256], strides = [1, 1]} : vector<16x256xf32> to vector<15x256xf32>
    %242 = tpu.concatenate %241, %25 in 0 : vector<15x256xf32>, vector<1x256xf32> -> vector<16x256xf32>
    %243 = arith.addf %235, %242 : vector<16x256xf32>
    %c11_97 = arith.constant 11 : index
    %c0_98 = arith.constant 0 : index
    %244 = vector.load %arg2[%c11_97, %c0_98] : memref<12x256xf32, #tpu.memory_space<vmem>>, vector<1x256xf32>
    %245 = vector.broadcast %244 : vector<1x256xf32> to vector<16x256xf32>
    %246 = arith.addf %243, %245 : vector<16x256xf32>
    %247 = vector.shape_cast %246 : vector<16x256xf32> to vector<2x8x256xf32>
    %248 = arith.addf %247, %137 : vector<2x8x256xf32>
    %c0_99 = arith.constant 0 : index
    %c0_100 = arith.constant 0 : index
    %c0_101 = arith.constant 0 : index
    %249 = vector.load %arg4[%c0_99, %c0_100, %c0_101] : memref<2x8x256xf32, #tpu.memory_space<vmem>>, vector<2x8x256xf32>
    tpu.vector_store %arg4[%c0_99, %c0_100, %c0_101], %248 {strides = array<i32>} : memref<2x8x256xf32, #tpu.memory_space<vmem>>, vector<2x8x256xf32>,
    return
  }
  func.func @transform_0(%arg0: i32) -> (i32, i32, i32) {
    %c0_i32 = arith.constant 0 : i32
    %c0_i32_0 = arith.constant 0 : i32
    %c0_i32_1 = arith.constant 0 : i32
    return %arg0, %c0_i32, %c0_i32_0 : i32, i32, i32
  }
  func.func @transform_1(%arg0: i32) -> (i32, i32) {
    %c0_i32 = arith.constant 0 : i32
    %c0_i32_0 = arith.constant 0 : i32
    %c0_i32_1 = arith.constant 0 : i32
    return %c0_i32, %c0_i32_0 : i32, i32
  }
  func.func @transform_2(%arg0: i32) -> (i32, i32, i32) {
    %c0_i32 = arith.constant 0 : i32
    %c0_i32_0 = arith.constant 0 : i32
    %c0_i32_1 = arith.constant 0 : i32
    %c0_i32_2 = arith.constant 0 : i32
    return %c0_i32, %c0_i32_0, %c0_i32_1 : i32, i32, i32
  }
  func.func @transform_3(%arg0: i32) -> (i32, i32, i32) {
    %c0_i32 = arith.constant 0 : i32
    %c0_i32_0 = arith.constant 0 : i32
    %c0_i32_1 = arith.constant 0 : i32
    return %arg0, %c0_i32, %c0_i32_0 : i32, i32, i32
  }
}

</mosaic_0001>

<bundles_post_ra>
// kernel: _conv_block2_forward.1
= control target key start
LH: loop header
LB: loop body
LE: loop exit
PB: predicated region body
PF: predicated region fallthrough
CT: control target
= control target key end

     0   :  { %8 = vsyncpa [#allocation3], 0  ;;  %s6662_s0 = inlined_call_operand.hbm [shape: f32[4,8,256], index: 0, kind: input, shape index: {}]   ;;  %s6663_s1 = inlined_call_operand.hbm [shape: f32[12,256], index: 1, kind: input, shape index: {}]   ;;  %s6664_s2 = inlined_call_operand.hbm [shape: bf16[12,256,256], index: 2, kind: input, shape index: {}]   ;;  %s6665_s3 = inlined_call_operand.hbm [shape: f32[4,8,256], index: 3, kind: output, shape index: {}]  }
   0x1   :  { %10 = vsyncpa [#allocation3 + $0x1], 0 }
   0x2   :  { %11 = vsyncpa [#allocation6], 0 }
   0x3   :  { %12 = vsyncpa [#allocation4], 0 }
   0x4   :  { %14 = vsyncpa [#allocation4 + $0x1], 0  ;;  %s6240_s12 = smov 0   ;;  %s6242_s13 = smov 0  }
   0x5   :  { %s6244_s14 = smov 0   ;;  %s6246_s15 = smov 0  }
   0x6 LB: > { %s6261_s16 = sadd.s32 4294967295, %s6209_s15   ;;  %s4007_s17 = sadd.s32 4294967294, %s6209_s15   ;;  %s6209_s15 = sphi %s6246_s15, %s6675_s15   ;;  %s6205_s14 = sphi %s6244_s14, %s6674_s14   ;;  %s6201_s13 = sphi %s6242_s13, %s6673_s13   ;;  %s6197_s12 = sphi %s6240_s12, %s6672_s12  }
   0x7   : > { %p40_p0 = scmp.ne.s32.totalorder %s6201_s13, %s6197_s12  ;;  %p41_p1 = scmp.eq.s32.totalorder %s6261_s16, 0 }
   0x8   : > { %p106_p2 = scmp.eq.s32.totalorder %s6261_s16, 1  ;;  %p112_p3 = scmp.eq.s32.totalorder %s4007_s17, 1 }
   0x9   : > { %p6270_p4 = por %p41_p1, %p40_p0  ;;  %p4008_p5 = scmp.ge.s32.totalorder %s6209_s15, 1 }
   0xa   : > { %p6275_p6 = por %p112_p3, %p40_p0  ;;  %p119_p7 = scmp.lt.s32.totalorder %s6209_s15, 3 }
   0xb   : > { %s130_s22 = sshll.u32 %s6663_s1, 4  ;;  %s6211_s24 = smov [#allocation5]   ;;  %s131_s22 = int_to_ptr.hbm [resolvable:$true] %s130_s22 }
   0xc   : > { %p6283_p8 = pnand %p4008_p5, %p119_p7  ;;  %s132_s25 = sshll.u32 %s6211_s24, 4  ;;  %s133_s25 = int_to_ptr.vmem [resolvable:$true] %s132_s25 }
   0xd   : > { %s144_s28 = sshll.u32 %s6664_s2, 4  ;;  %s6212_s29 = smov 256   ;;  %s145_s28 = int_to_ptr.hbm [resolvable:$true] %s144_s28 }
   0xe   : > { %p5967_p9 = pneg %p6283_p8  ;;  %s6213_s30 = smov 16  }
   0xf   : > { %s6214_s4 = smov [#allocation7]   ;;  %s6215_s6 = smov 128  }
  0x10   : > { %p5968_p10 = pnand %p5967_p9, %p41_p1  ;;  %s146_s5 = sshll.u32 %s6214_s4, 4  ;;  %s147_s5 = int_to_ptr.vmem [resolvable:$true] %s146_s5 }
  0x11   : > { %s6216_s7 = smov 8   ;;  %s6299_s8 = sadd.s32 1, %s6209_s15  }
  0x12   : > { %5970 = dma.hbm_to_vmem [thread:$0]  (!%p5968_p10), %s131_s22, 512, %s133_s25, [#allocation6], %s6212_s29, %s6212_s29, %s6213_s30  }
  0x13   : > { %5973 = dma.hbm_to_vmem [thread:$0]  (!%p5968_p10), %s145_s28, 49152, %s147_s5, [#allocation6], %s6215_s6, %s6215_s6, %s6216_s7  }
  0x14   : > { %s24_s9 = ssub.s32 %s6209_s15, %s6299_s8  ;;  %s27_s10 = sadd.s32 1, %s6205_s14 }
  0x15   : > { %p25_p12 = scmp.eq.s32.totalorder %s24_s9, 0  ;;  %p34_p13 = scmp.ne.s32.totalorder %s6205_s14, %s6201_s13 }
  0x16   : > { %p35_p0 = scmp.eq.s32.totalorder %s6209_s15, 0  ;;  %p5984_p7 = scmp.lt.s32.totalorder %s6209_s15, 2 }
  0x17   : > { %s6308_s11 = scalar_select %p25_p12, %s6205_s14, %s27_s10  }
  0x18   : > { %p36_p3 = por %p35_p0, %p34_p13  ;;  %p6312_p5 = por %p106_p2, %p34_p13 }
  0x19   : > { %s160_s20 = sand.u32 1, %s6205_s14   ;;  %s5568_s22 = sshll.u32 %s6209_s15, 5 }
  0x1a   : > { %s4012_s21 = sshll.u32 %s160_s20, 5  ;;  %s170_s26 = scalar_lea.hbm %s6662_s0, %s5568_s22 }
  0x1b   : > { %s164_s27 = scalar_lea.vmem [#allocation2], %s4012_s21  ;;  %s171_s4 = sshll.u32 %s170_s26, 4  ;;  %s172_s4 = int_to_ptr.hbm [resolvable:$true] %s171_s4 }
  0x1c   : > { %s173_s28 = sshll.u32 %s164_s27, 4  ;;  %p6322_p9 = pnand %p5984_p7, %p36_p3  ;;  %s174_s28 = int_to_ptr.vmem [resolvable:$true] %s173_s28 }
  0x1d   : > { %s161_s6 = scalar_lea.sflag [#allocation3], %s160_s20  ;;  %s6109_s7 = sshra.s32 %s172_s4, 4  ;;  %s6110_s7 = int_to_ptr.hbm [resolvable:$true] %s6109_s7 }
  0x1e   : > { %s6111_s9 = scalar_lea.hbm %s6110_s7, 32  ;;  %p6113_p10 = pneg %p6322_p9 }
  0x1f   : > { %p6112_p2 = scmp.ne.s32.totalorder %s6110_s7, %s6111_s9  ;;  %s6116_s22 = scalar_lea.hbm %s6662_s0, 64 }
  0x20   : > { %p6117_p0 = scmp.lt.s32.totalorder %s6110_s7, %s6662_s0  ;;  %p6118_p3 = scmp.lt.s32.totalorder %s6116_s22, %s6111_s9 }
  0x21   : > { %p6114_p12 = pnand %p6113_p10, %p6112_p2 }
  0x22   : > { %p6119_p7 = por %p6118_p3, %p6117_p0 }
  0x23   : > { %p6115_p13 = pneg %p6114_p12 }
  0x25   : > { %p6120_p11 = pnand %p6119_p7, %p6115_p13 }
  0x27   : > { %6123 = shalt.err (!%p6120_p11)
}
  0x28   : > { %5977 = dma.hbm_to_vmem [thread:$0]  (!%p6322_p9), %s172_s4, 512, %s174_s28, %s161_s6, %s6212_s29, %s6212_s29, %s6213_s30  }
  0x29   : > { %185 = sbr.rel (%p6283_p8) target bundleno = 2009 (0x7d9), region = 32  ;;  %s6342_s20 = sand.u32 (!%p6283_p8), 1, %s6201_s13  }
  0x2a   : > { %s4017_s26 = sshll.u32 (!%p6283_p8), %s6342_s20, 5  ;;  %s188_s27 = scalar_lea.sflag (!%p6283_p8), [#allocation3], %s6342_s20 }
  0x2b   : > { %s6348_s7 = scalar_lea.vmem (!%p6283_p8), [#allocation2], %s4017_s26 }
  0x2e   : > { %6184 = dma.done.wait (%p6270_p4), %s188_s27, 512  }
  0x2f   : > { %6186 = vsyncadd (%p6270_p4), %s188_s27, 4294966784 }
  0x30   : > { %6188 = dma.done.wait (%p41_p1), [#allocation6], 49664  }
  0x31   : > { %6190 = vsyncadd (%p41_p1), [#allocation6], 4294917632  ;;  %v266_v0 = vld [vmem:[%s6348_s7] sm:$0xff]  ;;  %v267_v1 = vld [vmem:[%s6348_s7 + $0x8] sm:$0xff]  ;;  %vm660_vm10 = vcmask 1040384   ;;  %vm1146_vm11 = vcmask 1046528  }
  0x32   : > { %v270_v2 = vadd.f32 %v267_v1, %v266_v0  ;;  %v268_v3 = vld [vmem:[%s6348_s7 + $0x10] sm:$0xff]  ;;  %v269_v4 = vld [vmem:[%s6348_s7 + $0x18] sm:$0xff]  ;;  %v4075_v17 = vld [vmem:[#allocation7 + $0x60] sm:$0xf]  ;;  %s5954_s18 = sshll.u32 %s6261_s16, 5  ;;  %s224_s28 = scalar_lea.vmem [#allocation8], %s4017_s26 }
  0x33   : > { %v273_v5 = vadd.f32 %v269_v4, %v268_v3  ;;  %v4083_v6 = vld [vmem:[#allocation7 + $0x70] sm:$0xf]  ;;  %v5616_v7 = vld [vmem:[#allocation7 + $0x74] sm:$0xf0]  ;;  %v5615_v11 = vld [vmem:[#allocation7 + $0x74] sm:$0xf]  ;;  %s3911_s30 = scalar_lea.hbm %s6665_s3, %s5954_s18 }
  0x34   : > { %271 = vadd.xlane.f32.xlu0 %v270_v2  ;;  %v4147_v8 = vld [vmem:[#allocation7 + $0xf0] sm:$0xf]  ;;  %v4084_v9 = vor.u32 %v5616_v7, %v4083_v6  ;;  %v5632_v10 = vld [vmem:[#allocation7 + $0xf4] sm:$0xf0]  ;;  %v4085_v12 = vld [vmem:[#allocation7 + $0x78] sm:$0xf0] }
  0x35   : > { %v4148_v13 = vor.u32 %v5632_v10, %v4147_v8  ;;  %v4088_v14 = vor.u32 %v5615_v11, %v4085_v12  ;;  %v5631_v15 = vld [vmem:[#allocation7 + $0xf4] sm:$0xf]  ;;  %v4149_v16 = vld [vmem:[#allocation7 + $0xf8] sm:$0xf0]  ;;  %v5614_v20 = vld [vmem:[#allocation7 + $0x64] sm:$0xf0] }
  0x36   : > { %596 = vmatpush.bf16.msra.mxu0 %v4084_v9  ;;  %v4152_v19 = vor.u32 %v5631_v15, %v4149_v16  ;;  %v4139_v21 = vld [vmem:[#allocation7 + $0xe0] sm:$0xf]  ;;  %v5630_v22 = vld [vmem:[#allocation7 + $0xe4] sm:$0xf0]  ;;  %v4076_v24 = vor.u32 %v5614_v20, %v4075_v17  ;;  %v5613_v26 = vld [vmem:[#allocation7 + $0x64] sm:$0xf] }
  0x37   : > { %610 = vmatpush.bf16.msra.mxu1 %v4148_v13  ;;  %624 = vmatpush.bf16.msra.mxu2 %v4088_v14  ;;  %v4140_v25 = vor.u32 %v5630_v22, %v4139_v21  ;;  %v4077_v27 = vld [vmem:[#allocation7 + $0x68] sm:$0xf0]  ;;  %v5629_v29 = vld [vmem:[#allocation7 + $0xe4] sm:$0xf]  ;;  %v4067_v56 = vld [vmem:[#allocation7 + $0x50] sm:$0xf] }
  0x38   : > { %638 = vmatpush.bf16.msra.mxu3 %v4152_v19  ;;  %v4080_v28 = vor.u32 %v5613_v26, %v4077_v27  ;;  %v4141_v30 = vld [vmem:[#allocation7 + $0xe8] sm:$0xf0]  ;;  %v5612_v57 = vld [vmem:[#allocation7 + $0x54] sm:$0xf0]  ;;  %v4131_v58 = vld [vmem:[#allocation7 + $0xd0] sm:$0xf] }
  0x39   : > { %v4144_v32 = vor.u32 %v5629_v29, %v4141_v30  ;;  %v4068_v59 = vor.u32 %v5612_v57, %v4067_v56  ;;  %v5628_v60 = vld [vmem:[#allocation7 + $0xd4] sm:$0xf0]  ;;  %v5611_v61 = vld [vmem:[#allocation7 + $0x54] sm:$0xf]  ;;  %v4069_v62 = vld [vmem:[#allocation7 + $0x58] sm:$0xf0] }
  0x3a   : > { %597 = vmatpush.bf16.msra.mxu0 %v4076_v24  ;;  %v4132_v63 = vor.u32 %v5628_v60, %v4131_v58  ;;  %v4133_v2 = vld [vmem:[#allocation7 + $0xd8] sm:$0xf0]  ;;  %v4123_v6 = vld [vmem:[#allocation7 + $0xc0] sm:$0xf]  ;;  %v5626_v8 = vld [vmem:[#allocation7 + $0xc4] sm:$0xf0] }
  0x3b   : > { %611 = vmatpush.bf16.msra.mxu1 %v4140_v25  ;;  %625 = vmatpush.bf16.msra.mxu2 %v4080_v28  ;;  %v5609_v9 = vld [vmem:[#allocation7 + $0x44] sm:$0xf]  ;;  %v4061_v10 = vld [vmem:[#allocation7 + $0x48] sm:$0xf0]  ;;  %v4124_v11 = vor.u32 %v5626_v8, %v4123_v6  ;;  %v4051_v16 = vld [vmem:[#allocation7 + $0x30] sm:$0xf] }
  0x3c   : > { %274 = vadd.xlane.f32.xlu0 %v273_v5  ;;  %639 = vmatpush.bf16.msra.mxu3 %v4144_v32  ;;  %v5610_v5 = vld [vmem:[#allocation7 + $0x44] sm:$0xf0]  ;;  %v4064_v12 = vor.u32 %v5609_v9, %v4061_v10  ;;  %v5625_v13 = vld [vmem:[#allocation7 + $0xc4] sm:$0xf]  ;;  %v4125_v14 = vld [vmem:[#allocation7 + $0xc8] sm:$0xf0] }
  0x3d   : > { %v4128_v15 = vor.u32 %v5625_v13, %v4125_v14  ;;  %v5608_v17 = vld [vmem:[#allocation7 + $0x34] sm:$0xf0]  ;;  %v5607_v21 = vld [vmem:[#allocation7 + $0x34] sm:$0xf]  ;;  %v4053_v22 = vld [vmem:[#allocation7 + $0x38] sm:$0xf0] }
  0x3e   : > { %598 = vmatpush.bf16.msra.mxu0 %v4068_v59  ;;  %v4052_v19 = vor.u32 %v5608_v17, %v4051_v16  ;;  %v5624_v20 = vld [vmem:[#allocation7 + $0xb4] sm:$0xf0]  ;;  %v4056_v24 = vor.u32 %v5607_v21, %v4053_v22  ;;  %v5623_v25 = vld [vmem:[#allocation7 + $0xb4] sm:$0xf]  ;;  %v4117_v26 = vld [vmem:[#allocation7 + $0xb8] sm:$0xf0] }
  0x3f   : > { %612 = vmatpush.bf16.msra.mxu1 %v4132_v63  ;;  %v4120_v27 = vor.u32 %v5623_v25, %v4117_v26  ;;  %v4043_v28 = vld [vmem:[#allocation7 + $0x20] sm:$0xf]  ;;  %v5606_v29 = vld [vmem:[#allocation7 + $0x24] sm:$0xf0]  ;;  %v4275_v6 = vld [vmem:[#allocation7 + $0x1f0] sm:$0xf] }
  0x40   : > { %v4107_v30 = vld [vmem:[#allocation7 + $0xa0] sm:$0xf]  ;;  %v5622_v32 = vld [vmem:[#allocation7 + $0xa4] sm:$0xf0]  ;;  %v5583_v10 = vld [vmem:[#allocation7 + $0x174] sm:$0xf] }
  0x41   : > { %v4027_v56 = vld [vmem:[#allocation7] sm:$0xf]  ;;  %v5602_v57 = vld [vmem:[#allocation7 + $0x4] sm:$0xf0]  ;;  %v4277_v14 = vld [vmem:[#allocation7 + $0x1f8] sm:$0xf0] }
  0x42   : > { %v4091_v58 = vld [vmem:[#allocation7 + $0x80] sm:$0xf]  ;;  %v4028_v59 = vor.u32 %v5602_v57, %v4027_v56  ;;  %v5618_v60 = vld [vmem:[#allocation7 + $0x84] sm:$0xf0]  ;;  %v5581_v21 = vld [vmem:[#allocation7 + $0x164] sm:$0xf] }
  0x43   : > { %613 = vmatpush.bf16.msra.mxu1 %v4124_v11  ;;  %v4092_v63 = vor.u32 %v5618_v60, %v4091_v58  ;;  %v4213_v11 = vld [vmem:[#allocation7 + $0x178] sm:$0xf0]  ;;  %v5582_v16 = vld [vmem:[#allocation7 + $0x164] sm:$0xf0]  ;;  %v4269_v25 = vld [vmem:[#allocation7 + $0x1e8] sm:$0xf0] }
  0x44   : > { %v4216_v13 = vor.u32 %v5583_v10, %v4213_v11  ;;  %v5593_v56 = vld [vmem:[#allocation7 + $0x1c4] sm:$0xf]  ;;  %v4253_v57 = vld [vmem:[#allocation7 + $0x1c8] sm:$0xf0]  ;;  %v4179_v60 = vld [vmem:[#allocation7 + $0x130] sm:$0xf] }
  0x45   : > { %s3912_s16 = sshll.u32 %s224_s28, 4  ;;  %s3914_s4 = sshll.u32 %s3911_s30, 4  ;;  %s3913_s16 = int_to_ptr.vmem [resolvable:$true] %s3912_s16  ;;  %s3915_s4 = int_to_ptr.hbm [resolvable:$true] %s3914_s4 }
  0x46   : > { %s3899_s5 = scalar_lea.sflag [#allocation4], %s6342_s20  ;;  %s6153_s6 = sshra.s32 %s3915_s4, 4  ;;  %s6154_s6 = int_to_ptr.hbm [resolvable:$true] %s6153_s6 }
  0x47   : > { %s6155_s9 = scalar_lea.hbm %s6154_s6, 32  ;;  %s6159_s22 = scalar_lea.hbm %s6665_s3, 64 }
  0x48   : > { %p6156_p1 = scmp.ne.s32.totalorder %s6154_s6, %s6155_s9  ;;  %p6160_p11 = scmp.lt.s32.totalorder %s6154_s6, %s6665_s3 }
  0x49   : > { %p6161_p9 = scmp.lt.s32.totalorder %s6159_s22, %s6155_s9 }
  0x4a   : > { %p6157_p4 = pnand %p6156_p1, %p6312_p5 }
  0x4b   : > { %p6162_p2 = por %p6161_p9, %p6160_p11 }
  0x4c   : > { %p6158_p8 = pneg %p6157_p4 }
  0x4e   : > { %p6163_p10 = pnand %p6162_p2, %p6158_p8 }
  0xa7   : > { %v272_v18 = vpop.xlane.xlu0 %271 }
  0xa8   : > { %v276_v23 = vrot.slane %v272_v18, 4 }
  0xaa   : > { %v277_v31 = vadd.f32 %v276_v23, %v272_v18  ;;  %v4115_v18 = vld [vmem:[#allocation7 + $0xb0] sm:$0xf] }
  0xab   : > { %v4116_v23 = vor.u32 %v5624_v20, %v4115_v18  ;;  %v5598_v20 = vld [vmem:[#allocation7 + $0x1e4] sm:$0xf0] }
  0xac   : > { %v278_v33 = vrot.slane %v277_v31, 2 }
  0xad   : > { %614 = vmatpush.bf16.msra.mxu1 %v4116_v23  ;;  %v4205_v23 = vld [vmem:[#allocation7 + $0x168] sm:$0xf0] }
  0xae   : > { %v279_v34 = vadd.f32 %v278_v33, %v277_v31  ;;  %v4044_v31 = vor.u32 %v5606_v29, %v4043_v28  ;;  %v5605_v33 = vld [vmem:[#allocation7 + $0x24] sm:$0xf]  ;;  %v4208_v26 = vor.u32 %v5581_v21, %v4205_v23  ;;  %v4195_v28 = vld [vmem:[#allocation7 + $0x150] sm:$0xf]  ;;  %v5580_v29 = vld [vmem:[#allocation7 + $0x154] sm:$0xf0] }
  0xaf   : > { %v275_v35 = vpop.xlane.xlu0 %274  ;;  %v5589_v23 = vld [vmem:[#allocation7 + $0x1a4] sm:$0xf] }
  0xb0   : > { %v280_v36 = vrot.slane %v279_v34, 1  ;;  %v282_v37 = vrot.slane %v275_v35, 4 }
  0xb2   : > { %v281_v38 = vadd.f32 %v280_v36, %v279_v34  ;;  %v283_v39 = vadd.f32 %v282_v37, %v275_v35  ;;  %v4045_v34 = vld [vmem:[#allocation7 + $0x28] sm:$0xf0]  ;;  %v4108_v35 = vor.u32 %v5622_v32, %v4107_v30  ;;  %v5621_v37 = vld [vmem:[#allocation7 + $0xa4] sm:$0xf]  ;;  %v4259_v30 = vld [vmem:[#allocation7 + $0x1d0] sm:$0xf] }
  0xb3   : > { %v4048_v36 = vor.u32 %v5605_v33, %v4045_v34  ;;  %v5596_v32 = vld [vmem:[#allocation7 + $0x1d4] sm:$0xf0]  ;;  %v5579_v33 = vld [vmem:[#allocation7 + $0x154] sm:$0xf]  ;;  %v4197_v34 = vld [vmem:[#allocation7 + $0x158] sm:$0xf0] }
  0xb4   : > { %v284_v40 = vrot.slane %v283_v39, 2  ;;  %v288_v41 = vmul.f32 0.00048828125, %v281_v38  ;;  %v4109_v38 = vld [vmem:[#allocation7 + $0xa8] sm:$0xf0]  ;;  %615 = vmatpush.bf16.msra.mxu1 %v4108_v35 }
  0xb6   : > { %v285_v42 = vadd.f32 %v284_v40, %v283_v39  ;;  %v6362_v43 = vsub.f32 %v266_v0, %v288_v41  ;;  %v6364_v44 = vsub.f32 %v267_v1, %v288_v41  ;;  %v4072_v0 = vor.u32 %v5611_v61, %v4069_v62  ;;  %v5627_v1 = vld [vmem:[#allocation7 + $0xd4] sm:$0xf]  ;;  %v4035_v40 = vld [vmem:[#allocation7 + $0x10] sm:$0xf]  ;;  %v5604_v41 = vld [vmem:[#allocation7 + $0x14] sm:$0xf0] }
  0xb7   : > { %v4112_v39 = vor.u32 %v5621_v37, %v4109_v38  ;;  %v5601_v61 = vld [vmem:[#allocation7 + $0x4] sm:$0xf]  ;;  %v4029_v62 = vld [vmem:[#allocation7 + $0x8] sm:$0xf0]  ;;  %v4200_v37 = vor.u32 %v5579_v33, %v4197_v34  ;;  %v5595_v38 = vld [vmem:[#allocation7 + $0x1d4] sm:$0xf] }
  0xb8   : > { %v286_v45 = vrot.slane %v285_v42, 1  ;;  %v294_v46 = vmul.f32 %v6362_v43, %v6362_v43  ;;  %v295_v47 = vmul.f32 %v6364_v44, %v6364_v44  ;;  %626 = vmatpush.bf16.msra.mxu2 %v4072_v0  ;;  %v4032_v0 = vor.u32 %v5601_v61, %v4029_v62  ;;  %v5576_v61 = vld [vmem:[#allocation7 + $0x134] sm:$0xf0]  ;;  %v4243_v62 = vld [vmem:[#allocation7 + $0x1b0] sm:$0xf] }
  0xb9   : > { %v5588_v34 = vld [vmem:[#allocation7 + $0x194] sm:$0xf0] }
  0xba   : > { %v287_v48 = vadd.f32 %v286_v45, %v285_v42  ;;  %v298_v49 = vadd.f32 %v295_v47, %v294_v46  ;;  %v4099_v42 = vld [vmem:[#allocation7 + $0x90] sm:$0xf]  ;;  %v4036_v45 = vor.u32 %v5604_v41, %v4035_v40  ;;  %v5620_v46 = vld [vmem:[#allocation7 + $0x94] sm:$0xf0]  ;;  %v5603_v47 = vld [vmem:[#allocation7 + $0x14] sm:$0xf] }
  0xbc   : > { %v289_v50 = vmul.f32 0.00048828125, %v287_v48  ;;  %299 = vadd.xlane.f32.xlu1 %v298_v49  ;;  %627 = vmatpush.bf16.msra.mxu2 %v4064_v12  ;;  %v4037_v48 = vld [vmem:[#allocation7 + $0x18] sm:$0xf0]  ;;  %v4100_v49 = vor.u32 %v5620_v46, %v4099_v42  ;;  %v5599_v12 = vld [vmem:[#allocation7 + $0x1f4] sm:$0xf] }
  0xbd   : > { %v4280_v17 = vor.u32 %v5599_v12, %v4277_v14  ;;  %v4187_v42 = vld [vmem:[#allocation7 + $0x140] sm:$0xf] }
  0xbe   : > { %v6370_v51 = vsub.f32 %v268_v3, %v289_v50  ;;  %v6372_v52 = vsub.f32 %v269_v4, %v289_v50  ;;  %v4136_v3 = vor.u32 %v5627_v1, %v4133_v2  ;;  %v4059_v4 = vld [vmem:[#allocation7 + $0x40] sm:$0xf]  ;;  %v4040_v50 = vor.u32 %v5603_v47, %v4037_v48  ;;  %616 = vmatpush.bf16.msra.mxu1 %v4100_v49  ;;  %v5617_v1 = vld [vmem:[#allocation7 + $0x84] sm:$0xf]  ;;  %v4093_v2 = vld [vmem:[#allocation7 + $0x88] sm:$0xf0] }
  0xbf   : > { %v4060_v7 = vor.u32 %v5610_v5, %v4059_v4  ;;  %v4096_v4 = vor.u32 %v5617_v1, %v4093_v2  ;;  %v5584_v5 = vld [vmem:[#allocation7 + $0x174] sm:$0xf0]  ;;  %v4251_v46 = vld [vmem:[#allocation7 + $0x1c0] sm:$0xf]  ;;  %v5594_v49 = vld [vmem:[#allocation7 + $0x1c4] sm:$0xf0] }
  0xc0   : > { %v296_v53 = vmul.f32 %v6370_v51, %v6370_v51  ;;  %v297_v54 = vmul.f32 %v6372_v52, %v6372_v52  ;;  %640 = vmatpush.bf16.msra.mxu3 %v4136_v3  ;;  %628 = vmatpush.bf16.msra.mxu2 %v4056_v24  ;;  %v4211_v3 = vld [vmem:[#allocation7 + $0x170] sm:$0xf]  ;;  %v5597_v24 = vld [vmem:[#allocation7 + $0x1e4] sm:$0xf]  ;;  %v5592_v1 = vld [vmem:[#allocation7 + $0x1b4] sm:$0xf0] }
  0xc1   : > { %599 = vmatpush.bf16.msra.mxu0 %v4060_v7  ;;  %v5600_v7 = vld [vmem:[#allocation7 + $0x1f4] sm:$0xf0]  ;;  %v4212_v8 = vor.u32 %v5584_v5, %v4211_v3  ;;  %v5575_v2 = vld [vmem:[#allocation7 + $0x134] sm:$0xf]  ;;  %v4181_v3 = vld [vmem:[#allocation7 + $0x138] sm:$0xf0]  ;;  %v4244_v5 = vor.u32 %v5592_v1, %v4243_v62 }
  0xc2   : > { %v301_v55 = vadd.f32 %v297_v54, %v296_v53  ;;  %v5619_v53 = vld [vmem:[#allocation7 + $0x94] sm:$0xf]  ;;  %v4101_v54 = vld [vmem:[#allocation7 + $0x98] sm:$0xf0]  ;;  %617 = vmatpush.bf16.msra.mxu1 %v4092_v63  ;;  %v4276_v9 = vor.u32 %v5600_v7, %v4275_v6  ;;  %v4184_v6 = vor.u32 %v5575_v2, %v4181_v3  ;;  %v4171_v12 = vld [vmem:[#allocation7 + $0x120] sm:$0xf] }
  0xc3   : > { %v5591_v7 = vld [vmem:[#allocation7 + $0x1b4] sm:$0xf]  ;;  %v4235_v14 = vld [vmem:[#allocation7 + $0x1a0] sm:$0xf] }
  0xc4   : > { %302 = vadd.xlane.f32.xlu1 %v301_v55  ;;  %641 = vmatpush.bf16.msra.mxu3 %v4128_v15  ;;  %v4104_v55 = vor.u32 %v5619_v53, %v4101_v54  ;;  %v4203_v15 = vld [vmem:[#allocation7 + $0x160] sm:$0xf]  ;;  %v4189_v53 = vld [vmem:[#allocation7 + $0x148] sm:$0xf0]  ;;  %v4252_v54 = vor.u32 %v5594_v49, %v4251_v46 }
  0xc5   : > { %600 = vmatpush.bf16.msra.mxu0 %v4052_v19  ;;  %629 = vmatpush.bf16.msra.mxu2 %v4048_v36  ;;  %v4204_v18 = vor.u32 %v5582_v16, %v4203_v15  ;;  %v4267_v19 = vld [vmem:[#allocation7 + $0x1e0] sm:$0xf]  ;;  %v4260_v36 = vor.u32 %v5596_v32, %v4259_v30  ;;  %v4227_v30 = vld [vmem:[#allocation7 + $0x190] sm:$0xf] }
  0xc6   : > { %847 = vmatpush.bf16.msrb.mxu1 %v4276_v9  ;;  %v4268_v22 = vor.u32 %v5598_v20, %v4267_v19  ;;  %v5573_v19 = vld [vmem:[#allocation7 + $0x124] sm:$0xf]  ;;  %v4173_v20 = vld [vmem:[#allocation7 + $0x128] sm:$0xf0]  ;;  %v4155_v46 = vld [vmem:[#allocation7 + $0x100] sm:$0xf] }
  0xc8   : > { %642 = vmatpush.bf16.msra.mxu3 %v4120_v27  ;;  %v4272_v27 = vor.u32 %v5597_v24, %v4269_v25  ;;  %v4237_v24 = vld [vmem:[#allocation7 + $0x1a8] sm:$0xf0] }
  0xc9   : > { %601 = vmatpush.bf16.msra.mxu0 %v4044_v31  ;;  %630 = vmatpush.bf16.msra.mxu2 %v4040_v50  ;;  %v4196_v31 = vor.u32 %v5580_v29, %v4195_v28  ;;  %v5577_v50 = vld [vmem:[#allocation7 + $0x144] sm:$0xf]  ;;  %v4163_v28 = vld [vmem:[#allocation7 + $0x110] sm:$0xf]  ;;  %v5572_v29 = vld [vmem:[#allocation7 + $0x114] sm:$0xf0] }
  0xca   : > { %848 = vmatpush.bf16.msrb.mxu1 %v4268_v22  ;;  %v4176_v22 = vor.u32 %v5573_v19, %v4173_v20  ;;  %v4164_v33 = vor.u32 %v5572_v29, %v4163_v28  ;;  %v5648_v29 = vld [vmem:[#allocation7 + $0x274] sm:$0xf0] }
  0xcc   : > { %643 = vmatpush.bf16.msra.mxu3 %v4112_v39  ;;  %v4261_v39 = vld [vmem:[#allocation7 + $0x1d8] sm:$0xf0] }
  0xcd   : > { %602 = vmatpush.bf16.msra.mxu0 %v4036_v45  ;;  %631 = vmatpush.bf16.msra.mxu2 %v4032_v0  ;;  %v4264_v41 = vor.u32 %v5595_v38, %v4261_v39  ;;  %v5578_v45 = vld [vmem:[#allocation7 + $0x144] sm:$0xf0]  ;;  %v4180_v0 = vor.u32 %v5576_v61, %v4179_v60  ;;  %v5587_v38 = vld [vmem:[#allocation7 + $0x194] sm:$0xf]  ;;  %v4229_v39 = vld [vmem:[#allocation7 + $0x198] sm:$0xf0] }
  0xce   : > { %849 = vmatpush.bf16.msrb.mxu1 %v4260_v36  ;;  %v4188_v48 = vor.u32 %v5578_v45, %v4187_v42  ;;  %v4228_v36 = vor.u32 %v5588_v34, %v4227_v30  ;;  %v4232_v42 = vor.u32 %v5587_v38, %v4229_v39  ;;  %v4403_v30 = vld [vmem:[#allocation7 + $0x2f0] sm:$0xf]  ;;  %v5663_v34 = vld [vmem:[#allocation7 + $0x2f4] sm:$0xf] }
  0xd0   : > { %644 = vmatpush.bf16.msra.mxu3 %v4104_v55  ;;  %v4192_v55 = vor.u32 %v5577_v50, %v4189_v53  ;;  %v5586_v50 = vld [vmem:[#allocation7 + $0x184] sm:$0xf0]  ;;  %v5569_v53 = vld [vmem:[#allocation7 + $0x104] sm:$0xf] }
  0xd1   : > { %603 = vmatpush.bf16.msra.mxu0 %v4028_v59  ;;  %861 = vmatpush.bf16.msrb.mxu2 %v4216_v13  ;;  %v4256_v59 = vor.u32 %v5593_v56, %v4253_v57  ;;  %v5574_v13 = vld [vmem:[#allocation7 + $0x124] sm:$0xf0] }
  0xd2   : > { %850 = vmatpush.bf16.msrb.mxu1 %v4252_v54  ;;  %v4157_v54 = vld [vmem:[#allocation7 + $0x108] sm:$0xf0] }
  0xd3   : > { %v4160_v57 = vor.u32 %v5569_v53, %v4157_v54  ;;  %v4333_v53 = vld [vmem:[#allocation7 + $0x268] sm:$0xf0]  ;;  %v5661_v54 = vld [vmem:[#allocation7 + $0x2e4] sm:$0xf] }
  0xd4   : > { %645 = vmatpush.bf16.msra.mxu3 %v4096_v4 }
  0xd5   : > { %833 = vmatpush.bf16.msrb.mxu0 %v4212_v8  ;;  %862 = vmatpush.bf16.msrb.mxu2 %v4208_v26  ;;  %v4245_v8 = vld [vmem:[#allocation7 + $0x1b8] sm:$0xf0] }
  0xd6   : > { %v4248_v11 = vor.u32 %v5591_v7, %v4245_v8  ;;  %851 = vmatpush.bf16.msrb.mxu1 %v4244_v5 }
  0xd8   : > { %875 = vmatpush.bf16.msrb.mxu3 %v4280_v17  ;;  %v4172_v17 = vor.u32 %v5574_v13, %v4171_v12 }
  0xd9   : > { %834 = vmatpush.bf16.msrb.mxu0 %v4204_v18  ;;  %863 = vmatpush.bf16.msrb.mxu2 %v4200_v37  ;;  %v5590_v18 = vld [vmem:[#allocation7 + $0x1a4] sm:$0xf0]  ;;  %v4165_v37 = vld [vmem:[#allocation7 + $0x118] sm:$0xf0] }
  0xda   : > { %v4236_v21 = vor.u32 %v5590_v18, %v4235_v14  ;;  %v346_v14 = vld [vmem:[#allocation5 + $0x1] ss:$8 sm:$0x3] }
  0xdb   : > { %v358_v18 = vperm.slane %v346_v14, 1 }
  0xdc   : > { %876 = vmatpush.bf16.msrb.mxu3 %v4272_v27  ;;  %v4240_v27 = vor.u32 %v5589_v23, %v4237_v24  ;;  %852 = vmatpush.bf16.msrb.mxu1 %v4236_v21 }
  0xdd   : > { %835 = vmatpush.bf16.msrb.mxu0 %v4196_v31  ;;  %864 = vmatpush.bf16.msrb.mxu2 %v4192_v55 }
  0xe0   : > { %877 = vmatpush.bf16.msrb.mxu3 %v4264_v41  ;;  %853 = vmatpush.bf16.msrb.mxu1 %v4228_v36 }
  0xe1   : > { %836 = vmatpush.bf16.msrb.mxu0 %v4188_v48  ;;  %865 = vmatpush.bf16.msrb.mxu2 %v4184_v6  ;;  %v4219_v48 = vld [vmem:[#allocation7 + $0x180] sm:$0xf] }
  0xe2   : > { %v4220_v56 = vor.u32 %v5586_v50, %v4219_v48  ;;  %v344_v6 = vld [vmem:[#allocation5] ss:$8 sm:$0x3]  ;;  %v5645_v50 = vld [vmem:[#allocation7 + $0x264] sm:$0xf] }
  0xe3   : > { %v4395_v48 = vld [vmem:[#allocation7 + $0x2e0] sm:$0xf] }
  0xe4   : > { %878 = vmatpush.bf16.msrb.mxu3 %v4256_v59  ;;  %v4221_v59 = vld [vmem:[#allocation7 + $0x188] sm:$0xf0]  ;;  %854 = vmatpush.bf16.msrb.mxu1 %v4220_v56 }
  0xe5   : > { %837 = vmatpush.bf16.msrb.mxu0 %v4180_v0  ;;  %866 = vmatpush.bf16.msrb.mxu2 %v4176_v22 }
  0xe8   : > { %879 = vmatpush.bf16.msrb.mxu3 %v4248_v11  ;;  %v349_v11 = vperm.slane %v344_v6, 1 }
  0xe9   : > { %838 = vmatpush.bf16.msrb.mxu0 %v4172_v17  ;;  %v357_v17 = vperm.slane %v346_v14, 0  ;;  %v5657_v14 = vld [vmem:[#allocation7 + $0x2c4] sm:$0xf] }
  0xec   : > { %880 = vmatpush.bf16.msrb.mxu3 %v4240_v27 }
  0xed   : > { %839 = vmatpush.bf16.msrb.mxu0 %v4164_v33  ;;  %v4341_v33 = vld [vmem:[#allocation7 + $0x278] sm:$0xf0] }
  0xf0   : > { %881 = vmatpush.bf16.msrb.mxu3 %v4232_v42  ;;  %v4331_v42 = vld [vmem:[#allocation7 + $0x260] sm:$0xf] }
 0x12f   : > { %v300_v35 = vpop.xlane.xlu1 %299 }
 0x130   : > { %v304_v40 = vrot.slane %v300_v35, 4 }
 0x132   : > { %v305_v47 = vadd.f32 %v304_v40, %v300_v35  ;;  %v5571_v35 = vld [vmem:[#allocation7 + $0x114] sm:$0xf] }
 0x133   : > { %v4168_v41 = vor.u32 %v5571_v35, %v4165_v37 }
 0x134   : > { %v306_v58 = vrot.slane %v305_v47, 2 }
 0x135   : > { %867 = vmatpush.bf16.msrb.mxu2 %v4168_v41 }
 0x136   : > { %v307_v63 = vadd.f32 %v306_v58, %v305_v47  ;;  %v5570_v47 = vld [vmem:[#allocation7 + $0x104] sm:$0xf0]  ;;  %v5585_v58 = vld [vmem:[#allocation7 + $0x184] sm:$0xf] }
 0x137   : > { %v303_v4 = vpop.xlane.xlu1 %302  ;;  %v4156_v49 = vor.u32 %v5570_v47, %v4155_v46  ;;  %v4224_v60 = vor.u32 %v5585_v58, %v4221_v59  ;;  %v4323_v58 = vld [vmem:[#allocation7 + $0x250] sm:$0xf]  ;;  %v5644_v59 = vld [vmem:[#allocation7 + $0x254] sm:$0xf0] }
 0x138   : > { %v308_v9 = vrot.slane %v307_v63, 1  ;;  %v310_v10 = vrot.slane %v303_v4, 4 }
 0x139   : > { %840 = vmatpush.bf16.msrb.mxu0 %v4156_v49  ;;  %868 = vmatpush.bf16.msrb.mxu2 %v4160_v57  ;;  %v5662_v49 = vld [vmem:[#allocation7 + $0x2e4] sm:$0xf0] }
 0x13a   : > { %v309_v15 = vadd.f32 %v308_v9, %v307_v63  ;;  %v311_v16 = vadd.f32 %v310_v10, %v303_v4  ;;  %882 = vmatpush.bf16.msrb.mxu3 %v4224_v60  ;;  %v348_v10 = vperm.slane %v344_v6, 0  ;;  %v4396_v57 = vor.u32 %v5662_v49, %v4395_v48  ;;  %v4315_v6 = vld [vmem:[#allocation7 + $0x240] sm:$0xf]  ;;  %v5635_v48 = vld [vmem:[#allocation7 + $0x214] sm:$0xf] }
 0x13b   : > { %v4336_v60 = vor.u32 %v5645_v50, %v4333_v53  ;;  %v4293_v49 = vld [vmem:[#allocation7 + $0x218] sm:$0xf0]  ;;  %v5651_v50 = vld [vmem:[#allocation7 + $0x294] sm:$0xf] }
 0x13c   : > { %v316_v25 = vmul.f32 0.00048828125, %v309_v15  ;;  %v312_v26 = vrot.slane %v311_v16, 2  ;;  %v4357_v53 = vld [vmem:[#allocation7 + $0x298] sm:$0xf0] }
 0x13e   : > { %v318_v31 = vadd.f32 1e-05, %v316_v25  ;;  %v313_v32 = vadd.f32 %v312_v26, %v311_v16 }
 0x140   : > { %6029 = vrsqrt.f32 %v318_v31  ;;  %v314_v40 = vrot.slane %v313_v32, 1  ;;  %vm326_vm1 = vweird.f32 %v318_v31 }
 0x142   : > { %v315_v45 = vadd.f32 %v314_v40, %v313_v32  ;;  %v5647_v32 = vld [vmem:[#allocation7 + $0x274] sm:$0xf] }
 0x143   : > { %v4344_v46 = vor.u32 %v5647_v32, %v4341_v33  ;;  %v4363_v32 = vld [vmem:[#allocation7 + $0x2a0] sm:$0xf]  ;;  %v5654_v33 = vld [vmem:[#allocation7 + $0x2a4] sm:$0xf0] }
 0x144   : > { %v317_v55 = vmul.f32 0.00048828125, %v315_v45  ;;  %v5646_v45 = vld [vmem:[#allocation7 + $0x264] sm:$0xf0] }
 0x145   : > { %v4332_v56 = vor.u32 %v5646_v45, %v4331_v42 }
 0x146   : > { %v6030_v61 = vpop.eup %6029  ;;  %v319_v62 = vadd.f32 1e-05, %v317_v55  ;;  %v4397_v55 = vld [vmem:[#allocation7 + $0x2e8] sm:$0xf0] }
 0x147   : > { %v321_v63 = vmul.f32 %v6030_v61, %v318_v31  ;;  %vm327_vm0 = vweird.f32 %v6030_v61  ;;  %v5664_v31 = vld [vmem:[#allocation7 + $0x2f4] sm:$0xf0] }
 0x148   : > { %6031 = vrsqrt.f32 %v319_v62  ;;  %vm328_vm2 = vmor %vm326_vm1, %vm327_vm0  ;;  %vm336_vm4 = vweird.f32 %v319_v62  ;;  %v4404_v41 = vor.u32 %v5664_v31, %v4403_v30 }
 0x149   : > { %v322_v0 = vmul.f32 %v6030_v61, %v321_v63  ;;  %v5660_v63 = vld [vmem:[#allocation7 + $0x2d4] sm:$0xf0] }
 0x14b   : > { %v323_v1 = vmul.f32 0.5, %v322_v0  ;;  %v5643_v0 = vld [vmem:[#allocation7 + $0x254] sm:$0xf] }
 0x14d   : > { %v324_v2 = vsub.f32 1.5, %v323_v1  ;;  %v4325_v1 = vld [vmem:[#allocation7 + $0x258] sm:$0xf0] }
 0x14e   : > { %v6032_v3 = vpop.eup %6031 }
 0x14f   : > { %v325_v4 = vmul.f32 %v6030_v61, %v324_v2  ;;  %v331_v5 = vmul.f32 %v6032_v3, %v319_v62  ;;  %vm337_vm3 = vweird.f32 %v6032_v3  ;;  %v4387_v62 = vld [vmem:[#allocation7 + $0x2d0] sm:$0xf]  ;;  %v5659_v2 = vld [vmem:[#allocation7 + $0x2d4] sm:$0xf] }
 0x150   : > { %vm338_vm5 = vmor %vm336_vm4, %vm337_vm3 }
 0x151   : > { %v329_v7 = vsel %vm328_vm2, %v6030_v61, %v325_v4  ;;  %v332_v8 = vmul.f32 %v6032_v3, %v331_v5  ;;  %v4400_v61 = vor.u32 %v5661_v54, %v4397_v55  ;;  %v4324_v4 = vor.u32 %v5644_v59, %v4323_v58 }
 0x152   : > { %v340_v12 = vmul.f32 %v329_v7, %v6362_v43  ;;  %v341_v13 = vmul.f32 %v329_v7, %v6364_v44  ;;  %v4339_v44 = vld [vmem:[#allocation7 + $0x270] sm:$0xf]  ;;  %v4388_v5 = vor.u32 %v5660_v63, %v4387_v62  ;;  %v5642_v7 = vld [vmem:[#allocation7 + $0x244] sm:$0xf0]  ;;  %v4296_v58 = vor.u32 %v5635_v48, %v4293_v49  ;;  %v5633_v62 = vld [vmem:[#allocation7 + $0x204] sm:$0xf] }
 0x153   : > { %v333_v9 = vmul.f32 0.5, %v332_v8  ;;  %v4340_v40 = vor.u32 %v5648_v29, %v4339_v44  ;;  %v4328_v8 = vor.u32 %v5643_v0, %v4325_v1  ;;  %v5638_v29 = vld [vmem:[#allocation7 + $0x224] sm:$0xf0]  ;;  %v4360_v59 = vor.u32 %v5651_v50, %v4357_v53  ;;  %v4285_v63 = vld [vmem:[#allocation7 + $0x208] sm:$0xf0] }
 0x154   : > { %v352_v19 = vmul.f32 %v348_v10, %v340_v12  ;;  %v353_v20 = vmul.f32 %v349_v11, %v341_v13  ;;  %v5641_v12 = vld [vmem:[#allocation7 + $0x244] sm:$0xf]  ;;  %v4317_v13 = vld [vmem:[#allocation7 + $0x248] sm:$0xf0] }
 0x155   : > { %v334_v15 = vsub.f32 1.5, %v333_v9  ;;  %v5649_v0 = vld [vmem:[#allocation7 + $0x284] sm:$0xf]  ;;  %v4349_v1 = vld [vmem:[#allocation7 + $0x288] sm:$0xf0] }
 0x156   : > { %v361_v24 = vadd.f32 %v357_v17, %v352_v19  ;;  %v362_v25 = vadd.f32 %v358_v18, %v353_v20  ;;  %v5640_v19 = vld [vmem:[#allocation7 + $0x234] sm:$0xf0]  ;;  %v4320_v20 = vor.u32 %v5641_v12, %v4317_v13 }
 0x157   : > { %v335_v16 = vmul.f32 %v6032_v3, %v334_v15  ;;  %v4381_v15 = vld [vmem:[#allocation7 + $0x2c8] sm:$0xf0] }
 0x158   : > { %v365_v35 = vmax.f32 %v361_v24, 0.0  ;;  %v366_v37 = vmax.f32 %v362_v25, 0.0  ;;  %v5639_v24 = vld [vmem:[#allocation7 + $0x234] sm:$0xf]  ;;  %v4309_v25 = vld [vmem:[#allocation7 + $0x238] sm:$0xf0] }
 0x159   : > { %v339_v21 = vsel %vm338_vm5, %v6032_v3, %v335_v16  ;;  %v4389_v3 = vld [vmem:[#allocation7 + $0x2d8] sm:$0xf0]  ;;  %v4316_v16 = vor.u32 %v5642_v7, %v4315_v6  ;;  %v4312_v30 = vor.u32 %v5639_v24, %v4309_v25 }
 0x15a   : > { %v342_v22 = vmul.f32 %v339_v21, %v6370_v51  ;;  %v343_v23 = vmul.f32 %v339_v21, %v6372_v52  ;;  %v4405_v51 = vld [vmem:[#allocation7 + $0x2f8] sm:$0xf0]  ;;  %v4392_v9 = vor.u32 %v5659_v2, %v4389_v3  ;;  %v4384_v21 = vor.u32 %v5657_v14, %v4381_v15 }
 0x15b   : > { %v4408_v47 = vor.u32 %v5663_v34, %v4405_v51  ;;  %v5637_v34 = vld [vmem:[#allocation7 + $0x224] sm:$0xf]  ;;  %v4364_v51 = vor.u32 %v5654_v33, %v4363_v32 }
 0x15c   : > { %v354_v43 = vmul.f32 %v348_v10, %v342_v22  ;;  %v355_v26 = vmul.f32 %v349_v11, %v343_v23  ;;  %v4379_v10 = vld [vmem:[#allocation7 + $0x2c0] sm:$0xf]  ;;  %v5658_v11 = vld [vmem:[#allocation7 + $0x2c4] sm:$0xf0]  ;;  %v4371_v22 = vld [vmem:[#allocation7 + $0x2b0] sm:$0xf] }
 0x15d   : > { %v5656_v23 = vld [vmem:[#allocation7 + $0x2b4] sm:$0xf0] }
 0x15e   : > { %v363_v27 = vadd.f32 %v357_v17, %v354_v43  ;;  %v364_v28 = vadd.f32 %v358_v18, %v355_v26  ;;  %v4380_v17 = vor.u32 %v5658_v11, %v4379_v10  ;;  %v4307_v18 = vld [vmem:[#allocation7 + $0x230] sm:$0xf]  ;;  %v5655_v43 = vld [vmem:[#allocation7 + $0x2b4] sm:$0xf]  ;;  %v4373_v26 = vld [vmem:[#allocation7 + $0x2b8] sm:$0xf0] }
 0x15f   : > { %v4308_v44 = vor.u32 %v5640_v19, %v4307_v18  ;;  %v4376_v31 = vor.u32 %v5655_v43, %v4373_v26  ;;  %v6217_v26 = vmov 0.0  }
 0x160   : > { %v367_v36 = vmax.f32 %v363_v27, 0.0  ;;  %v368_v38 = vmax.f32 %v364_v28, 0.0  ;;  %v4372_v27 = vor.u32 %v5656_v23, %v4371_v22  ;;  %v4299_v28 = vld [vmem:[#allocation7 + $0x220] sm:$0xf] }
 0x162   : > { %v6382_v39 = vpack.c.bf16 %v367_v36, %v365_v35  ;;  %v6384_v52 = vpack.c.bf16 %v368_v38, %v366_v37  ;;  %v4301_v35 = vld [vmem:[#allocation7 + $0x228] sm:$0xf0]  ;;  %v5653_v36 = vld [vmem:[#allocation7 + $0x2a4] sm:$0xf]  ;;  %v4300_v38 = vor.u32 %v5638_v29, %v4299_v28 }
 0x163   : > { %v4365_v37 = vld [vmem:[#allocation7 + $0x2a8] sm:$0xf0]  ;;  %v4304_v42 = vor.u32 %v5637_v34, %v4301_v35 }
 0x164   : > { %604 = vmatmul.bf16.vlgmr.msra.gmra.mxu0 %v6382_v39  ;;  %618 = vmatmul.bf16.vlgmr.msra.gmra.mxu1 %v6384_v52  ;;  %v4368_v45 = vor.u32 %v5653_v36, %v4365_v37 }
 0x165   : > { %632 = vmatmul.bf16.vlgmr.msra.gmra.mxu2 %v6382_v39  ;;  %646 = vmatmul.bf16.vlgmr.msra.gmra.mxu3 %v6384_v52 }
 0x166   : > { %1082 = vmatpush.bf16.msra.mxu0 %v4340_v40  ;;  %1096 = vmatpush.bf16.msra.mxu1 %v4404_v41  ;;  %v4291_v40 = vld [vmem:[#allocation7 + $0x210] sm:$0xf]  ;;  %v5636_v41 = vld [vmem:[#allocation7 + $0x214] sm:$0xf0] }
 0x167   : > { %1110 = vmatpush.bf16.msra.mxu2 %v4344_v46  ;;  %1124 = vmatpush.bf16.msra.mxu3 %v4408_v47  ;;  %v4355_v46 = vld [vmem:[#allocation7 + $0x290] sm:$0xf]  ;;  %v5652_v47 = vld [vmem:[#allocation7 + $0x294] sm:$0xf0]  ;;  %v4292_v54 = vor.u32 %v5636_v41, %v4291_v40 }
 0x168   : > { %v4356_v55 = vor.u32 %v5652_v47, %v4355_v46 }
 0x16a   : > { %1083 = vmatpush.bf16.msra.mxu0 %v4332_v56  ;;  %1097 = vmatpush.bf16.msra.mxu1 %v4396_v57  ;;  %v4283_v56 = vld [vmem:[#allocation7 + $0x200] sm:$0xf]  ;;  %v5634_v57 = vld [vmem:[#allocation7 + $0x204] sm:$0xf0] }
 0x16b   : > { %1111 = vmatpush.bf16.msra.mxu2 %v4336_v60  ;;  %1125 = vmatpush.bf16.msra.mxu3 %v4400_v61  ;;  %v4347_v60 = vld [vmem:[#allocation7 + $0x280] sm:$0xf]  ;;  %v5650_v61 = vld [vmem:[#allocation7 + $0x284] sm:$0xf0]  ;;  %v4284_v2 = vor.u32 %v5634_v57, %v4283_v56 }
 0x16c   : > { %v4348_v3 = vor.u32 %v5650_v61, %v4347_v60 }
 0x16e   : > { %1084 = vmatpush.bf16.msra.mxu0 %v4324_v4  ;;  %1098 = vmatpush.bf16.msra.mxu1 %v4388_v5  ;;  %v4288_v4 = vor.u32 %v5633_v62, %v4285_v63  ;;  %v4352_v5 = vor.u32 %v5649_v0, %v4349_v1  ;;  %v1164_v0 = vld [vmem:[#allocation5 + $0x2] ss:$8 sm:$0x3] }
 0x16f   : > { %1112 = vmatpush.bf16.msra.mxu2 %v4328_v8  ;;  %1126 = vmatpush.bf16.msra.mxu3 %v4392_v9 }
 0x172   : > { %1085 = vmatpush.bf16.msra.mxu0 %v4316_v16  ;;  %1099 = vmatpush.bf16.msra.mxu1 %v4380_v17  ;;  %v227_v16 = vlaneseq }
 0x173   : > { %1113 = vmatpush.bf16.msra.mxu2 %v4320_v20  ;;  %1127 = vmatpush.bf16.msra.mxu3 %v4384_v21 }
 0x174   : > { %841 = vmatmul.bf16.vlgmr.msrb.gmra.mxu0 %v6382_v39  ;;  %855 = vmatmul.bf16.vlgmr.msrb.gmra.mxu1 %v6384_v52 }
 0x175   : > { %869 = vmatmul.bf16.vlgmr.msrb.gmra.mxu2 %v6382_v39  ;;  %883 = vmatmul.bf16.vlgmr.msrb.gmra.mxu3 %v6384_v52 }
 0x176   : > { %1086 = vmatpush.bf16.msra.mxu0 %v4308_v44  ;;  %1100 = vmatpush.bf16.msra.mxu1 %v4372_v27 }
 0x177   : > { %1114 = vmatpush.bf16.msra.mxu2 %v4312_v30  ;;  %1128 = vmatpush.bf16.msra.mxu3 %v4376_v31 }
 0x17a   : > { %1087 = vmatpush.bf16.msra.mxu0 %v4300_v38  ;;  %1101 = vmatpush.bf16.msra.mxu1 %v4364_v51 }
 0x17b   : > { %1115 = vmatpush.bf16.msra.mxu2 %v4304_v42  ;;  %1129 = vmatpush.bf16.msra.mxu3 %v4368_v45 }
 0x17e   : > { %1088 = vmatpush.bf16.msra.mxu0 %v4292_v54  ;;  %1102 = vmatpush.bf16.msra.mxu1 %v4356_v55 }
 0x17f   : > { %1116 = vmatpush.bf16.msra.mxu2 %v4296_v58  ;;  %1130 = vmatpush.bf16.msra.mxu3 %v4360_v59 }
 0x182   : > { %1089 = vmatpush.bf16.msra.mxu0 %v4284_v2  ;;  %1103 = vmatpush.bf16.msra.mxu1 %v4348_v3 }
 0x183   : > { %1117 = vmatpush.bf16.msra.mxu2 %v4288_v4  ;;  %1131 = vmatpush.bf16.msra.mxu3 %v4352_v5 }
 0x185   : > { %1090 = vmatmul.bf16.vlgmr.msra.gmra.mxu0 %v6382_v39  ;;  %1104 = vmatmul.bf16.vlgmr.msra.gmra.mxu1 %v6384_v52 }
 0x186   : > { %1118 = vmatmul.bf16.vlgmr.msra.gmra.mxu2 %v6382_v39  ;;  %1132 = vmatmul.bf16.vlgmr.msra.gmra.mxu3 %v6384_v52  ;;  %v228_v39 = vshrl.u32 %v227_v16, 7 }
 0x188   : > { %v234_v21 = vand.u32 7, %v228_v39  ;;  %v229_v23 = vadd.s32 8, %v228_v39 }
 0x18a   : > { %vm254_vm6 = vcmp.ne.s32.totalorder %v234_v21, 7  ;;  %v241_v28 = vand.u32 7, %v229_v23  ;;  %vm260_vm8 = vcmp.ne.s32.totalorder %v234_v21, 0 }
 0x18b   : > { %v6404_v44 = vsel %vm254_vm6, 1.0, %v6217_v26  ;;  %v6410_v38 = vsel %vm260_vm8, 1.0, %v6217_v26 }
 0x18c   : > { %vm261_vm7 = vcmp.ne.s32.totalorder %v241_v28, 0  ;;  %vm255_vm9 = vcmp.ne.s32.totalorder %v241_v28, 7 }
 0x18d   : > { %v6408_v36 = vsel %vm261_vm7, 1.0, %v6217_v26  ;;  %v6412_v45 = vsel %vm255_vm9, 1.0, %v6217_v26 }
 0x1e1   : > { %v605_v6 = vpop.f32.mrf.mxu0  ;;  %v619_v7 = vpop.f32.mrf.mxu1 }
 0x1e2   : > { %v620_v43 = vadd.f32 %v619_v7, %v605_v6 }
 0x1e4   : > { %v652_v29 = vmul.f32 %v6404_v44, %v620_v43 }
 0x1e6   : > { %v661_v40 = vrot.slane %v652_v29, 7  ;;  %v5712_v29 = vld [vmem:[#allocation7 + $0x374] sm:$0xf0] }
 0x1e8   : > { %v633_v8 = vpop.f32.mrf.mxu2  ;;  %v647_v9 = vpop.f32.mrf.mxu3  ;;  %v671_v53 = vsel %vm660_vm10, 0.0, %v661_v40 }
 0x1e9   : > { %v607_v10 = vpop.f32.mrf.mxu0  ;;  %v621_v11 = vpop.f32.mrf.mxu1  ;;  %v648_v27 = vadd.f32 %v647_v9, %v633_v8  ;;  %v1166_v8 = vperm.slane %v1164_v0, 0 }
 0x1ea   : > { %v622_v41 = vadd.f32 %v621_v11, %v607_v10 }
 0x1eb   : > { %v653_v30 = vmul.f32 %v6404_v44, %v648_v27 }
 0x1ec   : > { %v654_v50 = vmul.f32 %v6412_v45, %v622_v41 }
 0x1ed   : > { %v662_v42 = vrot.slane %v653_v30, 7  ;;  %v4531_v30 = vld [vmem:[#allocation7 + $0x3f0] sm:$0xf] }
 0x1ee   : > { %v663_v1 = vrot.slane %v654_v50, 7 }
 0x1ef   : > { %v672_v56 = vsel %vm660_vm10, 0.0, %v662_v42 }
 0x1f0   : > { %v635_v12 = vpop.f32.mrf.mxu2  ;;  %v649_v13 = vpop.f32.mrf.mxu3 }
 0x1f1   : > { %v842_v14 = vpop.f32.mrf.mxu0  ;;  %v856_v15 = vpop.f32.mrf.mxu1  ;;  %v650_v33 = vadd.f32 %v649_v13, %v635_v12  ;;  %v1167_v12 = vperm.slane %v1164_v0, 1  ;;  %v664_v13 = vsel %vm660_vm10, %v661_v40, %v663_v1 }
 0x1f2   : > { %v843_v55 = vadd.f32 %v842_v14, %v671_v53  ;;  %v5709_v53 = vld [vmem:[#allocation7 + $0x364] sm:$0xf] }
 0x1f3   : > { %v655_v47 = vmul.f32 %v6412_v45, %v650_v33  ;;  %v4469_v33 = vld [vmem:[#allocation7 + $0x378] sm:$0xf0] }
 0x1f4   : > { %v857_v4 = vadd.f32 %v856_v15, %v843_v55 }
 0x1f5   : > { %v665_v59 = vrot.slane %v655_v47, 7  ;;  %v5726_v47 = vld [vmem:[#allocation7 + $0x3e4] sm:$0xf0] }
 0x1f7   : > { %v666_v5 = vsel %vm660_vm10, %v662_v42, %v665_v59  ;;  %v5710_v42 = vld [vmem:[#allocation7 + $0x364] sm:$0xf0] }
 0x1f8   : > { %v870_v17 = vpop.f32.mrf.mxu2  ;;  %v884_v18 = vpop.f32.mrf.mxu3 }
 0x1f9   : > { %v6398_v19 = vpop.f32.mrf.mxu0  ;;  %v6400_v20 = vpop.f32.mrf.mxu1  ;;  %v871_v63 = vadd.f32 %v870_v17, %v672_v56  ;;  %v5725_v56 = vld [vmem:[#allocation7 + $0x3e4] sm:$0xf] }
 0x1fa   : > { %v845_v16 = vadd.f32 %v6398_v19, %v664_v13  ;;  %v4467_v19 = vld [vmem:[#allocation7 + $0x370] sm:$0xf] }
 0x1fb   : > { %v885_v9 = vadd.f32 %v884_v18, %v871_v63 }
 0x1fc   : > { %v859_v18 = vadd.f32 %v6400_v20, %v845_v16  ;;  %v4459_v20 = vld [vmem:[#allocation7 + $0x360] sm:$0xf] }
 0x200   : > { %v872_v52 = vpop.f32.mrf.mxu2  ;;  %v6402_v22 = vpop.f32.mrf.mxu3 }
 0x201   : > { %v873_v10 = vadd.f32 %v872_v52, %v666_v5 }
 0x202   : > { %v1091_v24 = vpop.f32.mrf.mxu0  ;;  %v1105_v25 = vpop.f32.mrf.mxu1 }
 0x203   : > { %v1106_v34 = vadd.f32 %v1105_v25, %v1091_v24  ;;  %v887_v15 = vadd.f32 %v6402_v22, %v873_v10  ;;  %v5711_v22 = vld [vmem:[#allocation7 + $0x374] sm:$0xf] }
 0x205   : > { %v1138_v48 = vmul.f32 %v6410_v38, %v1106_v34 }
 0x207   : > { %v1147_v60 = vrot.slane %v1138_v48, 1 }
 0x209   : > { %v1119_v31 = vpop.f32.mrf.mxu2  ;;  %v1133_v32 = vpop.f32.mrf.mxu3 }
 0x20a   : > { %v1093_v35 = vpop.f32.mrf.mxu0  ;;  %v1107_v37 = vpop.f32.mrf.mxu1  ;;  %v1134_v49 = vadd.f32 %v1133_v32, %v1119_v31  ;;  %v4468_v31 = vor.u32 %v5712_v29, %v4467_v19  ;;  %v5728_v32 = vld [vmem:[#allocation7 + $0x3f4] sm:$0xf0]  ;;  %v5723_v19 = vld [vmem:[#allocation7 + $0x3d4] sm:$0xf] }
 0x20b   : > { %v1108_v51 = vadd.f32 %v1107_v37, %v1093_v35  ;;  %v4532_v34 = vor.u32 %v5728_v32, %v4531_v30  ;;  %v4472_v35 = vor.u32 %v5711_v22, %v4469_v33  ;;  %v5727_v37 = vld [vmem:[#allocation7 + $0x3f4] sm:$0xf]  ;;  %v4443_v30 = vld [vmem:[#allocation7 + $0x340] sm:$0xf]  ;;  %v5722_v33 = vld [vmem:[#allocation7 + $0x3c4] sm:$0xf0] }
 0x20c   : > { %v1139_v61 = vmul.f32 %v6410_v38, %v1134_v49  ;;  %1502 = vmatpush.bf16.msrb.mxu0 %v4468_v31  ;;  %v4460_v49 = vor.u32 %v5710_v42, %v4459_v20  ;;  %v5706_v31 = vld [vmem:[#allocation7 + $0x344] sm:$0xf0]  ;;  %v4507_v32 = vld [vmem:[#allocation7 + $0x3c0] sm:$0xf]  ;;  %v5721_v20 = vld [vmem:[#allocation7 + $0x3c4] sm:$0xf] }
 0x20d   : > { %v1140_v46 = vmul.f32 %v6408_v36, %v1108_v51  ;;  %v4533_v51 = vld [vmem:[#allocation7 + $0x3f8] sm:$0xf0]  ;;  %1516 = vmatpush.bf16.msrb.mxu1 %v4532_v34  ;;  %1530 = vmatpush.bf16.msrb.mxu2 %v4472_v35  ;;  %v4444_v22 = vor.u32 %v5706_v31, %v4443_v30  ;;  %v5705_v34 = vld [vmem:[#allocation7 + $0x344] sm:$0xf]  ;;  %v4445_v35 = vld [vmem:[#allocation7 + $0x348] sm:$0xf0] }
 0x20e   : > { %v1150_v6 = vrot.slane %v1139_v61, 1  ;;  %v4536_v41 = vor.u32 %v5727_v37, %v4533_v51  ;;  %v4508_v37 = vor.u32 %v5722_v33, %v4507_v32  ;;  %v4448_v51 = vor.u32 %v5705_v34, %v4445_v35  ;;  %v4435_v42 = vld [vmem:[#allocation7 + $0x330] sm:$0xf]  ;;  %v5713_v31 = vld [vmem:[#allocation7 + $0x384] sm:$0xf] }
 0x20f   : > { %v1148_v54 = vrot.slane %v1140_v46, 1  ;;  %v4523_v46 = vld [vmem:[#allocation7 + $0x3e0] sm:$0xf]  ;;  %v4477_v32 = vld [vmem:[#allocation7 + $0x388] sm:$0xf0] }
 0x210   : > { %v4524_v50 = vor.u32 %v5726_v47, %v4523_v46  ;;  %1544 = vmatpush.bf16.msrb.mxu3 %v4536_v41  ;;  %1503 = vmatpush.bf16.msrb.mxu0 %v4460_v49  ;;  %v5704_v46 = vld [vmem:[#allocation7 + $0x334] sm:$0xf0]  ;;  %v4499_v47 = vld [vmem:[#allocation7 + $0x3b0] sm:$0xf]  ;;  %v4480_v33 = vor.u32 %v5713_v31, %v4477_v32 }
 0x211   : > { %v1121_v57 = vpop.f32.mrf.mxu2  ;;  %v1135_v58 = vpop.f32.mrf.mxu3  ;;  %v1149_v3 = vsel %vm1146_vm11, %v1147_v60, %v1148_v54  ;;  %v1157_v24 = vsel %vm1146_vm11, %v1148_v54, 0.0  ;;  %v4461_v54 = vld [vmem:[#allocation7 + $0x368] sm:$0xf0]  ;;  %v5720_v49 = vld [vmem:[#allocation7 + $0x3b4] sm:$0xf0] }
 0x212   : > { %v1136_v62 = vadd.f32 %v1135_v58, %v1121_v57  ;;  %v1159_v11 = vadd.f32 %v1149_v3, %v857_v4  ;;  %v1161_v43 = vadd.f32 %v1157_v24, %v859_v18  ;;  %v4464_v55 = vor.u32 %v5709_v53, %v4461_v54  ;;  %v4525_v57 = vld [vmem:[#allocation7 + $0x3e8] sm:$0xf0]  ;;  %1517 = vmatpush.bf16.msrb.mxu1 %v4524_v50  ;;  %v4515_v24 = vld [vmem:[#allocation7 + $0x3d0] sm:$0xf]  ;;  %v5703_v50 = vld [vmem:[#allocation7 + $0x334] sm:$0xf] }
 0x213   : > { %v4528_v59 = vor.u32 %v5725_v56, %v4525_v57  ;;  %v4437_v53 = vld [vmem:[#allocation7 + $0x338] sm:$0xf0]  ;;  %v4500_v54 = vor.u32 %v5720_v49, %v4499_v47  ;;  %v5719_v56 = vld [vmem:[#allocation7 + $0x3b4] sm:$0xf]  ;;  %v5680_v34 = vld [vmem:[#allocation7 + $0x474] sm:$0xf0] }
 0x214   : > { %v1141_v2 = vmul.f32 %v6408_v36, %v1136_v62  ;;  %v1170_v21 = vadd.f32 %v1166_v8, %v1159_v11  ;;  %v1172_v27 = vadd.f32 %v1166_v8, %v1161_v43  ;;  %1531 = vmatpush.bf16.msrb.mxu2 %v4464_v55  ;;  %v4453_v43 = vld [vmem:[#allocation7 + $0x358] sm:$0xf0]  ;;  %v4440_v55 = vor.u32 %v5703_v50, %v4437_v53  ;;  %v4659_v35 = vld [vmem:[#allocation7 + $0x4f0] sm:$0xf]  ;;  %v5678_v49 = vld [vmem:[#allocation7 + $0x464] sm:$0xf0] }
 0x215   : > { %1545 = vmatpush.bf16.msrb.mxu3 %v4528_v59  ;;  %v4501_v57 = vld [vmem:[#allocation7 + $0x3b8] sm:$0xf0]  ;;  %v4427_v59 = vld [vmem:[#allocation7 + $0x320] sm:$0xf]  ;;  %v5672_v31 = vld [vmem:[#allocation7 + $0x434] sm:$0xf0] }
 0x216   : > { %v1151_v7 = vrot.slane %v1141_v2, 1  ;;  %v4661_v47 = vld [vmem:[#allocation7 + $0x4f8] sm:$0xf0]  ;;  %v4627_v32 = vld [vmem:[#allocation7 + $0x4b0] sm:$0xf] }
 0x218   : > { %v1152_v14 = vsel %vm1146_vm11, %v1150_v6, %v1151_v7  ;;  %v1158_v39 = vsel %vm1146_vm11, %v1151_v7, 0.0 }
 0x219   : > { %v1160_v17 = vadd.f32 %v1152_v14, %v885_v9  ;;  %v1162_v25 = vadd.f32 %v1158_v39, %v887_v15 }
 0x21b   : > { %v1171_v23 = vadd.f32 %v1167_v12, %v1160_v17  ;;  %v1173_v26 = vadd.f32 %v1167_v12, %v1162_v25  ;;  %v5707_v25 = vld [vmem:[#allocation7 + $0x354] sm:$0xf] }
 0x21d   : > { %v1174_v52 = vadd.f32 %v1171_v23, %v1170_v21  ;;  %v1177_v28 = vadd.f32 %v1173_v26, %v1172_v27 }
 0x21f   : > { %1175 = vadd.xlane.f32.xlu2 %v1174_v52  ;;  %v5724_v52 = vld [vmem:[#allocation7 + $0x3d4] sm:$0xf0] }
 0x227   : > { %1178 = vadd.xlane.f32.xlu2 %v1177_v28  ;;  %v4516_v28 = vor.u32 %v5724_v52, %v4515_v24  ;;  %v4485_v24 = vld [vmem:[#allocation7 + $0x398] sm:$0xf0]  ;;  %v4411_v52 = vld [vmem:[#allocation7 + $0x300] sm:$0xf] }
 0x229   : > { %1518 = vmatpush.bf16.msrb.mxu1 %v4516_v28 }
 0x22d   : > { %1519 = vmatpush.bf16.msrb.mxu1 %v4508_v37  ;;  %v5696_v37 = vld [vmem:[#allocation7 + $0x4f4] sm:$0xf0] }
 0x231   : > { %1520 = vmatpush.bf16.msrb.mxu1 %v4500_v54  ;;  %v4651_v54 = vld [vmem:[#allocation7 + $0x4e0] sm:$0xf] }
 0x292   : > { %v1176_v40 = vpop.xlane.xlu2 %1175 }
 0x293   : > { %v1180_v48 = vrot.slane %v1176_v40, 4 }
 0x295   : > { %v1181_v58 = vadd.f32 %v1180_v48, %v1176_v40  ;;  %v4509_v40 = vld [vmem:[#allocation7 + $0x3c8] sm:$0xf0]  ;;  %v4436_v48 = vor.u32 %v5704_v46, %v4435_v42  ;;  %v5695_v42 = vld [vmem:[#allocation7 + $0x4f4] sm:$0xf] }
 0x296   : > { %v4512_v41 = vor.u32 %v5721_v20, %v4509_v40  ;;  %v4660_v20 = vor.u32 %v5696_v37, %v4659_v35  ;;  %v5679_v40 = vld [vmem:[#allocation7 + $0x474] sm:$0xf]  ;;  %v4664_v50 = vor.u32 %v5695_v42, %v4661_v47  ;;  %v4565_v37 = vld [vmem:[#allocation7 + $0x438] sm:$0xf0] }
 0x297   : > { %v1182_v60 = vrot.slane %v1181_v58, 2  ;;  %v5671_v35 = vld [vmem:[#allocation7 + $0x434] sm:$0xf]  ;;  %v4629_v42 = vld [vmem:[#allocation7 + $0x4b8] sm:$0xf0] }
 0x299   : > { %v1183_v61 = vadd.f32 %v1182_v60, %v1181_v58  ;;  %v4504_v58 = vor.u32 %v5719_v56, %v4501_v57  ;;  %v5702_v60 = vld [vmem:[#allocation7 + $0x324] sm:$0xf0]  ;;  %v5677_v56 = vld [vmem:[#allocation7 + $0x464] sm:$0xf] }
 0x29a   : > { %v1179_v62 = vpop.xlane.xlu2 %1178 }
 0x29b   : > { %v1184_v63 = vrot.slane %v1183_v61, 1  ;;  %v1186_v0 = vrot.slane %v1179_v62, 4 }
 0x29d   : > { %v1185_v1 = vadd.f32 %v1184_v63, %v1183_v61  ;;  %v1187_v2 = vadd.f32 %v1186_v0, %v1179_v62  ;;  %v4491_v61 = vld [vmem:[#allocation7 + $0x3a0] sm:$0xf]  ;;  %v4428_v62 = vor.u32 %v5702_v60, %v4427_v59  ;;  %v5718_v63 = vld [vmem:[#allocation7 + $0x3a4] sm:$0xf0]  ;;  %v5701_v0 = vld [vmem:[#allocation7 + $0x324] sm:$0xf] }
 0x29e   : > { %v5693_v59 = vld [vmem:[#allocation7 + $0x4e4] sm:$0xf]  ;;  %v4653_v60 = vld [vmem:[#allocation7 + $0x4e8] sm:$0xf0] }
 0x29f   : > { %v1192_v3 = vmul.f32 0.00048828125, %v1185_v1  ;;  %v1188_v4 = vrot.slane %v1187_v2, 2  ;;  %v4429_v1 = vld [vmem:[#allocation7 + $0x328] sm:$0xf0] }
 0x2a1   : > { %v1189_v5 = vadd.f32 %v1188_v4, %v1187_v2  ;;  %v6431_v6 = vsub.f32 %v1170_v21, %v1192_v3  ;;  %v6433_v7 = vsub.f32 %v1171_v23, %v1192_v3  ;;  %v4451_v21 = vld [vmem:[#allocation7 + $0x350] sm:$0xf]  ;;  %v5708_v23 = vld [vmem:[#allocation7 + $0x354] sm:$0xf0]  ;;  %v4492_v2 = vor.u32 %v5718_v63, %v4491_v61  ;;  %v5717_v4 = vld [vmem:[#allocation7 + $0x3a4] sm:$0xf] }
 0x2a2   : > { %v4452_v18 = vor.u32 %v5708_v23, %v4451_v21  ;;  %v4432_v3 = vor.u32 %v5701_v0, %v4429_v1  ;;  %v5715_v23 = vld [vmem:[#allocation7 + $0x394] sm:$0xf]  ;;  %v4579_v63 = vld [vmem:[#allocation7 + $0x450] sm:$0xf]  ;;  %v5676_v0 = vld [vmem:[#allocation7 + $0x454] sm:$0xf0] }
 0x2a3   : > { %v1190_v8 = vrot.slane %v1189_v5, 1  ;;  %v1198_v9 = vmul.f32 %v6431_v6, %v6431_v6  ;;  %v1199_v10 = vmul.f32 %v6433_v7, %v6433_v7  ;;  %1521 = vmatpush.bf16.msrb.mxu1 %v4492_v2  ;;  %v4643_v1 = vld [vmem:[#allocation7 + $0x4d0] sm:$0xf]  ;;  %v4580_v2 = vor.u32 %v5676_v0, %v4579_v63  ;;  %v4621_v63 = vld [vmem:[#allocation7 + $0x4a8] sm:$0xf0] }
 0x2a4   : > { %1504 = vmatpush.bf16.msrb.mxu0 %v4452_v18  ;;  %v4488_v18 = vor.u32 %v5715_v23, %v4485_v24 }
 0x2a5   : > { %v1191_v11 = vadd.f32 %v1190_v8, %v1189_v5  ;;  %v1202_v12 = vadd.f32 %v1199_v10, %v1198_v9  ;;  %v4493_v5 = vld [vmem:[#allocation7 + $0x3a8] sm:$0xf0]  ;;  %v4419_v9 = vld [vmem:[#allocation7 + $0x310] sm:$0xf]  ;;  %v5700_v10 = vld [vmem:[#allocation7 + $0x314] sm:$0xf0] }
 0x2a6   : > { %v4496_v8 = vor.u32 %v5717_v4, %v4493_v5  ;;  %v5675_v4 = vld [vmem:[#allocation7 + $0x454] sm:$0xf]  ;;  %v4581_v5 = vld [vmem:[#allocation7 + $0x458] sm:$0xf0] }
 0x2a7   : > { %v1193_v13 = vmul.f32 0.00048828125, %v1191_v11  ;;  %1203 = vadd.xlane.f32.xlu0 %v1202_v12  ;;  %v4483_v11 = vld [vmem:[#allocation7 + $0x390] sm:$0xf]  ;;  %v4420_v12 = vor.u32 %v5700_v10, %v4419_v9  ;;  %v4584_v10 = vor.u32 %v5675_v4, %v4581_v5  ;;  %v5668_v4 = vld [vmem:[#allocation7 + $0x414] sm:$0xf0] }
 0x2a8   : > { %1505 = vmatpush.bf16.msrb.mxu0 %v4444_v22  ;;  %v4595_v22 = vld [vmem:[#allocation7 + $0x470] sm:$0xf] }
 0x2a9   : > { %v6439_v14 = vsub.f32 %v1172_v27, %v1193_v13  ;;  %v6441_v16 = vsub.f32 %v1173_v26, %v1193_v13  ;;  %v4456_v27 = vor.u32 %v5707_v25, %v4453_v43  ;;  %v4517_v26 = vld [vmem:[#allocation7 + $0x3d8] sm:$0xf0]  ;;  %v5716_v13 = vld [vmem:[#allocation7 + $0x394] sm:$0xf0]  ;;  %v5698_v25 = vld [vmem:[#allocation7 + $0x304] sm:$0xf0] }
 0x2aa   : > { %v4520_v29 = vor.u32 %v5723_v19, %v4517_v26  ;;  %v4475_v43 = vld [vmem:[#allocation7 + $0x380] sm:$0xf]  ;;  %v4412_v28 = vor.u32 %v5698_v25, %v4411_v52  ;;  %v5697_v19 = vld [vmem:[#allocation7 + $0x304] sm:$0xf]  ;;  %v4413_v26 = vld [vmem:[#allocation7 + $0x308] sm:$0xf0] }
 0x2ab   : > { %v1200_v17 = vmul.f32 %v6439_v14, %v6439_v14  ;;  %v1201_v39 = vmul.f32 %v6441_v16, %v6441_v16  ;;  %1532 = vmatpush.bf16.msrb.mxu2 %v4456_v27  ;;  %v5714_v27 = vld [vmem:[#allocation7 + $0x384] sm:$0xf0]  ;;  %v4416_v30 = vor.u32 %v5697_v19, %v4413_v26  ;;  %v5673_v52 = vld [vmem:[#allocation7 + $0x444] sm:$0xf]  ;;  %v4573_v25 = vld [vmem:[#allocation7 + $0x448] sm:$0xf0] }
 0x2ac   : > { %1546 = vmatpush.bf16.msrb.mxu3 %v4520_v29  ;;  %1506 = vmatpush.bf16.msrb.mxu0 %v4436_v48  ;;  %v4476_v29 = vor.u32 %v5714_v27, %v4475_v43  ;;  %v4587_v48 = vld [vmem:[#allocation7 + $0x460] sm:$0xf]  ;;  %v5689_v27 = vld [vmem:[#allocation7 + $0x4c4] sm:$0xf]  ;;  %v4637_v19 = vld [vmem:[#allocation7 + $0x4c8] sm:$0xf0] }
 0x2ad   : > { %v1205_v15 = vadd.f32 %v1201_v39, %v1200_v17  ;;  %v5699_v17 = vld [vmem:[#allocation7 + $0x314] sm:$0xf]  ;;  %v4421_v39 = vld [vmem:[#allocation7 + $0x318] sm:$0xf0]  ;;  %v4588_v53 = vor.u32 %v5678_v49, %v4587_v48  ;;  %v4555_v49 = vld [vmem:[#allocation7 + $0x420] sm:$0xf] }
 0x2ae   : > { %v4424_v21 = vor.u32 %v5699_v17, %v4421_v39  ;;  %v4571_v39 = vld [vmem:[#allocation7 + $0x440] sm:$0xf]  ;;  %v4611_v5 = vld [vmem:[#allocation7 + $0x490] sm:$0xf] }
 0x2af   : > { %1206 = vadd.xlane.f32.xlu1 %v1205_v15  ;;  %1533 = vmatpush.bf16.msrb.mxu2 %v4448_v51  ;;  %v4484_v15 = vor.u32 %v5716_v13, %v4483_v11  ;;  %v4596_v51 = vor.u32 %v5680_v34, %v4595_v22  ;;  %v5691_v11 = vld [vmem:[#allocation7 + $0x4d4] sm:$0xf]  ;;  %v5688_v34 = vld [vmem:[#allocation7 + $0x4b4] sm:$0xf0] }
 0x2b0   : > { %1547 = vmatpush.bf16.msrb.mxu3 %v4512_v41  ;;  %1507 = vmatpush.bf16.msrb.mxu0 %v4428_v62  ;;  %v4597_v41 = vld [vmem:[#allocation7 + $0x478] sm:$0xf0]  ;;  %v4656_v62 = vor.u32 %v5693_v59, %v4653_v60  ;;  %v4557_v59 = vld [vmem:[#allocation7 + $0x428] sm:$0xf0] }
 0x2b1   : > { %1522 = vmatpush.bf16.msrb.mxu1 %v4484_v15  ;;  %v4600_v46 = vor.u32 %v5679_v40, %v4597_v41  ;;  %v5674_v15 = vld [vmem:[#allocation7 + $0x444] sm:$0xf0]  ;;  %v4568_v40 = vor.u32 %v5671_v35, %v4565_v37  ;;  %v5687_v41 = vld [vmem:[#allocation7 + $0x4b4] sm:$0xf] }
 0x2b2   : > { %v4572_v24 = vor.u32 %v5674_v15, %v4571_v39  ;;  %v4632_v48 = vor.u32 %v5687_v41, %v4629_v42  ;;  %v5683_v39 = vld [vmem:[#allocation7 + $0x494] sm:$0xf]  ;;  %v4613_v15 = vld [vmem:[#allocation7 + $0x498] sm:$0xf0] }
 0x2b3   : > { %1534 = vmatpush.bf16.msrb.mxu2 %v4440_v55  ;;  %v5694_v55 = vld [vmem:[#allocation7 + $0x4e4] sm:$0xf0] }
 0x2b4   : > { %1548 = vmatpush.bf16.msrb.mxu3 %v4504_v58  ;;  %1508 = vmatpush.bf16.msrb.mxu0 %v4420_v12  ;;  %v4652_v57 = vor.u32 %v5694_v55, %v4651_v54  ;;  %v4589_v58 = vld [vmem:[#allocation7 + $0x468] sm:$0xf0]  ;;  %v4645_v12 = vld [vmem:[#allocation7 + $0x4d8] sm:$0xf0] }
 0x2b5   : > { %1523 = vmatpush.bf16.msrb.mxu1 %v4476_v29  ;;  %v4592_v61 = vor.u32 %v5677_v56, %v4589_v58  ;;  %v4648_v17 = vor.u32 %v5691_v11, %v4645_v12  ;;  %v4640_v29 = vor.u32 %v5689_v27, %v4637_v19  ;;  %v5669_v58 = vld [vmem:[#allocation7 + $0x424] sm:$0xf]  ;;  %v5684_v11 = vld [vmem:[#allocation7 + $0x494] sm:$0xf0]  ;;  %v5667_v12 = vld [vmem:[#allocation7 + $0x414] sm:$0xf] }
 0x2b6   : > { %v5682_v27 = vld [vmem:[#allocation7 + $0x484] sm:$0xf0]  ;;  %v5665_v19 = vld [vmem:[#allocation7 + $0x404] sm:$0xf] }
 0x2b7   : > { %1535 = vmatpush.bf16.msrb.mxu2 %v4432_v3  ;;  %v5692_v3 = vld [vmem:[#allocation7 + $0x4d4] sm:$0xf0] }
 0x2b8   : > { %1549 = vmatpush.bf16.msrb.mxu3 %v4496_v8  ;;  %1509 = vmatpush.bf16.msrb.mxu0 %v4412_v28  ;;  %v4644_v9 = vor.u32 %v5692_v3, %v4643_v1  ;;  %v4576_v28 = vor.u32 %v5673_v52, %v4573_v25  ;;  %v4547_v3 = vld [vmem:[#allocation7 + $0x410] sm:$0xf]  ;;  %v4539_v52 = vld [vmem:[#allocation7 + $0x400] sm:$0xf]  ;;  %v5666_v25 = vld [vmem:[#allocation7 + $0x404] sm:$0xf0] }
 0x2b9   : > { %1752 = vmatpush.bf16.msra.mxu1 %v4660_v20  ;;  %v4628_v20 = vor.u32 %v5688_v34, %v4627_v32  ;;  %v5681_v32 = vld [vmem:[#allocation7 + $0x484] sm:$0xf] }
 0x2bb   : > { %1536 = vmatpush.bf16.msrb.mxu2 %v4424_v21  ;;  %v4635_v21 = vld [vmem:[#allocation7 + $0x4c0] sm:$0xf] }
 0x2bc   : > { %1550 = vmatpush.bf16.msrb.mxu3 %v4488_v18  ;;  %1738 = vmatpush.bf16.msra.mxu0 %v4596_v51  ;;  %v5690_v18 = vld [vmem:[#allocation7 + $0x4c4] sm:$0xf0] }
 0x2bd   : > { %1753 = vmatpush.bf16.msra.mxu1 %v4652_v57  ;;  %v4636_v43 = vor.u32 %v5690_v18, %v4635_v21  ;;  %v5686_v57 = vld [vmem:[#allocation7 + $0x4a4] sm:$0xf0] }
 0x2bf   : > { %1537 = vmatpush.bf16.msrb.mxu2 %v4416_v30  ;;  %v4563_v30 = vld [vmem:[#allocation7 + $0x430] sm:$0xf] }
 0x2c0   : > { %1551 = vmatpush.bf16.msrb.mxu3 %v4480_v33  ;;  %1739 = vmatpush.bf16.msra.mxu0 %v4588_v53  ;;  %v4564_v33 = vor.u32 %v5672_v31, %v4563_v30  ;;  %v4619_v53 = vld [vmem:[#allocation7 + $0x4a0] sm:$0xf] }
 0x2c1   : > { %1754 = vmatpush.bf16.msra.mxu1 %v4644_v9  ;;  %v4620_v60 = vor.u32 %v5686_v57, %v4619_v53  ;;  %v1251_v57 = vld [vmem:[#allocation5 + $0x4] ss:$8 sm:$0x3] }
 0x2c3   : > { %1766 = vmatpush.bf16.msra.mxu2 %v4600_v46 }
 0x2c4   : > { %1780 = vmatpush.bf16.msra.mxu3 %v4664_v50  ;;  %1740 = vmatpush.bf16.msra.mxu0 %v4580_v2  ;;  %v5670_v50 = vld [vmem:[#allocation7 + $0x424] sm:$0xf0] }
 0x2c5   : > { %1755 = vmatpush.bf16.msra.mxu1 %v4636_v43  ;;  %v4556_v56 = vor.u32 %v5670_v50, %v4555_v49  ;;  %v4603_v43 = vld [vmem:[#allocation7 + $0x480] sm:$0xf] }
 0x2c6   : > { %v4604_v30 = vor.u32 %v5682_v27, %v4603_v43  ;;  %v4715_v43 = vld [vmem:[#allocation7 + $0x560] sm:$0xf] }
 0x2c7   : > { %1767 = vmatpush.bf16.msra.mxu2 %v4592_v61  ;;  %v4560_v61 = vor.u32 %v5669_v58, %v4557_v59 }
 0x2c8   : > { %1781 = vmatpush.bf16.msra.mxu3 %v4656_v62  ;;  %1741 = vmatpush.bf16.msra.mxu0 %v4572_v24  ;;  %v5685_v62 = vld [vmem:[#allocation7 + $0x4a4] sm:$0xf]  ;;  %v4616_v24 = vor.u32 %v5683_v39, %v4613_v15  ;;  %v5759_v39 = vld [vmem:[#allocation7 + $0x5f4] sm:$0xf] }
 0x2c9   : > { %1756 = vmatpush.bf16.msra.mxu1 %v4628_v20  ;;  %v4624_v2 = vor.u32 %v5685_v62, %v4621_v63 }
 0x2cb   : > { %1768 = vmatpush.bf16.msra.mxu2 %v4584_v10  ;;  %v4548_v10 = vor.u32 %v5668_v4, %v4547_v3 }
 0x2cc   : > { %1782 = vmatpush.bf16.msra.mxu3 %v4648_v17  ;;  %1742 = vmatpush.bf16.msra.mxu0 %v4564_v33  ;;  %v4549_v17 = vld [vmem:[#allocation7 + $0x418] sm:$0xf0] }
 0x2cd   : > { %1757 = vmatpush.bf16.msra.mxu1 %v4620_v60  ;;  %v1262_v60 = vperm.slane %v1251_v57, 0 }
 0x2cf   : > { %1769 = vmatpush.bf16.msra.mxu2 %v4576_v28  ;;  %v4540_v28 = vor.u32 %v5666_v25, %v4539_v52 }
 0x2d0   : > { %1783 = vmatpush.bf16.msra.mxu3 %v4640_v29  ;;  %1743 = vmatpush.bf16.msra.mxu0 %v4556_v56 }
 0x2d3   : > { %1770 = vmatpush.bf16.msra.mxu2 %v4568_v40 }
 0x2d4   : > { %1784 = vmatpush.bf16.msra.mxu3 %v4632_v48  ;;  %1744 = vmatpush.bf16.msra.mxu0 %v4548_v10  ;;  %v5744_v10 = vld [vmem:[#allocation7 + $0x574] sm:$0xf0] }
 0x2d7   : > { %1771 = vmatpush.bf16.msra.mxu2 %v4560_v61  ;;  %v1263_v61 = vperm.slane %v1251_v57, 1  ;;  %v4763_v57 = vld [vmem:[#allocation7 + $0x5c0] sm:$0xf] }
 0x2d8   : > { %1785 = vmatpush.bf16.msra.mxu3 %v4624_v2  ;;  %1745 = vmatpush.bf16.msra.mxu0 %v4540_v28  ;;  %v5742_v28 = vld [vmem:[#allocation7 + $0x564] sm:$0xf0] }
 0x2dc   : > { %1786 = vmatpush.bf16.msra.mxu3 %v4616_v24 }
 0x31a   : > { %v1204_v8 = vpop.xlane.xlu0 %1203 }
 0x31b   : > { %v1208_v13 = vrot.slane %v1204_v8, 4 }
 0x31d   : > { %v1209_v23 = vadd.f32 %v1208_v13, %v1204_v8  ;;  %v4612_v13 = vor.u32 %v5684_v11, %v4611_v5  ;;  %v4787_v11 = vld [vmem:[#allocation7 + $0x5f0] sm:$0xf] }
 0x31f   : > { %v1210_v26 = vrot.slane %v1209_v23, 2  ;;  %1758 = vmatpush.bf16.msra.mxu1 %v4612_v13  ;;  %v5743_v13 = vld [vmem:[#allocation7 + $0x574] sm:$0xf] }
 0x321   : > { %v1211_v22 = vadd.f32 %v1210_v26, %v1209_v23  ;;  %v4552_v23 = vor.u32 %v5667_v12, %v4549_v17  ;;  %v4541_v26 = vld [vmem:[#allocation7 + $0x408] sm:$0xf0]  ;;  %v5760_v12 = vld [vmem:[#allocation7 + $0x5f4] sm:$0xf0]  ;;  %v4725_v17 = vld [vmem:[#allocation7 + $0x578] sm:$0xf0] }
 0x322   : > { %v1207_v51 = vpop.xlane.xlu1 %1206  ;;  %v4544_v31 = vor.u32 %v5665_v19, %v4541_v26  ;;  %v4788_v25 = vor.u32 %v5760_v12, %v4787_v11  ;;  %v4728_v27 = vor.u32 %v5743_v13, %v4725_v17  ;;  %v4779_v26 = vld [vmem:[#allocation7 + $0x5e0] sm:$0xf]  ;;  %v5734_v17 = vld [vmem:[#allocation7 + $0x524] sm:$0xf0] }
 0x323   : > { %v1212_v46 = vrot.slane %v1211_v22, 1  ;;  %v1214_v47 = vrot.slane %v1207_v51, 4  ;;  %1772 = vmatpush.bf16.msra.mxu2 %v4552_v23  ;;  %1759 = vmatpush.bf16.msra.mxu1 %v4604_v30  ;;  %v5741_v30 = vld [vmem:[#allocation7 + $0x564] sm:$0xf]  ;;  %v4683_v13 = vld [vmem:[#allocation7 + $0x520] sm:$0xf] }
 0x325   : > { %v1213_v54 = vadd.f32 %v1212_v46, %v1211_v22  ;;  %v1215_v55 = vadd.f32 %v1214_v47, %v1207_v51  ;;  %v4605_v22 = vld [vmem:[#allocation7 + $0x488] sm:$0xf0]  ;;  %v1249_v47 = vld [vmem:[#allocation5 + $0x3] ss:$8 sm:$0x3] }
 0x326   : > { %v4608_v33 = vor.u32 %v5681_v32, %v4605_v22  ;;  %v1253_v53 = vperm.slane %v1249_v47, 0  ;;  %v5757_v32 = vld [vmem:[#allocation7 + $0x5e4] sm:$0xf]  ;;  %v4781_v22 = vld [vmem:[#allocation7 + $0x5e8] sm:$0xf0] }
 0x327   : > { %v1220_v0 = vmul.f32 0.00048828125, %v1213_v54  ;;  %v1216_v1 = vrot.slane %v1215_v55, 2  ;;  %1773 = vmatpush.bf16.msra.mxu2 %v4544_v31  ;;  %v1254_v54 = vperm.slane %v1249_v47, 1  ;;  %v4717_v31 = vld [vmem:[#allocation7 + $0x568] sm:$0xf0] }
 0x328   : > { %1787 = vmatpush.bf16.msra.mxu3 %v4608_v33  ;;  %v4716_v33 = vor.u32 %v5742_v28, %v4715_v43  ;;  %v5755_v47 = vld [vmem:[#allocation7 + $0x5d4] sm:$0xf]  ;;  %v4684_v43 = vor.u32 %v5734_v17, %v4683_v13 }
 0x329   : > { %v1222_v8 = vadd.f32 1e-05, %v1220_v0  ;;  %v1217_v9 = vadd.f32 %v1216_v1, %v1215_v55 }
 0x32b   : > { %6033 = vrsqrt.f32 %v1222_v8  ;;  %v1218_v21 = vrot.slane %v1217_v9, 1  ;;  %vm1230_vm13 = vweird.f32 %v1222_v8 }
 0x32d   : > { %v1219_v18 = vadd.f32 %v1218_v21, %v1217_v9 }
 0x32f   : > { %v1221_v29 = vmul.f32 0.00048828125, %v1219_v18 }
 0x331   : > { %v6034_v34 = vpop.eup %6033  ;;  %v1223_v35 = vadd.f32 1e-05, %v1221_v29  ;;  %v5758_v29 = vld [vmem:[#allocation7 + $0x5e4] sm:$0xf0] }
 0x332   : > { %v1225_v37 = vmul.f32 %v6034_v34, %v1222_v8  ;;  %vm1231_vm12 = vweird.f32 %v6034_v34 }
 0x333   : > { %6035 = vrsqrt.f32 %v1223_v35  ;;  %vm1232_vm14 = vmor %vm1230_vm13, %vm1231_vm12  ;;  %vm1240_vm0 = vweird.f32 %v1223_v35 }
 0x334   : > { %v1226_v51 = vmul.f32 %v6034_v34, %v1225_v37  ;;  %v5740_v37 = vld [vmem:[#allocation7 + $0x554] sm:$0xf0] }
 0x336   : > { %v1227_v20 = vmul.f32 0.5, %v1226_v51  ;;  %v4720_v51 = vor.u32 %v5741_v30, %v4717_v31  ;;  %v4739_v30 = vld [vmem:[#allocation7 + $0x590] sm:$0xf]  ;;  %v5748_v31 = vld [vmem:[#allocation7 + $0x594] sm:$0xf0] }
 0x338   : > { %v1228_v40 = vsub.f32 1.5, %v1227_v20  ;;  %v4784_v20 = vor.u32 %v5757_v32, %v4781_v22  ;;  %v5731_v32 = vld [vmem:[#allocation7 + $0x514] sm:$0xf]  ;;  %v4677_v22 = vld [vmem:[#allocation7 + $0x518] sm:$0xf0] }
 0x339   : > { %v6036_v41 = vpop.eup %6035 }
 0x33a   : > { %v1229_v42 = vmul.f32 %v6034_v34, %v1228_v40  ;;  %v1235_v46 = vmul.f32 %v6036_v41, %v1223_v35  ;;  %vm1241_vm15 = vweird.f32 %v6036_v41  ;;  %v4707_v35 = vld [vmem:[#allocation7 + $0x550] sm:$0xf] }
 0x33b   : > { %vm1242_vm1 = vmor %vm1240_vm0, %vm1241_vm15  ;;  %v4771_v40 = vld [vmem:[#allocation7 + $0x5d0] sm:$0xf] }
 0x33c   : > { %v1233_v48 = vsel %vm1232_vm14, %v6034_v34, %v1229_v42  ;;  %v1236_v49 = vmul.f32 %v6036_v41, %v1235_v46  ;;  %v4780_v34 = vor.u32 %v5758_v29, %v4779_v26  ;;  %v5739_v42 = vld [vmem:[#allocation7 + $0x554] sm:$0xf]  ;;  %v4709_v46 = vld [vmem:[#allocation7 + $0x558] sm:$0xf0] }
 0x33d   : > { %v1244_v55 = vmul.f32 %v1233_v48, %v6431_v6  ;;  %v1245_v56 = vmul.f32 %v1233_v48, %v6433_v7  ;;  %v4723_v7 = vld [vmem:[#allocation7 + $0x570] sm:$0xf]  ;;  %v4773_v48 = vld [vmem:[#allocation7 + $0x5d8] sm:$0xf0] }
 0x33e   : > { %v1237_v50 = vmul.f32 0.5, %v1236_v49  ;;  %v4724_v52 = vor.u32 %v5744_v10, %v4723_v7  ;;  %v4708_v49 = vor.u32 %v5740_v37, %v4707_v35  ;;  %v5735_v7 = vld [vmem:[#allocation7 + $0x534] sm:$0xf]  ;;  %v4757_v10 = vld [vmem:[#allocation7 + $0x5b8] sm:$0xf0]  ;;  %v4740_v37 = vor.u32 %v5748_v31, %v4739_v30 }
 0x33f   : > { %v1257_v62 = vmul.f32 %v1253_v53, %v1244_v55  ;;  %v1258_v63 = vmul.f32 %v1254_v54, %v1245_v56  ;;  %v4712_v55 = vor.u32 %v5739_v42, %v4709_v46  ;;  %v4776_v56 = vor.u32 %v5755_v47, %v4773_v48  ;;  %v4731_v42 = vld [vmem:[#allocation7 + $0x580] sm:$0xf]  ;;  %v5746_v46 = vld [vmem:[#allocation7 + $0x584] sm:$0xf0]  ;;  %v5729_v47 = vld [vmem:[#allocation7 + $0x504] sm:$0xf] }
 0x340   : > { %v1238_v58 = vsub.f32 1.5, %v1237_v50  ;;  %v4669_v48 = vld [vmem:[#allocation7 + $0x508] sm:$0xf0] }
 0x341   : > { %v1266_v3 = vadd.f32 %v1262_v60, %v1257_v62  ;;  %v1267_v4 = vadd.f32 %v1263_v61, %v1258_v63  ;;  %v4765_v62 = vld [vmem:[#allocation7 + $0x5c8] sm:$0xf0] }
 0x342   : > { %v1239_v59 = vmul.f32 %v6036_v41, %v1238_v58  ;;  %v5754_v58 = vld [vmem:[#allocation7 + $0x5c4] sm:$0xf0] }
 0x343   : > { %v1270_v15 = vmax.f32 %v1266_v3, 0.0  ;;  %v1271_v23 = vmax.f32 %v1267_v4, 0.0 }
 0x344   : > { %v1243_v0 = vsel %vm1242_vm1, %v6036_v41, %v1239_v59  ;;  %v5756_v41 = vld [vmem:[#allocation7 + $0x5d4] sm:$0xf0]  ;;  %v5737_v59 = vld [vmem:[#allocation7 + $0x544] sm:$0xf] }
 0x345   : > { %v1246_v1 = vmul.f32 %v1243_v0, %v6439_v14  ;;  %v1247_v2 = vmul.f32 %v1243_v0, %v6441_v16  ;;  %v4789_v14 = vld [vmem:[#allocation7 + $0x5f8] sm:$0xf0]  ;;  %v4772_v50 = vor.u32 %v5756_v41, %v4771_v40  ;;  %v4764_v0 = vor.u32 %v5754_v58, %v4763_v57 }
 0x346   : > { %v4792_v19 = vor.u32 %v5759_v39, %v4789_v14  ;;  %v4685_v14 = vld [vmem:[#allocation7 + $0x528] sm:$0xf0]  ;;  %v4680_v40 = vor.u32 %v5731_v32, %v4677_v22 }
 0x347   : > { %v1259_v6 = vmul.f32 %v1253_v53, %v1246_v1  ;;  %v1260_v5 = vmul.f32 %v1254_v54, %v1247_v2  ;;  %v4699_v53 = vld [vmem:[#allocation7 + $0x540] sm:$0xf]  ;;  %v5738_v54 = vld [vmem:[#allocation7 + $0x544] sm:$0xf0]  ;;  %v4691_v1 = vld [vmem:[#allocation7 + $0x530] sm:$0xf] }
 0x348   : > { %v4700_v63 = vor.u32 %v5738_v54, %v4699_v53  ;;  %v5736_v2 = vld [vmem:[#allocation7 + $0x534] sm:$0xf0]  ;;  %v4732_v54 = vor.u32 %v5746_v46, %v4731_v42 }
 0x349   : > { %v1268_v8 = vadd.f32 %v1262_v60, %v1259_v6  ;;  %v1269_v9 = vadd.f32 %v1263_v61, %v1260_v5  ;;  %v4701_v60 = vld [vmem:[#allocation7 + $0x548] sm:$0xf0]  ;;  %v5753_v61 = vld [vmem:[#allocation7 + $0x5c4] sm:$0xf]  ;;  %v4755_v6 = vld [vmem:[#allocation7 + $0x5b0] sm:$0xf]  ;;  %v4692_v11 = vor.u32 %v5736_v2, %v4691_v1 }
 0x34a   : > { %v4704_v3 = vor.u32 %v5737_v59, %v4701_v60  ;;  %v4768_v4 = vor.u32 %v5753_v61, %v4765_v62  ;;  %v5752_v5 = vld [vmem:[#allocation7 + $0x5b4] sm:$0xf0] }
 0x34b   : > { %v1272_v21 = vmax.f32 %v1268_v8, 0.0  ;;  %v1273_v24 = vmax.f32 %v1269_v9, 0.0  ;;  %v4693_v8 = vld [vmem:[#allocation7 + $0x538] sm:$0xf0]  ;;  %v5751_v9 = vld [vmem:[#allocation7 + $0x5b4] sm:$0xf]  ;;  %v4756_v12 = vor.u32 %v5752_v5, %v4755_v6 }
 0x34c   : > { %v4696_v39 = vor.u32 %v5735_v7, %v4693_v8 }
 0x34d   : > { %v6451_v18 = vpack.c.bf16 %v1272_v21, %v1270_v15  ;;  %v6453_v16 = vpack.c.bf16 %v1273_v24, %v1271_v23  ;;  %v4760_v15 = vor.u32 %v5751_v9, %v4757_v10  ;;  %v4747_v21 = vld [vmem:[#allocation7 + $0x5a0] sm:$0xf]  ;;  %v5750_v23 = vld [vmem:[#allocation7 + $0x5a4] sm:$0xf0]  ;;  %v5733_v24 = vld [vmem:[#allocation7 + $0x524] sm:$0xf] }
 0x34e   : > { %v4748_v28 = vor.u32 %v5750_v23, %v4747_v21  ;;  %v4688_v26 = vor.u32 %v5733_v24, %v4685_v14 }
 0x34f   : > { %1510 = vmatmul.bf16.vlgmr.msrb.gmra.mxu0 %v6451_v18  ;;  %1524 = vmatmul.bf16.vlgmr.msrb.gmra.mxu1 %v6453_v16 }
 0x350   : > { %1538 = vmatmul.bf16.vlgmr.msrb.gmra.mxu2 %v6451_v18  ;;  %1552 = vmatmul.bf16.vlgmr.msrb.gmra.mxu3 %v6453_v16 }
 0x351   : > { %1987 = vmatpush.bf16.msrb.mxu0 %v4724_v52  ;;  %2001 = vmatpush.bf16.msrb.mxu1 %v4788_v25  ;;  %v5749_v52 = vld [vmem:[#allocation7 + $0x5a4] sm:$0xf]  ;;  %v4749_v25 = vld [vmem:[#allocation7 + $0x5a8] sm:$0xf0] }
 0x352   : > { %2015 = vmatpush.bf16.msrb.mxu2 %v4728_v27  ;;  %2029 = vmatpush.bf16.msrb.mxu3 %v4792_v19  ;;  %v4675_v27 = vld [vmem:[#allocation7 + $0x510] sm:$0xf]  ;;  %v5732_v19 = vld [vmem:[#allocation7 + $0x514] sm:$0xf0]  ;;  %v4752_v29 = vor.u32 %v5749_v52, %v4749_v25 }
 0x353   : > { %v4676_v35 = vor.u32 %v5732_v19, %v4675_v27 }
 0x355   : > { %1988 = vmatpush.bf16.msrb.mxu0 %v4716_v33  ;;  %2002 = vmatpush.bf16.msrb.mxu1 %v4780_v34  ;;  %v5747_v33 = vld [vmem:[#allocation7 + $0x594] sm:$0xf]  ;;  %v4741_v34 = vld [vmem:[#allocation7 + $0x598] sm:$0xf0] }
 0x356   : > { %2016 = vmatpush.bf16.msrb.mxu2 %v4720_v51  ;;  %2030 = vmatpush.bf16.msrb.mxu3 %v4784_v20  ;;  %v4667_v51 = vld [vmem:[#allocation7 + $0x500] sm:$0xf]  ;;  %v5730_v20 = vld [vmem:[#allocation7 + $0x504] sm:$0xf0]  ;;  %v4744_v41 = vor.u32 %v5747_v33, %v4741_v34 }
 0x357   : > { %v4668_v53 = vor.u32 %v5730_v20, %v4667_v51 }
 0x359   : > { %1989 = vmatpush.bf16.msrb.mxu0 %v4708_v49  ;;  %2003 = vmatpush.bf16.msrb.mxu1 %v4772_v50  ;;  %v5745_v49 = vld [vmem:[#allocation7 + $0x584] sm:$0xf]  ;;  %v4733_v50 = vld [vmem:[#allocation7 + $0x588] sm:$0xf0] }
 0x35a   : > { %2017 = vmatpush.bf16.msrb.mxu2 %v4712_v55  ;;  %2031 = vmatpush.bf16.msrb.mxu3 %v4776_v56  ;;  %v4672_v55 = vor.u32 %v5729_v47, %v4669_v48  ;;  %v4736_v56 = vor.u32 %v5745_v49, %v4733_v50  ;;  %v2068_v48 = vld [vmem:[#allocation5 + $0x5] ss:$8 sm:$0x3] }
 0x35d   : > { %1990 = vmatpush.bf16.msrb.mxu0 %v4700_v63  ;;  %2004 = vmatpush.bf16.msrb.mxu1 %v4764_v0 }
 0x35e   : > { %2018 = vmatpush.bf16.msrb.mxu2 %v4704_v3  ;;  %2032 = vmatpush.bf16.msrb.mxu3 %v4768_v4 }
 0x35f   : > { %1746 = vmatmul.bf16.vlgmr.msra.gmra.mxu0 %v6451_v18  ;;  %1760 = vmatmul.bf16.vlgmr.msra.gmra.mxu1 %v6453_v16 }
 0x360   : > { %1774 = vmatmul.bf16.vlgmr.msra.gmra.mxu2 %v6451_v18  ;;  %1788 = vmatmul.bf16.vlgmr.msra.gmra.mxu3 %v6453_v16 }
 0x361   : > { %1991 = vmatpush.bf16.msrb.mxu0 %v4692_v11  ;;  %2005 = vmatpush.bf16.msrb.mxu1 %v4756_v12 }
 0x362   : > { %2019 = vmatpush.bf16.msrb.mxu2 %v4696_v39  ;;  %2033 = vmatpush.bf16.msrb.mxu3 %v4760_v15 }
 0x365   : > { %1992 = vmatpush.bf16.msrb.mxu0 %v4684_v43  ;;  %2006 = vmatpush.bf16.msrb.mxu1 %v4748_v28 }
 0x366   : > { %2020 = vmatpush.bf16.msrb.mxu2 %v4688_v26  ;;  %2034 = vmatpush.bf16.msrb.mxu3 %v4752_v29 }
 0x369   : > { %1993 = vmatpush.bf16.msrb.mxu0 %v4676_v35  ;;  %2007 = vmatpush.bf16.msrb.mxu1 %v4740_v37 }
 0x36a   : > { %2021 = vmatpush.bf16.msrb.mxu2 %v4680_v40  ;;  %2035 = vmatpush.bf16.msrb.mxu3 %v4744_v41 }
 0x36d   : > { %1994 = vmatpush.bf16.msrb.mxu0 %v4668_v53  ;;  %2008 = vmatpush.bf16.msrb.mxu1 %v4732_v54 }
 0x36e   : > { %2022 = vmatpush.bf16.msrb.mxu2 %v4672_v55  ;;  %2036 = vmatpush.bf16.msrb.mxu3 %v4736_v56 }
 0x370   : > { %1995 = vmatmul.bf16.vlgmr.msrb.gmra.mxu0 %v6451_v18  ;;  %2009 = vmatmul.bf16.vlgmr.msrb.gmra.mxu1 %v6453_v16 }
 0x371   : > { %2023 = vmatmul.bf16.vlgmr.msrb.gmra.mxu2 %v6451_v18  ;;  %2037 = vmatmul.bf16.vlgmr.msrb.gmra.mxu3 %v6453_v16 }
 0x3cc   : > { %v1511_v57 = vpop.f32.mrf.mxu0  ;;  %v1525_v58 = vpop.f32.mrf.mxu1 }
 0x3cd   : > { %v1526_v9 = vadd.f32 %v1525_v58, %v1511_v57  ;;  %v2070_v58 = vperm.slane %v2068_v48, 0 }
 0x3cf   : > { %v1558_v13 = vmul.f32 %v6404_v44, %v1526_v9 }
 0x3d1   : > { %v1566_v14 = vrot.slane %v1558_v13, 7 }
 0x3d3   : > { %v1539_v59 = vpop.f32.mrf.mxu2  ;;  %v1553_v60 = vpop.f32.mrf.mxu3  ;;  %v1576_v30 = vsel %vm660_vm10, 0.0, %v1566_v14 }
 0x3d4   : > { %v1513_v61 = vpop.f32.mrf.mxu0  ;;  %v1527_v62 = vpop.f32.mrf.mxu1  ;;  %v1554_v11 = vadd.f32 %v1553_v60, %v1539_v59 }
 0x3d5   : > { %v1528_v18 = vadd.f32 %v1527_v62, %v1513_v61 }
 0x3d6   : > { %v1559_v15 = vmul.f32 %v6404_v44, %v1554_v11 }
 0x3d7   : > { %v1560_v17 = vmul.f32 %v6412_v45, %v1528_v18  ;;  %v6045_v18 = vld [vmem:[%s6348_s7] sm:$0xff] }
 0x3d8   : > { %v1567_v19 = vrot.slane %v1559_v15, 7  ;;  %v4851_v15 = vld [vmem:[#allocation7 + $0x670] sm:$0xf] }
 0x3d9   : > { %v1568_v52 = vrot.slane %v1560_v17, 7 }
 0x3da   : > { %v1577_v37 = vsel %vm660_vm10, 0.0, %v1567_v19 }
 0x3db   : > { %v1541_v63 = vpop.f32.mrf.mxu2  ;;  %v1555_v0 = vpop.f32.mrf.mxu3  ;;  %v1569_v31 = vsel %vm660_vm10, %v1566_v14, %v1568_v52  ;;  %v5824_v14 = vld [vmem:[#allocation7 + $0x6f4] sm:$0xf0]  ;;  %v5807_v52 = vld [vmem:[#allocation7 + $0x674] sm:$0xf] }
 0x3dc   : > { %v1747_v1 = vpop.f32.mrf.mxu0  ;;  %v1761_v2 = vpop.f32.mrf.mxu1  ;;  %v1556_v12 = vadd.f32 %v1555_v0, %v1541_v63  ;;  %v2071_v63 = vperm.slane %v2068_v48, 1  ;;  %v5803_v48 = vld [vmem:[#allocation7 + $0x654] sm:$0xf] }
 0x3dd   : > { %v1748_v22 = vadd.f32 %v1747_v1, %v1576_v30  ;;  %v5806_v30 = vld [vmem:[#allocation7 + $0x664] sm:$0xf0] }
 0x3de   : > { %v1561_v21 = vmul.f32 %v6412_v45, %v1556_v12  ;;  %v6048_v12 = vld [vmem:[%s6348_s7 + $0x18] sm:$0xff] }
 0x3df   : > { %v1762_v49 = vadd.f32 %v1761_v2, %v1748_v22 }
 0x3e0   : > { %v1570_v26 = vrot.slane %v1561_v21, 7  ;;  %v5808_v21 = vld [vmem:[#allocation7 + $0x674] sm:$0xf0] }
 0x3e2   : > { %v1571_v51 = vsel %vm660_vm10, %v1567_v19, %v1570_v26  ;;  %v4917_v19 = vld [vmem:[#allocation7 + $0x6f8] sm:$0xf0]  ;;  %v4843_v26 = vld [vmem:[#allocation7 + $0x660] sm:$0xf] }
 0x3e3   : > { %v1775_v3 = vpop.f32.mrf.mxu2  ;;  %v1789_v4 = vpop.f32.mrf.mxu3  ;;  %v4844_v22 = vor.u32 %v5806_v30, %v4843_v26 }
 0x3e4   : > { %v1749_v6 = vpop.f32.mrf.mxu0  ;;  %v1763_v5 = vpop.f32.mrf.mxu1  ;;  %v1776_v50 = vadd.f32 %v1775_v3, %v1577_v37  ;;  %v5821_v37 = vld [vmem:[#allocation7 + $0x6e4] sm:$0xf] }
 0x3e5   : > { %v1750_v33 = vadd.f32 %v1749_v6, %v1569_v31  ;;  %v4907_v31 = vld [vmem:[#allocation7 + $0x6e0] sm:$0xf] }
 0x3e6   : > { %v1790_v61 = vadd.f32 %v1789_v4, %v1776_v50  ;;  %v6047_v4 = vld [vmem:[%s6348_s7 + $0x10] sm:$0xff]  ;;  %v4837_v50 = vld [vmem:[#allocation7 + $0x658] sm:$0xf0] }
 0x3e7   : > { %v1764_v53 = vadd.f32 %v1763_v5, %v1750_v33 }
 0x3eb   : > { %v1777_v7 = vpop.f32.mrf.mxu2  ;;  %v1791_v8 = vpop.f32.mrf.mxu3 }
 0x3ec   : > { %v1778_v54 = vadd.f32 %v1777_v7, %v1571_v51 }
 0x3ed   : > { %v1996_v10 = vpop.f32.mrf.mxu0  ;;  %v2010_v16 = vpop.f32.mrf.mxu1 }
 0x3ee   : > { %v2011_v39 = vadd.f32 %v2010_v16, %v1996_v10  ;;  %v1792_v62 = vadd.f32 %v1791_v8, %v1778_v54  ;;  %v6046_v16 = vld [vmem:[%s6348_s7 + $0x8] sm:$0xff]  ;;  %v4901_v54 = vld [vmem:[#allocation7 + $0x6d8] sm:$0xf0] }
 0x3f0   : > { %v2043_v27 = vmul.f32 %v6410_v38, %v2011_v39 }
 0x3f2   : > { %v2051_v35 = vrot.slane %v2043_v27, 1  ;;  %v5823_v27 = vld [vmem:[#allocation7 + $0x6f4] sm:$0xf] }
 0x3f4   : > { %v2024_v23 = vpop.f32.mrf.mxu2  ;;  %v2038_v24 = vpop.f32.mrf.mxu3 }
 0x3f5   : > { %v1998_v25 = vpop.f32.mrf.mxu0  ;;  %v2012_v43 = vpop.f32.mrf.mxu1  ;;  %v2039_v32 = vadd.f32 %v2038_v24, %v2024_v23  ;;  %v4915_v23 = vld [vmem:[#allocation7 + $0x6f0] sm:$0xf]  ;;  %v4852_v24 = vor.u32 %v5808_v21, %v4851_v15 }
 0x3f6   : > { %v2013_v28 = vadd.f32 %v2012_v43, %v1998_v25  ;;  %v4853_v25 = vld [vmem:[#allocation7 + $0x678] sm:$0xf0]  ;;  %v4916_v43 = vor.u32 %v5824_v14, %v4915_v23 }
 0x3f7   : > { %v2044_v41 = vmul.f32 %v6410_v38, %v2039_v32  ;;  %2410 = vmatpush.bf16.msra.mxu0 %v4852_v24  ;;  %v5822_v32 = vld [vmem:[#allocation7 + $0x6e4] sm:$0xf0] }
 0x3f8   : > { %v2045_v29 = vmul.f32 %v6408_v36, %v2013_v28  ;;  %v4856_v28 = vor.u32 %v5807_v52, %v4853_v25  ;;  %2424 = vmatpush.bf16.msra.mxu1 %v4916_v43  ;;  %v4908_v33 = vor.u32 %v5822_v32, %v4907_v31 }
 0x3f9   : > { %v2054_v59 = vrot.slane %v2044_v41, 1  ;;  %v5804_v41 = vld [vmem:[#allocation7 + $0x654] sm:$0xf0] }
 0x3fa   : > { %v2052_v34 = vrot.slane %v2045_v29, 1  ;;  %v4920_v29 = vor.u32 %v5823_v27, %v4917_v19  ;;  %2438 = vmatpush.bf16.msra.mxu2 %v4856_v28 }
 0x3fb   : > { %2411 = vmatpush.bf16.msra.mxu0 %v4844_v22 }
 0x3fc   : > { %v2026_v20 = vpop.f32.mrf.mxu2  ;;  %v2040_v40 = vpop.f32.mrf.mxu3  ;;  %v2053_v42 = vsel %vm1146_vm11, %v2051_v35, %v2052_v34  ;;  %v2061_v46 = vsel %vm1146_vm11, %v2052_v34, 0.0  ;;  %v5805_v34 = vld [vmem:[#allocation7 + $0x664] sm:$0xf]  ;;  %v4845_v35 = vld [vmem:[#allocation7 + $0x668] sm:$0xf0]  ;;  %2452 = vmatpush.bf16.msra.mxu3 %v4920_v29  ;;  %2425 = vmatpush.bf16.msra.mxu1 %v4908_v33 }
 0x3fd   : > { %v2041_v47 = vadd.f32 %v2040_v40, %v2026_v20  ;;  %v2063_v56 = vadd.f32 %v2053_v42, %v1762_v49  ;;  %v2065_v57 = vadd.f32 %v2061_v46, %v1764_v53  ;;  %v4848_v51 = vor.u32 %v5805_v34, %v4845_v35  ;;  %v4909_v20 = vld [vmem:[#allocation7 + $0x6e8] sm:$0xf0]  ;;  %v4835_v40 = vld [vmem:[#allocation7 + $0x650] sm:$0xf]  ;;  %v5819_v53 = vld [vmem:[#allocation7 + $0x6d4] sm:$0xf] }
 0x3fe   : > { %v4912_v42 = vor.u32 %v5821_v37, %v4909_v20  ;;  %v4899_v46 = vld [vmem:[#allocation7 + $0x6d0] sm:$0xf]  ;;  %v4836_v49 = vor.u32 %v5804_v41, %v4835_v40  ;;  %v5800_v35 = vld [vmem:[#allocation7 + $0x634] sm:$0xf0]  ;;  %v5799_v40 = vld [vmem:[#allocation7 + $0x634] sm:$0xf] }
 0x3ff   : > { %v2046_v55 = vmul.f32 %v6408_v36, %v2041_v47  ;;  %v2074_v6 = vadd.f32 %v2070_v58, %v2063_v56  ;;  %v2076_v5 = vadd.f32 %v2070_v58, %v2065_v57  ;;  %v5820_v47 = vld [vmem:[#allocation7 + $0x6d4] sm:$0xf0]  ;;  %2439 = vmatpush.bf16.msra.mxu2 %v4848_v51  ;;  %v4840_v56 = vor.u32 %v5803_v48, %v4837_v50  ;;  %v4827_v57 = vld [vmem:[#allocation7 + $0x640] sm:$0xf]  ;;  %v5802_v58 = vld [vmem:[#allocation7 + $0x644] sm:$0xf0] }
 0x400   : > { %2453 = vmatpush.bf16.msra.mxu3 %v4912_v42  ;;  %2412 = vmatpush.bf16.msra.mxu0 %v4836_v49  ;;  %v4819_v34 = vld [vmem:[#allocation7 + $0x630] sm:$0xf]  ;;  %v5816_v20 = vld [vmem:[#allocation7 + $0x6b4] sm:$0xf0]  ;;  %v4821_v41 = vld [vmem:[#allocation7 + $0x638] sm:$0xf0] }
 0x401   : > { %v2055_v60 = vrot.slane %v2046_v55, 1  ;;  %v6484_v10 = vadd.f32 %v6045_v18, %v2074_v6  ;;  %v6490_v8 = vadd.f32 %v6047_v4, %v2076_v5  ;;  %v4900_v55 = vor.u32 %v5820_v47, %v4899_v46  ;;  %v4883_v37 = vld [vmem:[#allocation7 + $0x6b0] sm:$0xf]  ;;  %v5815_v47 = vld [vmem:[#allocation7 + $0x6b4] sm:$0xf] }
 0x402   : > { %v4828_v6 = vor.u32 %v5802_v58, %v4827_v57  ;;  %v4820_v51 = vor.u32 %v5800_v35, %v4819_v34  ;;  %v4884_v42 = vor.u32 %v5816_v20, %v4883_v37  ;;  %v4824_v46 = vor.u32 %v5799_v40, %v4821_v41  ;;  %v4885_v48 = vld [vmem:[#allocation7 + $0x6b8] sm:$0xf0]  ;;  %v4811_v50 = vld [vmem:[#allocation7 + $0x620] sm:$0xf]  ;;  %v5797_v57 = vld [vmem:[#allocation7 + $0x624] sm:$0xf] }
 0x403   : > { %v2056_v0 = vsel %vm1146_vm11, %v2054_v59, %v2055_v60  ;;  %v2062_v1 = vsel %vm1146_vm11, %v2055_v60, 0.0  ;;  %v4891_v59 = vld [vmem:[#allocation7 + $0x6c0] sm:$0xf]  ;;  %v4904_v60 = vor.u32 %v5819_v53, %v4901_v54  ;;  %2426 = vmatpush.bf16.msra.mxu1 %v4900_v55  ;;  %2440 = vmatpush.bf16.msra.mxu2 %v4840_v56  ;;  %v4888_v49 = vor.u32 %v5815_v47, %v4885_v48  ;;  %v5798_v53 = vld [vmem:[#allocation7 + $0x624] sm:$0xf0] }
 0x404   : > { %v2064_v2 = vadd.f32 %v2056_v0, %v1790_v61  ;;  %v2066_v3 = vadd.f32 %v2062_v1, %v1792_v62  ;;  %v5818_v61 = vld [vmem:[#allocation7 + $0x6c4] sm:$0xf0]  ;;  %v5801_v62 = vld [vmem:[#allocation7 + $0x644] sm:$0xf]  ;;  %v4893_v1 = vld [vmem:[#allocation7 + $0x6c8] sm:$0xf0]  ;;  %2413 = vmatpush.bf16.msra.mxu0 %v4828_v6  ;;  %v4812_v55 = vor.u32 %v5798_v53, %v4811_v50 }
 0x405   : > { %v5817_v0 = vld [vmem:[#allocation7 + $0x6c4] sm:$0xf]  ;;  %2454 = vmatpush.bf16.msra.mxu3 %v4904_v60  ;;  %v4875_v54 = vld [vmem:[#allocation7 + $0x6a0] sm:$0xf]  ;;  %v5814_v56 = vld [vmem:[#allocation7 + $0x6a4] sm:$0xf0] }
 0x406   : > { %v2075_v7 = vadd.f32 %v2071_v63, %v2064_v2  ;;  %v2077_v9 = vadd.f32 %v2071_v63, %v2066_v3  ;;  %v4829_v63 = vld [vmem:[#allocation7 + $0x648] sm:$0xf0]  ;;  %v5812_v6 = vld [vmem:[#allocation7 + $0x694] sm:$0xf0]  ;;  %v5775_v37 = vld [vmem:[#allocation7 + $0x774] sm:$0xf] }
 0x407   : > { %v4832_v18 = vor.u32 %v5801_v62, %v4829_v63  ;;  %v4813_v58 = vld [vmem:[#allocation7 + $0x628] sm:$0xf0]  ;;  %v5791_v20 = vld [vmem:[#allocation7 + $0x7f4] sm:$0xf]  ;;  %v5045_v41 = vld [vmem:[#allocation7 + $0x7f8] sm:$0xf0] }
 0x408   : > { %v6487_v11 = vadd.f32 %v6046_v16, %v2075_v7  ;;  %v6493_v13 = vadd.f32 %v6048_v12, %v2077_v9  ;;  %v4892_v9 = vor.u32 %v5818_v61, %v4891_v59  ;;  %v4896_v16 = vor.u32 %v5817_v0, %v4893_v1  ;;  %2414 = vmatpush.bf16.msra.mxu0 %v4820_v51  ;;  %v5813_v61 = vld [vmem:[#allocation7 + $0x6a4] sm:$0xf]  ;;  %v4877_v62 = vld [vmem:[#allocation7 + $0x6a8] sm:$0xf0]  ;;  %v4803_v0 = vld [vmem:[#allocation7 + $0x610] sm:$0xf] }
 0x409   : > { %2441 = vmatpush.bf16.msra.mxu2 %v4832_v18  ;;  %v4876_v59 = vor.u32 %v5814_v56, %v4875_v54  ;;  %v4816_v60 = vor.u32 %v5797_v57, %v4813_v58  ;;  %v4880_v63 = vor.u32 %v5813_v61, %v4877_v62  ;;  %v5796_v1 = vld [vmem:[#allocation7 + $0x614] sm:$0xf0]  ;;  %v4981_v51 = vld [vmem:[#allocation7 + $0x778] sm:$0xf0]  ;;  %v5048_v47 = vor.u32 %v5791_v20, %v5045_v41  ;;  %v5790_v50 = vld [vmem:[#allocation7 + $0x7e4] sm:$0xf0] }
 0x40a   : > { %v2082_v17 = vadd.f32 %v6487_v11, %v6484_v10  ;;  %v2085_v39 = vadd.f32 %v6493_v13, %v6490_v8  ;;  %2427 = vmatpush.bf16.msra.mxu1 %v4892_v9  ;;  %2455 = vmatpush.bf16.msra.mxu3 %v4896_v16  ;;  %v5811_v16 = vld [vmem:[#allocation7 + $0x694] sm:$0xf]  ;;  %v4984_v40 = vor.u32 %v5775_v37, %v4981_v51  ;;  %v5773_v53 = vld [vmem:[#allocation7 + $0x764] sm:$0xf]  ;;  %v5037_v57 = vld [vmem:[#allocation7 + $0x7e8] sm:$0xf0] }
 0x40b   : > { %v5789_v56 = vld [vmem:[#allocation7 + $0x7e4] sm:$0xf]  ;;  %v5772_v61 = vld [vmem:[#allocation7 + $0x754] sm:$0xf0]  ;;  %v5027_v62 = vld [vmem:[#allocation7 + $0x7d0] sm:$0xf] }
 0x40c   : > { %2083 = vadd.xlane.f32.xlu2 %v2082_v17  ;;  %2086 = vadd.xlane.f32.xlu0 %v2085_v39  ;;  %v5013_v41 = vld [vmem:[#allocation7 + $0x7b8] sm:$0xf0] }
 0x40d   : > { %2442 = vmatpush.bf16.msra.mxu2 %v4824_v46  ;;  %2415 = vmatpush.bf16.msra.mxu0 %v4812_v55  ;;  %v5774_v46 = vld [vmem:[#allocation7 + $0x764] sm:$0xf0]  ;;  %v4973_v55 = vld [vmem:[#allocation7 + $0x768] sm:$0xf0] }
 0x40e   : > { %2428 = vmatpush.bf16.msra.mxu1 %v4884_v42  ;;  %2456 = vmatpush.bf16.msra.mxu3 %v4888_v49  ;;  %v4971_v42 = vld [vmem:[#allocation7 + $0x760] sm:$0xf]  ;;  %v4976_v58 = vor.u32 %v5773_v53, %v4973_v55  ;;  %v5765_v55 = vld [vmem:[#allocation7 + $0x724] sm:$0xf] }
 0x40f   : > { %v4972_v48 = vor.u32 %v5774_v46, %v4971_v42  ;;  %v5035_v49 = vld [vmem:[#allocation7 + $0x7e0] sm:$0xf] }
 0x410   : > { %v5036_v54 = vor.u32 %v5790_v50, %v5035_v49  ;;  %v5766_v49 = vld [vmem:[#allocation7 + $0x724] sm:$0xf0]  ;;  %v5003_v50 = vld [vmem:[#allocation7 + $0x7a0] sm:$0xf] }
 0x411   : > { %2443 = vmatpush.bf16.msra.mxu2 %v4816_v60  ;;  %v4963_v60 = vld [vmem:[#allocation7 + $0x750] sm:$0xf] }
 0x412   : > { %2429 = vmatpush.bf16.msra.mxu1 %v4876_v59  ;;  %2457 = vmatpush.bf16.msra.mxu3 %v4880_v63  ;;  %v5040_v59 = vor.u32 %v5789_v56, %v5037_v57  ;;  %v4964_v63 = vor.u32 %v5772_v61, %v4963_v60  ;;  %v4941_v56 = vld [vmem:[#allocation7 + $0x728] sm:$0xf0]  ;;  %v5781_v61 = vld [vmem:[#allocation7 + $0x7a4] sm:$0xf] }
 0x413   : > { %v4944_v60 = vor.u32 %v5765_v55, %v4941_v56  ;;  %v2159_v56 = vld [vmem:[#allocation5 + $0x7] ss:$8 sm:$0x3] }
 0x47f   : > { %v2084_v2 = vpop.xlane.xlu2 %2083  ;;  %v2087_v3 = vpop.xlane.xlu0 %2086 }
 0x480   : > { %v2088_v5 = vrot.slane %v2084_v2, 4  ;;  %v2094_v7 = vrot.slane %v2087_v3, 4 }
 0x482   : > { %v2089_v4 = vadd.f32 %v2088_v5, %v2084_v2  ;;  %v2095_v12 = vadd.f32 %v2094_v7, %v2087_v3  ;;  %v4867_v2 = vld [vmem:[#allocation7 + $0x690] sm:$0xf]  ;;  %v4804_v3 = vor.u32 %v5796_v1, %v4803_v0  ;;  %v5795_v5 = vld [vmem:[#allocation7 + $0x614] sm:$0xf]  ;;  %v4805_v7 = vld [vmem:[#allocation7 + $0x618] sm:$0xf0] }
 0x483   : > { %v4868_v9 = vor.u32 %v5812_v6, %v4867_v2  ;;  %v4808_v18 = vor.u32 %v5795_v5, %v4805_v7  ;;  %v5788_v0 = vld [vmem:[#allocation7 + $0x7d4] sm:$0xf0]  ;;  %v5771_v1 = vld [vmem:[#allocation7 + $0x754] sm:$0xf]  ;;  %v4965_v2 = vld [vmem:[#allocation7 + $0x758] sm:$0xf0] }
 0x484   : > { %v2090_v17 = vrot.slane %v2089_v4, 2  ;;  %v2096_v39 = vrot.slane %v2095_v12, 2  ;;  %2416 = vmatpush.bf16.msra.mxu0 %v4804_v3  ;;  %v5028_v3 = vor.u32 %v5788_v0, %v5027_v62  ;;  %v4968_v6 = vor.u32 %v5771_v1, %v4965_v2  ;;  %v5787_v5 = vld [vmem:[#allocation7 + $0x7d4] sm:$0xf]  ;;  %v5029_v7 = vld [vmem:[#allocation7 + $0x7d8] sm:$0xf0] }
 0x485   : > { %2430 = vmatpush.bf16.msra.mxu1 %v4868_v9  ;;  %2444 = vmatpush.bf16.msra.mxu2 %v4808_v18  ;;  %v5032_v9 = vor.u32 %v5787_v5, %v5029_v7  ;;  %v4955_v18 = vld [vmem:[#allocation7 + $0x740] sm:$0xf]  ;;  %v5005_v62 = vld [vmem:[#allocation7 + $0x7a8] sm:$0xf0]  ;;  %v4931_v2 = vld [vmem:[#allocation7 + $0x710] sm:$0xf] }
 0x486   : > { %v2091_v15 = vadd.f32 %v2090_v17, %v2089_v4  ;;  %v2097_v21 = vadd.f32 %v2096_v39, %v2095_v12  ;;  %v4869_v4 = vld [vmem:[#allocation7 + $0x698] sm:$0xf0]  ;;  %v4795_v17 = vld [vmem:[#allocation7 + $0x600] sm:$0xf]  ;;  %v5794_v39 = vld [vmem:[#allocation7 + $0x604] sm:$0xf0] }
 0x487   : > { %v4872_v12 = vor.u32 %v5811_v16, %v4869_v4  ;;  %v5770_v16 = vld [vmem:[#allocation7 + $0x744] sm:$0xf0]  ;;  %v5019_v4 = vld [vmem:[#allocation7 + $0x7c0] sm:$0xf]  ;;  %v5780_v7 = vld [vmem:[#allocation7 + $0x794] sm:$0xf0] }
 0x488   : > { %v2092_v23 = vrot.slane %v2091_v15, 1  ;;  %v2098_v24 = vrot.slane %v2097_v21, 1 }
 0x489   : > { %2458 = vmatpush.bf16.msra.mxu3 %v4872_v12  ;;  %v4956_v12 = vor.u32 %v5770_v16, %v4955_v18  ;;  %v4933_v18 = vld [vmem:[#allocation7 + $0x718] sm:$0xf0] }
 0x48a   : > { %v2093_v14 = vadd.f32 %v2092_v23, %v2091_v15  ;;  %v2099_v52 = vadd.f32 %v2098_v24, %v2097_v21  ;;  %v4859_v15 = vld [vmem:[#allocation7 + $0x680] sm:$0xf]  ;;  %v4796_v21 = vor.u32 %v5794_v39, %v4795_v17  ;;  %v5810_v23 = vld [vmem:[#allocation7 + $0x684] sm:$0xf0]  ;;  %v5793_v24 = vld [vmem:[#allocation7 + $0x604] sm:$0xf] }
 0x48b   : > { %v5786_v17 = vld [vmem:[#allocation7 + $0x7c4] sm:$0xf0]  ;;  %v5769_v39 = vld [vmem:[#allocation7 + $0x744] sm:$0xf] }
 0x48c   : > { %v2100_v25 = vmul.f32 0.00048828125, %v2093_v14  ;;  %v2101_v43 = vmul.f32 0.00048828125, %v2099_v52  ;;  %v4797_v14 = vld [vmem:[#allocation7 + $0x608] sm:$0xf0]  ;;  %v4860_v52 = vor.u32 %v5810_v23, %v4859_v15  ;;  %2417 = vmatpush.bf16.msra.mxu0 %v4796_v21  ;;  %v5020_v21 = vor.u32 %v5786_v17, %v5019_v4 }
 0x48d   : > { %v4957_v15 = vld [vmem:[#allocation7 + $0x748] sm:$0xf0] }
 0x48e   : > { %v6500_v28 = vsub.f32 %v6484_v10, %v2100_v25  ;;  %v6503_v27 = vsub.f32 %v6487_v11, %v2100_v25  ;;  %v6506_v19 = vsub.f32 %v6490_v8, %v2101_v43  ;;  %v6509_v26 = vsub.f32 %v6493_v13, %v2101_v43  ;;  %v5809_v43 = vld [vmem:[#allocation7 + $0x684] sm:$0xf]  ;;  %2431 = vmatpush.bf16.msra.mxu1 %v4860_v52 }
 0x48f   : > { %v4800_v25 = vor.u32 %v5793_v24, %v4797_v14  ;;  %v4960_v23 = vor.u32 %v5769_v39, %v4957_v15  ;;  %v5785_v24 = vld [vmem:[#allocation7 + $0x7c4] sm:$0xf]  ;;  %v5021_v14 = vld [vmem:[#allocation7 + $0x7c8] sm:$0xf0]  ;;  %v5779_v39 = vld [vmem:[#allocation7 + $0x794] sm:$0xf] }
 0x490   : > { %v2106_v29 = vmul.f32 %v6500_v28, %v6500_v28  ;;  %v2107_v30 = vmul.f32 %v6503_v27, %v6503_v27  ;;  %v2108_v31 = vmul.f32 %v6506_v19, %v6506_v19  ;;  %v2109_v32 = vmul.f32 %v6509_v26, %v6509_v26  ;;  %v4997_v15 = vld [vmem:[#allocation7 + $0x798] sm:$0xf0] }
 0x491   : > { %2445 = vmatpush.bf16.msra.mxu2 %v4800_v25  ;;  %v5024_v52 = vor.u32 %v5785_v24, %v5021_v14  ;;  %v4947_v25 = vld [vmem:[#allocation7 + $0x730] sm:$0xf]  ;;  %v4923_v14 = vld [vmem:[#allocation7 + $0x700] sm:$0xf] }
 0x492   : > { %v2110_v22 = vadd.f32 %v2107_v30, %v2106_v29  ;;  %v2113_v33 = vadd.f32 %v2109_v32, %v2108_v31  ;;  %v4861_v29 = vld [vmem:[#allocation7 + $0x688] sm:$0xf0]  ;;  %v4979_v30 = vld [vmem:[#allocation7 + $0x770] sm:$0xf]  ;;  %v5776_v32 = vld [vmem:[#allocation7 + $0x774] sm:$0xf0] }
 0x493   : > { %v4864_v31 = vor.u32 %v5809_v43, %v4861_v29  ;;  %v4980_v34 = vor.u32 %v5776_v32, %v4979_v30  ;;  %v5768_v43 = vld [vmem:[#allocation7 + $0x734] sm:$0xf0]  ;;  %v5011_v29 = vld [vmem:[#allocation7 + $0x7b0] sm:$0xf] }
 0x494   : > { %2111 = vadd.xlane.f32.xlu1 %v2110_v22  ;;  %2114 = vadd.xlane.f32.xlu2 %v2113_v33  ;;  %v5043_v22 = vld [vmem:[#allocation7 + $0x7f0] sm:$0xf]  ;;  %v5792_v33 = vld [vmem:[#allocation7 + $0x7f4] sm:$0xf0]  ;;  %v4948_v32 = vor.u32 %v5768_v43, %v4947_v25  ;;  %v4987_v25 = vld [vmem:[#allocation7 + $0x780] sm:$0xf] }
 0x495   : > { %v5044_v35 = vor.u32 %v5792_v33, %v5043_v22  ;;  %2459 = vmatpush.bf16.msra.mxu3 %v4864_v31  ;;  %2646 = vmatpush.bf16.msrb.mxu0 %v4980_v34  ;;  %v5784_v22 = vld [vmem:[#allocation7 + $0x7b4] sm:$0xf0]  ;;  %v5767_v33 = vld [vmem:[#allocation7 + $0x734] sm:$0xf]  ;;  %v4949_v34 = vld [vmem:[#allocation7 + $0x738] sm:$0xf0] }
 0x496   : > { %2674 = vmatpush.bf16.msrb.mxu2 %v4984_v40  ;;  %v5012_v51 = vor.u32 %v5784_v22, %v5011_v29  ;;  %v4952_v20 = vor.u32 %v5767_v33, %v4949_v34  ;;  %v5783_v40 = vld [vmem:[#allocation7 + $0x7b4] sm:$0xf]  ;;  %v4925_v33 = vld [vmem:[#allocation7 + $0x708] sm:$0xf0]  ;;  %v5777_v34 = vld [vmem:[#allocation7 + $0x784] sm:$0xf] }
 0x497   : > { %2660 = vmatpush.bf16.msrb.mxu1 %v5044_v35  ;;  %v5016_v42 = vor.u32 %v5783_v40, %v5013_v41 }
 0x499   : > { %2688 = vmatpush.bf16.msrb.mxu3 %v5048_v47  ;;  %2647 = vmatpush.bf16.msrb.mxu0 %v4972_v48  ;;  %v4939_v48 = vld [vmem:[#allocation7 + $0x720] sm:$0xf] }
 0x49a   : > { %2675 = vmatpush.bf16.msrb.mxu2 %v4976_v58  ;;  %v4940_v53 = vor.u32 %v5766_v49, %v4939_v48 }
 0x49b   : > { %2661 = vmatpush.bf16.msrb.mxu1 %v5036_v54  ;;  %v5782_v54 = vld [vmem:[#allocation7 + $0x7a4] sm:$0xf0] }
 0x49d   : > { %2689 = vmatpush.bf16.msrb.mxu3 %v5040_v59  ;;  %2648 = vmatpush.bf16.msrb.mxu0 %v4964_v63  ;;  %v5004_v59 = vor.u32 %v5782_v54, %v5003_v50  ;;  %v5008_v63 = vor.u32 %v5781_v61, %v5005_v62  ;;  %v2157_v54 = vld [vmem:[#allocation5 + $0x6] ss:$8 sm:$0x3]  ;;  %v2170_v62 = vperm.slane %v2159_v56, 0 }
 0x49e   : > { %2676 = vmatpush.bf16.msrb.mxu2 %v4968_v6  ;;  %v4995_v6 = vld [vmem:[#allocation7 + $0x790] sm:$0xf] }
 0x49f   : > { %2662 = vmatpush.bf16.msrb.mxu1 %v5028_v3  ;;  %v5764_v3 = vld [vmem:[#allocation7 + $0x714] sm:$0xf0] }
 0x4a0   : > { %v4932_v5 = vor.u32 %v5764_v3, %v4931_v2 }
 0x4a1   : > { %2690 = vmatpush.bf16.msrb.mxu3 %v5032_v9  ;;  %2649 = vmatpush.bf16.msrb.mxu0 %v4956_v12  ;;  %v5763_v9 = vld [vmem:[#allocation7 + $0x714] sm:$0xf]  ;;  %v4996_v12 = vor.u32 %v5780_v7, %v4995_v6 }
 0x4a2   : > { %2677 = vmatpush.bf16.msrb.mxu2 %v4960_v23  ;;  %v4936_v17 = vor.u32 %v5763_v9, %v4933_v18 }
 0x4a3   : > { %2663 = vmatpush.bf16.msrb.mxu1 %v5020_v21  ;;  %v5000_v21 = vor.u32 %v5779_v39, %v4997_v15 }
 0x4a5   : > { %2691 = vmatpush.bf16.msrb.mxu3 %v5024_v52  ;;  %2650 = vmatpush.bf16.msrb.mxu0 %v4948_v32  ;;  %v5762_v52 = vld [vmem:[#allocation7 + $0x704] sm:$0xf0]  ;;  %v5761_v32 = vld [vmem:[#allocation7 + $0x704] sm:$0xf] }
 0x4a6   : > { %2678 = vmatpush.bf16.msrb.mxu2 %v4952_v20  ;;  %v4928_v20 = vor.u32 %v5761_v32, %v4925_v33  ;;  %v5838_v33 = vld [vmem:[#allocation7 + $0x864] sm:$0xf0] }
 0x4a7   : > { %2664 = vmatpush.bf16.msrb.mxu1 %v5012_v51 }
 0x4a9   : > { %2692 = vmatpush.bf16.msrb.mxu3 %v5016_v42  ;;  %2651 = vmatpush.bf16.msrb.mxu0 %v4940_v53 }
 0x4aa   : > { %2679 = vmatpush.bf16.msrb.mxu2 %v4944_v60  ;;  %v2162_v60 = vperm.slane %v2157_v54, 1 }
 0x4ab   : > { %2665 = vmatpush.bf16.msrb.mxu1 %v5004_v59  ;;  %v2161_v59 = vperm.slane %v2157_v54, 0  ;;  %v5155_v54 = vld [vmem:[#allocation7 + $0x8d0] sm:$0xf] }
 0x4ad   : > { %2693 = vmatpush.bf16.msrb.mxu3 %v5008_v63  ;;  %2652 = vmatpush.bf16.msrb.mxu0 %v4932_v5 }
 0x4ae   : > { %2680 = vmatpush.bf16.msrb.mxu2 %v4936_v17  ;;  %v5107_v17 = vld [vmem:[#allocation7 + $0x870] sm:$0xf] }
 0x4af   : > { %2666 = vmatpush.bf16.msrb.mxu1 %v4996_v12 }
 0x4b1   : > { %2694 = vmatpush.bf16.msrb.mxu3 %v5000_v21  ;;  %v5840_v21 = vld [vmem:[#allocation7 + $0x874] sm:$0xf0] }
 0x4b2   : > { %2681 = vmatpush.bf16.msrb.mxu2 %v4928_v20  ;;  %v5837_v20 = vld [vmem:[#allocation7 + $0x864] sm:$0xf] }
 0x507   : > { %v2112_v30 = vpop.xlane.xlu1 %2111  ;;  %v2115_v31 = vpop.xlane.xlu2 %2114 }
 0x508   : > { %v2116_v35 = vrot.slane %v2112_v30, 4  ;;  %v2122_v37 = vrot.slane %v2115_v31, 4 }
 0x50a   : > { %v2117_v46 = vadd.f32 %v2116_v35, %v2112_v30  ;;  %v2123_v47 = vadd.f32 %v2122_v37, %v2115_v31  ;;  %v4924_v30 = vor.u32 %v5762_v52, %v4923_v14  ;;  %v5778_v31 = vld [vmem:[#allocation7 + $0x784] sm:$0xf0]  ;;  %v4989_v35 = vld [vmem:[#allocation7 + $0x788] sm:$0xf0]  ;;  %v5109_v52 = vld [vmem:[#allocation7 + $0x878] sm:$0xf0] }
 0x50b   : > { %v4988_v22 = vor.u32 %v5778_v31, %v4987_v25  ;;  %v4992_v40 = vor.u32 %v5777_v34, %v4989_v35  ;;  %v5108_v31 = vor.u32 %v5840_v21, %v5107_v17  ;;  %v5848_v21 = vld [vmem:[#allocation7 + $0x8b4] sm:$0xf0] }
 0x50c   : > { %v2118_v57 = vrot.slane %v2117_v46, 2  ;;  %v2124_v58 = vrot.slane %v2123_v47, 2  ;;  %2653 = vmatpush.bf16.msrb.mxu0 %v4924_v30 }
 0x50d   : > { %2667 = vmatpush.bf16.msrb.mxu1 %v4988_v22  ;;  %2695 = vmatpush.bf16.msrb.mxu3 %v4992_v40  ;;  %v5099_v22 = vld [vmem:[#allocation7 + $0x860] sm:$0xf]  ;;  %v5101_v40 = vld [vmem:[#allocation7 + $0x868] sm:$0xf0] }
 0x50e   : > { %v2119_v0 = vadd.f32 %v2118_v57, %v2117_v46  ;;  %v2125_v1 = vadd.f32 %v2124_v58, %v2123_v47 }
 0x510   : > { %v2120_v16 = vrot.slane %v2119_v0, 1  ;;  %v2126_v4 = vrot.slane %v2125_v1, 1 }
 0x512   : > { %v2121_v23 = vadd.f32 %v2120_v16, %v2119_v0  ;;  %v2127_v24 = vadd.f32 %v2126_v4, %v2125_v1  ;;  %v2171_v0 = vperm.slane %v2159_v56, 1  ;;  %v5835_v56 = vld [vmem:[#allocation7 + $0x854] sm:$0xf] }
 0x514   : > { %v2128_v43 = vmul.f32 0.00048828125, %v2121_v23  ;;  %v2129_v29 = vmul.f32 0.00048828125, %v2127_v24  ;;  %v5171_v23 = vld [vmem:[#allocation7 + $0x8f0] sm:$0xf]  ;;  %v5856_v24 = vld [vmem:[#allocation7 + $0x8f4] sm:$0xf0] }
 0x515   : > { %v5172_v32 = vor.u32 %v5856_v24, %v5171_v23  ;;  %v5831_v23 = vld [vmem:[#allocation7 + $0x834] sm:$0xf]  ;;  %v5077_v24 = vld [vmem:[#allocation7 + $0x838] sm:$0xf0] }
 0x516   : > { %v2130_v37 = vadd.f32 1e-05, %v2128_v43  ;;  %v2131_v51 = vadd.f32 1e-05, %v2129_v29  ;;  %v5855_v43 = vld [vmem:[#allocation7 + $0x8f4] sm:$0xf] }
 0x518   : > { %6037 = vrsqrt.f32 %v2130_v37  ;;  %vm2138_vm4 = vweird.f32 %v2130_v37  ;;  %vm2148_vm6 = vweird.f32 %v2131_v51 }
 0x519   : > { %6039 = vrsqrt.f32 %v2131_v51 }
 0x51e   : > { %v6038_v41 = vpop.eup %6037 }
 0x51f   : > { %v6040_v42 = vpop.eup %6039  ;;  %v2133_v46 = vmul.f32 %v6038_v41, %v2130_v37  ;;  %vm2139_vm2 = vweird.f32 %v6038_v41  ;;  %v5163_v37 = vld [vmem:[#allocation7 + $0x8e0] sm:$0xf] }
 0x520   : > { %v2143_v47 = vmul.f32 %v6040_v42, %v2131_v51  ;;  %vm2149_vm3 = vweird.f32 %v6040_v42  ;;  %vm2140_vm5 = vmor %vm2138_vm4, %vm2139_vm2  ;;  %v5854_v51 = vld [vmem:[#allocation7 + $0x8e4] sm:$0xf0] }
 0x521   : > { %v2134_v48 = vmul.f32 %v6038_v41, %v2133_v46  ;;  %vm2150_vm7 = vmor %vm2148_vm6, %vm2149_vm3  ;;  %v5100_v46 = vor.u32 %v5838_v33, %v5099_v22  ;;  %v5829_v22 = vld [vmem:[#allocation7 + $0x824] sm:$0xf]  ;;  %v5069_v33 = vld [vmem:[#allocation7 + $0x828] sm:$0xf0] }
 0x522   : > { %v2144_v49 = vmul.f32 %v6040_v42, %v2143_v47  ;;  %v5164_v47 = vor.u32 %v5854_v51, %v5163_v37 }
 0x523   : > { %v2135_v50 = vmul.f32 0.5, %v2134_v48  ;;  %v5091_v48 = vld [vmem:[#allocation7 + $0x850] sm:$0xf] }
 0x524   : > { %v2145_v53 = vmul.f32 0.5, %v2144_v49  ;;  %v5836_v49 = vld [vmem:[#allocation7 + $0x854] sm:$0xf0] }
 0x525   : > { %v2136_v55 = vsub.f32 1.5, %v2135_v50  ;;  %v5104_v50 = vor.u32 %v5837_v20, %v5101_v40  ;;  %v5059_v20 = vld [vmem:[#allocation7 + $0x810] sm:$0xf]  ;;  %v5828_v40 = vld [vmem:[#allocation7 + $0x814] sm:$0xf0] }
 0x526   : > { %v2146_v57 = vsub.f32 1.5, %v2145_v53 }
 0x527   : > { %v2137_v58 = vmul.f32 %v6038_v41, %v2136_v55  ;;  %v5852_v55 = vld [vmem:[#allocation7 + $0x8d4] sm:$0xf0] }
 0x528   : > { %v2147_v61 = vmul.f32 %v6040_v42, %v2146_v57  ;;  %v5093_v57 = vld [vmem:[#allocation7 + $0x858] sm:$0xf0] }
 0x529   : > { %v2141_v63 = vsel %vm2140_vm5, %v6038_v41, %v2137_v58  ;;  %v5853_v41 = vld [vmem:[#allocation7 + $0x8e4] sm:$0xf]  ;;  %v5851_v58 = vld [vmem:[#allocation7 + $0x8d4] sm:$0xf] }
 0x52a   : > { %v2152_v1 = vmul.f32 %v2141_v63, %v6500_v28  ;;  %v2153_v2 = vmul.f32 %v2141_v63, %v6503_v27  ;;  %v2151_v3 = vsel %vm2150_vm7, %v6040_v42, %v2147_v61  ;;  %v5839_v27 = vld [vmem:[#allocation7 + $0x874] sm:$0xf]  ;;  %v5165_v42 = vld [vmem:[#allocation7 + $0x8e8] sm:$0xf0]  ;;  %v5156_v61 = vor.u32 %v5852_v55, %v5155_v54  ;;  %v5834_v63 = vld [vmem:[#allocation7 + $0x844] sm:$0xf0] }
 0x52b   : > { %v2154_v6 = vmul.f32 %v2151_v3, %v6506_v19  ;;  %v2155_v5 = vmul.f32 %v2151_v3, %v6509_v26  ;;  %v5173_v26 = vld [vmem:[#allocation7 + $0x8f8] sm:$0xf0]  ;;  %v5112_v34 = vor.u32 %v5839_v27, %v5109_v52  ;;  %v5168_v53 = vor.u32 %v5853_v41, %v5165_v42  ;;  %v5850_v3 = vld [vmem:[#allocation7 + $0x8c4] sm:$0xf0] }
 0x52c   : > { %v2165_v7 = vmul.f32 %v2161_v59, %v2152_v1  ;;  %v2166_v9 = vmul.f32 %v2162_v60, %v2153_v2  ;;  %v5176_v35 = vor.u32 %v5855_v43, %v5173_v26  ;;  %v5147_v2 = vld [vmem:[#allocation7 + $0x8c0] sm:$0xf]  ;;  %v5080_v43 = vor.u32 %v5831_v23, %v5077_v24 }
 0x52d   : > { %v2167_v18 = vmul.f32 %v2161_v59, %v2154_v6  ;;  %v2168_v16 = vmul.f32 %v2162_v60, %v2155_v5  ;;  %v5157_v59 = vld [vmem:[#allocation7 + $0x8d8] sm:$0xf0]  ;;  %v5092_v60 = vor.u32 %v5836_v49, %v5091_v48  ;;  %v5833_v6 = vld [vmem:[#allocation7 + $0x844] sm:$0xf]  ;;  %v5085_v5 = vld [vmem:[#allocation7 + $0x848] sm:$0xf0]  ;;  %v5072_v41 = vor.u32 %v5829_v22, %v5069_v33 }
 0x52e   : > { %v2174_v4 = vadd.f32 %v2170_v62, %v2165_v7  ;;  %v2175_v12 = vadd.f32 %v2171_v0, %v2166_v9  ;;  %v5160_v1 = vor.u32 %v5851_v58, %v5157_v59  ;;  %v5849_v7 = vld [vmem:[#allocation7 + $0x8c4] sm:$0xf]  ;;  %v5149_v9 = vld [vmem:[#allocation7 + $0x8c8] sm:$0xf0]  ;;  %v5088_v17 = vor.u32 %v5833_v6, %v5085_v5  ;;  %v5827_v48 = vld [vmem:[#allocation7 + $0x814] sm:$0xf] }
 0x52f   : > { %v2176_v39 = vadd.f32 %v2170_v62, %v2167_v18  ;;  %v2177_v15 = vadd.f32 %v2171_v0, %v2168_v16  ;;  %v5083_v62 = vld [vmem:[#allocation7 + $0x840] sm:$0xf]  ;;  %v5096_v0 = vor.u32 %v5835_v56, %v5093_v57  ;;  %v5148_v16 = vor.u32 %v5850_v3, %v5147_v2  ;;  %v5061_v49 = vld [vmem:[#allocation7 + $0x818] sm:$0xf0]  ;;  %v5826_v57 = vld [vmem:[#allocation7 + $0x804] sm:$0xf0] }
 0x530   : > { %v2178_v28 = vmax.f32 %v2174_v4, 0.0  ;;  %v2179_v14 = vmax.f32 %v2175_v12, 0.0  ;;  %v5084_v18 = vor.u32 %v5834_v63, %v5083_v62  ;;  %v5075_v4 = vld [vmem:[#allocation7 + $0x830] sm:$0xf]  ;;  %v5832_v12 = vld [vmem:[#allocation7 + $0x834] sm:$0xf0]  ;;  %v5060_v54 = vor.u32 %v5828_v40, %v5059_v20 }
 0x531   : > { %v2180_v25 = vmax.f32 %v2176_v39, 0.0  ;;  %v2181_v19 = vmax.f32 %v2177_v15, 0.0  ;;  %v5152_v39 = vor.u32 %v5849_v7, %v5149_v9  ;;  %v5139_v15 = vld [vmem:[#allocation7 + $0x8b0] sm:$0xf]  ;;  %v5076_v27 = vor.u32 %v5832_v12, %v5075_v4  ;;  %v5051_v56 = vld [vmem:[#allocation7 + $0x800] sm:$0xf] }
 0x532   : > { %v5140_v52 = vor.u32 %v5848_v21, %v5139_v15  ;;  %v5064_v58 = vor.u32 %v5827_v48, %v5061_v49  ;;  %v5825_v62 = vld [vmem:[#allocation7 + $0x804] sm:$0xf]  ;;  %v5053_v63 = vld [vmem:[#allocation7 + $0x808] sm:$0xf0]  ;;  %v5052_v2 = vor.u32 %v5826_v57, %v5051_v56 }
 0x533   : > { %v6523_v29 = vpack.c.bf16 %v2180_v25, %v2178_v28  ;;  %v6525_v30 = vpack.c.bf16 %v2181_v19, %v2179_v14  ;;  %v5847_v28 = vld [vmem:[#allocation7 + $0x8b4] sm:$0xf]  ;;  %v5141_v14 = vld [vmem:[#allocation7 + $0x8b8] sm:$0xf0]  ;;  %v5067_v25 = vld [vmem:[#allocation7 + $0x820] sm:$0xf]  ;;  %v5056_v6 = vor.u32 %v5825_v62, %v5053_v63 }
 0x534   : > { %v5830_v19 = vld [vmem:[#allocation7 + $0x824] sm:$0xf0]  ;;  %v5144_v26 = vor.u32 %v5847_v28, %v5141_v14 }
 0x535   : > { %2418 = vmatmul.bf16.vlgmr.msra.gmra.mxu0 %v6523_v29  ;;  %2432 = vmatmul.bf16.vlgmr.msra.gmra.mxu1 %v6525_v30  ;;  %v5068_v37 = vor.u32 %v5830_v19, %v5067_v25 }
 0x536   : > { %2446 = vmatmul.bf16.vlgmr.msra.gmra.mxu2 %v6523_v29  ;;  %2460 = vmatmul.bf16.vlgmr.msra.gmra.mxu3 %v6525_v30 }
 0x537   : > { %2895 = vmatpush.bf16.msra.mxu0 %v5108_v31  ;;  %2909 = vmatpush.bf16.msra.mxu1 %v5172_v32  ;;  %v5131_v31 = vld [vmem:[#allocation7 + $0x8a0] sm:$0xf]  ;;  %v5846_v32 = vld [vmem:[#allocation7 + $0x8a4] sm:$0xf0] }
 0x538   : > { %2923 = vmatpush.bf16.msra.mxu2 %v5112_v34  ;;  %2937 = vmatpush.bf16.msra.mxu3 %v5176_v35  ;;  %v5845_v34 = vld [vmem:[#allocation7 + $0x8a4] sm:$0xf]  ;;  %v5133_v35 = vld [vmem:[#allocation7 + $0x8a8] sm:$0xf0]  ;;  %v5132_v51 = vor.u32 %v5846_v32, %v5131_v31 }
 0x539   : > { %v5136_v42 = vor.u32 %v5845_v34, %v5133_v35 }
 0x53b   : > { %2896 = vmatpush.bf16.msra.mxu0 %v5100_v46  ;;  %2910 = vmatpush.bf16.msra.mxu1 %v5164_v47  ;;  %v5123_v46 = vld [vmem:[#allocation7 + $0x890] sm:$0xf]  ;;  %v5844_v47 = vld [vmem:[#allocation7 + $0x894] sm:$0xf0] }
 0x53c   : > { %2924 = vmatpush.bf16.msra.mxu2 %v5104_v50  ;;  %2938 = vmatpush.bf16.msra.mxu3 %v5168_v53  ;;  %v5843_v50 = vld [vmem:[#allocation7 + $0x894] sm:$0xf]  ;;  %v5125_v53 = vld [vmem:[#allocation7 + $0x898] sm:$0xf0]  ;;  %v5124_v55 = vor.u32 %v5844_v47, %v5123_v46 }
 0x53d   : > { %v5128_v59 = vor.u32 %v5843_v50, %v5125_v53 }
 0x53f   : > { %2897 = vmatpush.bf16.msra.mxu0 %v5092_v60  ;;  %2911 = vmatpush.bf16.msra.mxu1 %v5156_v61  ;;  %v5115_v60 = vld [vmem:[#allocation7 + $0x880] sm:$0xf]  ;;  %v5842_v61 = vld [vmem:[#allocation7 + $0x884] sm:$0xf0] }
 0x540   : > { %2925 = vmatpush.bf16.msra.mxu2 %v5096_v0  ;;  %2939 = vmatpush.bf16.msra.mxu3 %v5160_v1  ;;  %v5841_v0 = vld [vmem:[#allocation7 + $0x884] sm:$0xf]  ;;  %v5117_v1 = vld [vmem:[#allocation7 + $0x888] sm:$0xf0]  ;;  %v5116_v3 = vor.u32 %v5842_v61, %v5115_v60 }
 0x541   : > { %v5120_v5 = vor.u32 %v5841_v0, %v5117_v1 }
 0x543   : > { %2898 = vmatpush.bf16.msra.mxu0 %v5084_v18  ;;  %2912 = vmatpush.bf16.msra.mxu1 %v5148_v16 }
 0x544   : > { %2926 = vmatpush.bf16.msra.mxu2 %v5088_v17  ;;  %2940 = vmatpush.bf16.msra.mxu3 %v5152_v39 }
 0x545   : > { %2654 = vmatmul.bf16.vlgmr.msrb.gmra.mxu0 %v6523_v29  ;;  %2668 = vmatmul.bf16.vlgmr.msrb.gmra.mxu1 %v6525_v30 }
 0x546   : > { %2682 = vmatmul.bf16.vlgmr.msrb.gmra.mxu2 %v6523_v29  ;;  %2696 = vmatmul.bf16.vlgmr.msrb.gmra.mxu3 %v6525_v30 }
 0x547   : > { %2899 = vmatpush.bf16.msra.mxu0 %v5076_v27  ;;  %2913 = vmatpush.bf16.msra.mxu1 %v5140_v52 }
 0x548   : > { %2927 = vmatpush.bf16.msra.mxu2 %v5080_v43  ;;  %2941 = vmatpush.bf16.msra.mxu3 %v5144_v26 }
 0x54b   : > { %2900 = vmatpush.bf16.msra.mxu0 %v5068_v37  ;;  %2914 = vmatpush.bf16.msra.mxu1 %v5132_v51 }
 0x54c   : > { %2928 = vmatpush.bf16.msra.mxu2 %v5072_v41  ;;  %2942 = vmatpush.bf16.msra.mxu3 %v5136_v42 }
 0x54f   : > { %2901 = vmatpush.bf16.msra.mxu0 %v5060_v54  ;;  %2915 = vmatpush.bf16.msra.mxu1 %v5124_v55 }
 0x550   : > { %2929 = vmatpush.bf16.msra.mxu2 %v5064_v58  ;;  %2943 = vmatpush.bf16.msra.mxu3 %v5128_v59 }
 0x553   : > { %2902 = vmatpush.bf16.msra.mxu0 %v5052_v2  ;;  %2916 = vmatpush.bf16.msra.mxu1 %v5116_v3  ;;  %v2976_v3 = vld [vmem:[#allocation5 + $0x10] ss:$8 sm:$0x3] }
 0x554   : > { %2930 = vmatpush.bf16.msra.mxu2 %v5056_v6  ;;  %2944 = vmatpush.bf16.msra.mxu3 %v5120_v5 }
 0x556   : > { %2903 = vmatmul.bf16.vlgmr.msra.gmra.mxu0 %v6523_v29  ;;  %2917 = vmatmul.bf16.vlgmr.msra.gmra.mxu1 %v6525_v30 }
 0x557   : > { %2931 = vmatmul.bf16.vlgmr.msra.gmra.mxu2 %v6523_v29  ;;  %2945 = vmatmul.bf16.vlgmr.msra.gmra.mxu3 %v6525_v30 }
 0x5b2   : > { %v2419_v7 = vpop.f32.mrf.mxu0  ;;  %v2433_v9 = vpop.f32.mrf.mxu1 }
 0x5b3   : > { %v2434_v19 = vadd.f32 %v2433_v9, %v2419_v7 }
 0x5b5   : > { %v2466_v31 = vmul.f32 %v6404_v44, %v2434_v19 }
 0x5b7   : > { %v2474_v41 = vrot.slane %v2466_v31, 7  ;;  %v5904_v31 = vld [vmem:[#allocation7 + $0x974] sm:$0xf0] }
 0x5b9   : > { %v2447_v18 = vpop.f32.mrf.mxu2  ;;  %v2461_v16 = vpop.f32.mrf.mxu3  ;;  %v2484_v53 = vsel %vm660_vm10, 0.0, %v2474_v41 }
 0x5ba   : > { %v2421_v4 = vpop.f32.mrf.mxu0  ;;  %v2435_v12 = vpop.f32.mrf.mxu1  ;;  %v2462_v43 = vadd.f32 %v2461_v16, %v2447_v18 }
 0x5bb   : > { %v2436_v30 = vadd.f32 %v2435_v12, %v2421_v4  ;;  %v2978_v12 = vperm.slane %v2976_v3, 0 }
 0x5bc   : > { %v2467_v22 = vmul.f32 %v6404_v44, %v2462_v43 }
 0x5bd   : > { %v2468_v32 = vmul.f32 %v6412_v45, %v2436_v30 }
 0x5be   : > { %v2475_v46 = vrot.slane %v2467_v22, 7 }
 0x5bf   : > { %v2476_v42 = vrot.slane %v2468_v32, 7  ;;  %v5299_v32 = vld [vmem:[#allocation7 + $0x9f0] sm:$0xf] }
 0x5c0   : > { %v2485_v57 = vsel %vm660_vm10, 0.0, %v2475_v46 }
 0x5c1   : > { %v2449_v17 = vpop.f32.mrf.mxu2  ;;  %v2463_v39 = vpop.f32.mrf.mxu3  ;;  %v2477_v54 = vsel %vm660_vm10, %v2474_v41, %v2476_v42  ;;  %v5227_v41 = vld [vmem:[#allocation7 + $0x960] sm:$0xf] }
 0x5c2   : > { %v2655_v15 = vpop.f32.mrf.mxu0  ;;  %v2669_v21 = vpop.f32.mrf.mxu1  ;;  %v2464_v26 = vadd.f32 %v2463_v39, %v2449_v17  ;;  %v2979_v17 = vperm.slane %v2976_v3, 1  ;;  %v5285_v3 = vld [vmem:[#allocation7 + $0x9d8] sm:$0xf0] }
 0x5c3   : > { %v2656_v56 = vadd.f32 %v2655_v15, %v2484_v53  ;;  %v5901_v53 = vld [vmem:[#allocation7 + $0x964] sm:$0xf] }
 0x5c4   : > { %v2469_v35 = vmul.f32 %v6412_v45, %v2464_v26  ;;  %v5235_v26 = vld [vmem:[#allocation7 + $0x970] sm:$0xf] }
 0x5c5   : > { %v2670_v9 = vadd.f32 %v2669_v21, %v2656_v56  ;;  %v5236_v22 = vor.u32 %v5904_v31, %v5235_v26 }
 0x5c6   : > { %v2478_v48 = vrot.slane %v2469_v35, 7  ;;  %v5237_v35 = vld [vmem:[#allocation7 + $0x978] sm:$0xf0] }
 0x5c7   : > { %3314 = vmatpush.bf16.msrb.mxu0 %v5236_v22 }
 0x5c8   : > { %v2479_v61 = vsel %vm660_vm10, %v2475_v46, %v2478_v48  ;;  %v5902_v46 = vld [vmem:[#allocation7 + $0x964] sm:$0xf0] }
 0x5c9   : > { %v2683_v23 = vpop.f32.mrf.mxu2  ;;  %v2697_v24 = vpop.f32.mrf.mxu3  ;;  %v5918_v48 = vld [vmem:[#allocation7 + $0x9e4] sm:$0xf0] }
 0x5ca   : > { %v2657_v28 = vpop.f32.mrf.mxu0  ;;  %v2671_v14 = vpop.f32.mrf.mxu1  ;;  %v2684_v1 = vadd.f32 %v2683_v23, %v2485_v57  ;;  %v5293_v57 = vld [vmem:[#allocation7 + $0x9e8] sm:$0xf0] }
 0x5cb   : > { %v2658_v58 = vadd.f32 %v2657_v28, %v2477_v54  ;;  %v5229_v54 = vld [vmem:[#allocation7 + $0x968] sm:$0xf0] }
 0x5cc   : > { %v2698_v39 = vadd.f32 %v2697_v24, %v2684_v1  ;;  %v5232_v56 = vor.u32 %v5901_v53, %v5229_v54  ;;  %v5221_v1 = vld [vmem:[#allocation7 + $0x958] sm:$0xf0] }
 0x5cd   : > { %v2672_v18 = vadd.f32 %v2671_v14, %v2658_v58  ;;  %v5219_v58 = vld [vmem:[#allocation7 + $0x950] sm:$0xf] }
 0x5d1   : > { %v2685_v27 = vpop.f32.mrf.mxu2  ;;  %v2699_v52 = vpop.f32.mrf.mxu3 }
 0x5d2   : > { %v2686_v2 = vadd.f32 %v2685_v27, %v2479_v61  ;;  %v5283_v61 = vld [vmem:[#allocation7 + $0x9d0] sm:$0xf] }
 0x5d3   : > { %v2904_v25 = vpop.f32.mrf.mxu0  ;;  %v2918_v29 = vpop.f32.mrf.mxu1 }
 0x5d4   : > { %v2919_v37 = vadd.f32 %v2918_v29, %v2904_v25  ;;  %v2700_v15 = vadd.f32 %v2699_v52, %v2686_v2  ;;  %v5915_v2 = vld [vmem:[#allocation7 + $0x9d4] sm:$0xf] }
 0x5d6   : > { %v2951_v49 = vmul.f32 %v6410_v38, %v2919_v37 }
 0x5d8   : > { %v2959_v62 = vrot.slane %v2951_v49, 1  ;;  %v5228_v49 = vor.u32 %v5902_v46, %v5227_v41 }
 0x5da   : > { %v2932_v33 = vpop.f32.mrf.mxu2  ;;  %v2946_v34 = vpop.f32.mrf.mxu3  ;;  %3315 = vmatpush.bf16.msrb.mxu0 %v5228_v49 }
 0x5db   : > { %v2906_v51 = vpop.f32.mrf.mxu0  ;;  %v2920_v20 = vpop.f32.mrf.mxu1  ;;  %v2947_v50 = vadd.f32 %v2946_v34, %v2932_v33  ;;  %v5920_v33 = vld [vmem:[#allocation7 + $0x9f4] sm:$0xf0]  ;;  %v5903_v34 = vld [vmem:[#allocation7 + $0x974] sm:$0xf] }
 0x5dc   : > { %v2921_v40 = vadd.f32 %v2920_v20, %v2906_v51  ;;  %v5300_v37 = vor.u32 %v5920_v33, %v5299_v32  ;;  %v5240_v51 = vor.u32 %v5903_v34, %v5237_v35  ;;  %v5919_v20 = vld [vmem:[#allocation7 + $0x9f4] sm:$0xf] }
 0x5dd   : > { %v2952_v63 = vmul.f32 %v6410_v38, %v2947_v50 }
 0x5de   : > { %v2953_v47 = vmul.f32 %v6408_v36, %v2921_v40  ;;  %v5301_v40 = vld [vmem:[#allocation7 + $0x9f8] sm:$0xf0]  ;;  %3328 = vmatpush.bf16.msrb.mxu1 %v5300_v37  ;;  %3342 = vmatpush.bf16.msrb.mxu2 %v5240_v51 }
 0x5df   : > { %v2962_v16 = vrot.slane %v2952_v63, 1  ;;  %v5304_v42 = vor.u32 %v5919_v20, %v5301_v40  ;;  %v5899_v63 = vld [vmem:[#allocation7 + $0x954] sm:$0xf] }
 0x5e0   : > { %v2960_v55 = vrot.slane %v2953_v47, 1  ;;  %v5291_v47 = vld [vmem:[#allocation7 + $0x9e0] sm:$0xf] }
 0x5e1   : > { %v5292_v50 = vor.u32 %v5918_v48, %v5291_v47  ;;  %3356 = vmatpush.bf16.msrb.mxu3 %v5304_v42 }
 0x5e2   : > { %v2934_v59 = vpop.f32.mrf.mxu2  ;;  %v2948_v60 = vpop.f32.mrf.mxu3  ;;  %v2969_v6 = vsel %vm1146_vm11, %v2960_v55, 0.0  ;;  %v2961_v7 = vsel %vm1146_vm11, %v2959_v62, %v2960_v55  ;;  %v5917_v55 = vld [vmem:[#allocation7 + $0x9e4] sm:$0xf]  ;;  %v5916_v62 = vld [vmem:[#allocation7 + $0x9d4] sm:$0xf0]  ;;  %3343 = vmatpush.bf16.msrb.mxu2 %v5232_v56 }
 0x5e3   : > { %v2949_v0 = vadd.f32 %v2948_v60, %v2934_v59  ;;  %v2971_v28 = vadd.f32 %v2961_v7, %v2670_v9  ;;  %v2973_v25 = vadd.f32 %v2969_v6, %v2672_v18  ;;  %v5900_v59 = vld [vmem:[#allocation7 + $0x954] sm:$0xf0]  ;;  %v5296_v60 = vor.u32 %v5917_v55, %v5293_v57  ;;  %3329 = vmatpush.bf16.msrb.mxu1 %v5292_v50  ;;  %v5211_v7 = vld [vmem:[#allocation7 + $0x940] sm:$0xf]  ;;  %v5898_v9 = vld [vmem:[#allocation7 + $0x944] sm:$0xf0] }
 0x5e4   : > { %v5284_v6 = vor.u32 %v5916_v62, %v5283_v61  ;;  %v5275_v18 = vld [vmem:[#allocation7 + $0x9c0] sm:$0xf]  ;;  %v5896_v55 = vld [vmem:[#allocation7 + $0x934] sm:$0xf0]  ;;  %v5911_v62 = vld [vmem:[#allocation7 + $0x9b4] sm:$0xf] }
 0x5e5   : > { %v2954_v5 = vmul.f32 %v6408_v36, %v2949_v0  ;;  %v6555_v30 = vadd.f32 %v2978_v12, %v2971_v28  ;;  %v6559_v21 = vadd.f32 %v2978_v12, %v2973_v25  ;;  %v5220_v0 = vor.u32 %v5900_v59, %v5219_v58  ;;  %3357 = vmatpush.bf16.msrb.mxu3 %v5296_v60  ;;  %v5897_v12 = vld [vmem:[#allocation7 + $0x944] sm:$0xf]  ;;  %v5912_v57 = vld [vmem:[#allocation7 + $0x9b4] sm:$0xf0]  ;;  %v5895_v58 = vld [vmem:[#allocation7 + $0x934] sm:$0xf] }
 0x5e6   : > { %v5205_v59 = vld [vmem:[#allocation7 + $0x938] sm:$0xf0] }
 0x5e7   : > { %v2963_v4 = vrot.slane %v2954_v5, 1  ;;  %v5224_v5 = vor.u32 %v5899_v63, %v5221_v1  ;;  %3316 = vmatpush.bf16.msrb.mxu0 %v5220_v0  ;;  %3330 = vmatpush.bf16.msrb.mxu1 %v5284_v6  ;;  %v5208_v61 = vor.u32 %v5895_v58, %v5205_v59  ;;  %v5269_v63 = vld [vmem:[#allocation7 + $0x9b8] sm:$0xf0]  ;;  %v5195_v1 = vld [vmem:[#allocation7 + $0x920] sm:$0xf] }
 0x5e8   : > { %v5272_v0 = vor.u32 %v5911_v62, %v5269_v63  ;;  %v5429_v59 = vld [vmem:[#allocation7 + $0xaf8] sm:$0xf0] }
 0x5e9   : > { %v2970_v23 = vsel %vm1146_vm11, %v2963_v4, 0.0  ;;  %v2964_v27 = vsel %vm1146_vm11, %v2962_v16, %v2963_v4  ;;  %v5288_v16 = vor.u32 %v5915_v2, %v5285_v3  ;;  %v5914_v4 = vld [vmem:[#allocation7 + $0x9c4] sm:$0xf0]  ;;  %3344 = vmatpush.bf16.msrb.mxu2 %v5224_v5  ;;  %v5259_v3 = vld [vmem:[#allocation7 + $0x9a0] sm:$0xf] }
 0x5ea   : > { %v2972_v29 = vadd.f32 %v2964_v27, %v2698_v39  ;;  %v2974_v19 = vadd.f32 %v2970_v23, %v2700_v15  ;;  %v5913_v39 = vld [vmem:[#allocation7 + $0x9c4] sm:$0xf]  ;;  %v5277_v15 = vld [vmem:[#allocation7 + $0x9c8] sm:$0xf0]  ;;  %v5212_v23 = vor.u32 %v5898_v9, %v5211_v7  ;;  %v5894_v2 = vld [vmem:[#allocation7 + $0x924] sm:$0xf0] }
 0x5eb   : > { %3358 = vmatpush.bf16.msrb.mxu3 %v5288_v16  ;;  %v5196_v6 = vor.u32 %v5894_v2, %v5195_v1  ;;  %v5910_v5 = vld [vmem:[#allocation7 + $0x9a4] sm:$0xf0]  ;;  %v5893_v7 = vld [vmem:[#allocation7 + $0x924] sm:$0xf]  ;;  %v5197_v9 = vld [vmem:[#allocation7 + $0x928] sm:$0xf0] }
 0x5ec   : > { %v6557_v43 = vadd.f32 %v2979_v17, %v2972_v29  ;;  %v6561_v14 = vadd.f32 %v2979_v17, %v2974_v19  ;;  %v5213_v17 = vld [vmem:[#allocation7 + $0x948] sm:$0xf0]  ;;  %v5276_v19 = vor.u32 %v5914_v4, %v5275_v18  ;;  %3317 = vmatpush.bf16.msrb.mxu0 %v5212_v23  ;;  %v5260_v18 = vor.u32 %v5910_v5, %v5259_v3  ;;  %v5909_v4 = vld [vmem:[#allocation7 + $0x9a4] sm:$0xf]  ;;  %v5908_v23 = vld [vmem:[#allocation7 + $0x994] sm:$0xf0] }
 0x5ed   : > { %v5200_v16 = vor.u32 %v5893_v7, %v5197_v9  ;;  %v5886_v1 = vld [vmem:[#allocation7 + $0xae4] sm:$0xf0]  ;;  %v5869_v2 = vld [vmem:[#allocation7 + $0xa64] sm:$0xf]  ;;  %v5421_v7 = vld [vmem:[#allocation7 + $0xae8] sm:$0xf0] }
 0x5ee   : > { %v2986_v24 = vadd.f32 %v6557_v43, %v6555_v30  ;;  %v2989_v52 = vadd.f32 %v6561_v14, %v6559_v21  ;;  %3331 = vmatpush.bf16.msrb.mxu1 %v5276_v19  ;;  %v5885_v5 = vld [vmem:[#allocation7 + $0xae4] sm:$0xf] }
 0x5f0   : > { %2987 = vadd.xlane.f32.xlu0 %v2986_v24  ;;  %2990 = vadd.xlane.f32.xlu1 %v2989_v52  ;;  %v5216_v24 = vor.u32 %v5897_v12, %v5213_v17  ;;  %v5280_v52 = vor.u32 %v5913_v39, %v5277_v15  ;;  %v5261_v12 = vld [vmem:[#allocation7 + $0x9a8] sm:$0xf0]  ;;  %v5187_v39 = vld [vmem:[#allocation7 + $0x910] sm:$0xf]  ;;  %v5892_v15 = vld [vmem:[#allocation7 + $0x914] sm:$0xf0] }
 0x5f1   : > { %v5264_v17 = vor.u32 %v5909_v4, %v5261_v12  ;;  %v5868_v4 = vld [vmem:[#allocation7 + $0xa54] sm:$0xf0]  ;;  %v5411_v12 = vld [vmem:[#allocation7 + $0xad0] sm:$0xf] }
 0x5f2   : > { %3345 = vmatpush.bf16.msrb.mxu2 %v5216_v24  ;;  %3359 = vmatpush.bf16.msrb.mxu3 %v5280_v52  ;;  %v5907_v52 = vld [vmem:[#allocation7 + $0x994] sm:$0xf] }
 0x5f6   : > { %3346 = vmatpush.bf16.msrb.mxu2 %v5208_v61  ;;  %3360 = vmatpush.bf16.msrb.mxu3 %v5272_v0  ;;  %v5870_v61 = vld [vmem:[#allocation7 + $0xa64] sm:$0xf0]  ;;  %v5419_v0 = vld [vmem:[#allocation7 + $0xae0] sm:$0xf] }
 0x5f7   : > { %v5420_v3 = vor.u32 %v5886_v1, %v5419_v0  ;;  %v5862_v0 = vld [vmem:[#allocation7 + $0xa24] sm:$0xf0]  ;;  %v5387_v1 = vld [vmem:[#allocation7 + $0xaa0] sm:$0xf] }
 0x5fa   : > { %3347 = vmatpush.bf16.msrb.mxu2 %v5200_v16  ;;  %3361 = vmatpush.bf16.msrb.mxu3 %v5264_v17  ;;  %v5347_v16 = vld [vmem:[#allocation7 + $0xa50] sm:$0xf] }
 0x5fb   : > { %v5348_v17 = vor.u32 %v5868_v4, %v5347_v16  ;;  %v5877_v4 = vld [vmem:[#allocation7 + $0xaa4] sm:$0xf] }
 0x663   : > { %v2988_v28 = vpop.xlane.xlu0 %2987  ;;  %v2991_v25 = vpop.xlane.xlu1 %2990 }
 0x664   : > { %v2992_v27 = vrot.slane %v2988_v28, 4  ;;  %v2998_v29 = vrot.slane %v2991_v25, 4 }
 0x666   : > { %v2993_v26 = vadd.f32 %v2992_v27, %v2988_v28  ;;  %v2999_v31 = vadd.f32 %v2998_v29, %v2991_v25  ;;  %v5251_v28 = vld [vmem:[#allocation7 + $0x990] sm:$0xf]  ;;  %v5188_v25 = vor.u32 %v5892_v15, %v5187_v39  ;;  %v5891_v27 = vld [vmem:[#allocation7 + $0x914] sm:$0xf]  ;;  %v5189_v29 = vld [vmem:[#allocation7 + $0x918] sm:$0xf0] }
 0x667   : > { %v5252_v19 = vor.u32 %v5908_v23, %v5251_v28  ;;  %v5192_v24 = vor.u32 %v5891_v27, %v5189_v29  ;;  %v5884_v39 = vld [vmem:[#allocation7 + $0xad4] sm:$0xf0]  ;;  %v5867_v15 = vld [vmem:[#allocation7 + $0xa54] sm:$0xf]  ;;  %v5349_v28 = vld [vmem:[#allocation7 + $0xa58] sm:$0xf0] }
 0x668   : > { %v2994_v32 = vrot.slane %v2993_v26, 2  ;;  %v3000_v22 = vrot.slane %v2999_v31, 2  ;;  %v5352_v23 = vor.u32 %v5867_v15, %v5349_v28  ;;  %v5883_v27 = vld [vmem:[#allocation7 + $0xad4] sm:$0xf]  ;;  %v5413_v29 = vld [vmem:[#allocation7 + $0xad8] sm:$0xf0] }
 0x669   : > { %3348 = vmatpush.bf16.msrb.mxu2 %v5192_v24  ;;  %v5339_v24 = vld [vmem:[#allocation7 + $0xa40] sm:$0xf]  ;;  %v5315_v28 = vld [vmem:[#allocation7 + $0xa10] sm:$0xf] }
 0x66a   : > { %v2995_v33 = vadd.f32 %v2994_v32, %v2993_v26  ;;  %v3001_v34 = vadd.f32 %v3000_v22, %v2999_v31  ;;  %v5253_v26 = vld [vmem:[#allocation7 + $0x998] sm:$0xf0]  ;;  %v5179_v32 = vld [vmem:[#allocation7 + $0x900] sm:$0xf]  ;;  %v5890_v22 = vld [vmem:[#allocation7 + $0x904] sm:$0xf0] }
 0x66b   : > { %v5256_v31 = vor.u32 %v5907_v52, %v5253_v26  ;;  %v5866_v52 = vld [vmem:[#allocation7 + $0xa44] sm:$0xf0]  ;;  %v5403_v26 = vld [vmem:[#allocation7 + $0xac0] sm:$0xf] }
 0x66c   : > { %v2996_v35 = vrot.slane %v2995_v33, 1  ;;  %v3002_v37 = vrot.slane %v3001_v34, 1 }
 0x66d   : > { %3362 = vmatpush.bf16.msrb.mxu3 %v5256_v31  ;;  %v5340_v31 = vor.u32 %v5866_v52, %v5339_v24  ;;  %v5317_v24 = vld [vmem:[#allocation7 + $0xa18] sm:$0xf0] }
 0x66e   : > { %v2997_v51 = vadd.f32 %v2996_v35, %v2995_v33  ;;  %v3003_v20 = vadd.f32 %v3002_v37, %v3001_v34  ;;  %v5243_v33 = vld [vmem:[#allocation7 + $0x980] sm:$0xf]  ;;  %v5180_v34 = vor.u32 %v5890_v22, %v5179_v32  ;;  %v5906_v35 = vld [vmem:[#allocation7 + $0x984] sm:$0xf0]  ;;  %v5889_v37 = vld [vmem:[#allocation7 + $0x904] sm:$0xf] }
 0x66f   : > { %v5882_v32 = vld [vmem:[#allocation7 + $0xac4] sm:$0xf0]  ;;  %v5865_v22 = vld [vmem:[#allocation7 + $0xa44] sm:$0xf] }
 0x670   : > { %v3004_v40 = vmul.f32 0.00048828125, %v2997_v51  ;;  %v3005_v41 = vmul.f32 0.00048828125, %v3003_v20  ;;  %v5181_v51 = vld [vmem:[#allocation7 + $0x908] sm:$0xf0]  ;;  %v5244_v20 = vor.u32 %v5906_v35, %v5243_v33 }
 0x671   : > { %v5341_v33 = vld [vmem:[#allocation7 + $0xa48] sm:$0xf0] }
 0x672   : > { %v6568_v42 = vsub.f32 %v6555_v30, %v3004_v40  ;;  %v6571_v46 = vsub.f32 %v6557_v43, %v3004_v40  ;;  %v6574_v47 = vsub.f32 %v6559_v21, %v3005_v41  ;;  %v6577_v48 = vsub.f32 %v6561_v14, %v3005_v41  ;;  %v5203_v21 = vld [vmem:[#allocation7 + $0x930] sm:$0xf]  ;;  %v5905_v41 = vld [vmem:[#allocation7 + $0x984] sm:$0xf] }
 0x673   : > { %v5267_v14 = vld [vmem:[#allocation7 + $0x9b0] sm:$0xf]  ;;  %v5204_v56 = vor.u32 %v5896_v55, %v5203_v21  ;;  %v5184_v40 = vor.u32 %v5889_v37, %v5181_v51  ;;  %v5344_v35 = vor.u32 %v5865_v22, %v5341_v33  ;;  %v5881_v37 = vld [vmem:[#allocation7 + $0xac4] sm:$0xf]  ;;  %v5405_v51 = vld [vmem:[#allocation7 + $0xac8] sm:$0xf0] }
 0x674   : > { %v3010_v49 = vmul.f32 %v6568_v42, %v6568_v42  ;;  %v3011_v50 = vmul.f32 %v6571_v46, %v6571_v46  ;;  %v3012_v53 = vmul.f32 %v6574_v47, %v6574_v47  ;;  %v3013_v30 = vmul.f32 %v6577_v48, %v6577_v48  ;;  %v5875_v22 = vld [vmem:[#allocation7 + $0xa94] sm:$0xf]  ;;  %v5381_v33 = vld [vmem:[#allocation7 + $0xa98] sm:$0xf0] }
 0x675   : > { %v5268_v60 = vor.u32 %v5912_v57, %v5267_v14  ;;  %3318 = vmatpush.bf16.msrb.mxu0 %v5204_v56  ;;  %3349 = vmatpush.bf16.msrb.mxu2 %v5184_v40  ;;  %v5871_v14 = vld [vmem:[#allocation7 + $0xa74] sm:$0xf]  ;;  %v5365_v56 = vld [vmem:[#allocation7 + $0xa78] sm:$0xf0]  ;;  %v5331_v40 = vld [vmem:[#allocation7 + $0xa30] sm:$0xf] }
 0x676   : > { %v3014_v43 = vadd.f32 %v3011_v50, %v3010_v49  ;;  %v3017_v54 = vadd.f32 %v3013_v30, %v3012_v53  ;;  %v5245_v49 = vld [vmem:[#allocation7 + $0x988] sm:$0xf0]  ;;  %v5363_v50 = vld [vmem:[#allocation7 + $0xa70] sm:$0xf]  ;;  %v5872_v30 = vld [vmem:[#allocation7 + $0xa74] sm:$0xf0]  ;;  %v5368_v58 = vor.u32 %v5871_v14, %v5365_v56 }
 0x677   : > { %3332 = vmatpush.bf16.msrb.mxu1 %v5268_v60  ;;  %v5248_v53 = vor.u32 %v5905_v41, %v5245_v49  ;;  %v5364_v21 = vor.u32 %v5872_v30, %v5363_v50  ;;  %v5887_v57 = vld [vmem:[#allocation7 + $0xaf4] sm:$0xf]  ;;  %v5355_v60 = vld [vmem:[#allocation7 + $0xa60] sm:$0xf]  ;;  %v5864_v41 = vld [vmem:[#allocation7 + $0xa34] sm:$0xf0] }
 0x678   : > { %3015 = vadd.xlane.f32.xlu2 %v3014_v43  ;;  %3018 = vadd.xlane.f32.xlu0 %v3017_v54  ;;  %v5427_v43 = vld [vmem:[#allocation7 + $0xaf0] sm:$0xf]  ;;  %v5888_v54 = vld [vmem:[#allocation7 + $0xaf4] sm:$0xf0]  ;;  %v5432_v62 = vor.u32 %v5887_v57, %v5429_v59  ;;  %v5356_v63 = vor.u32 %v5870_v61, %v5355_v60  ;;  %v5332_v30 = vor.u32 %v5864_v41, %v5331_v40  ;;  %v5397_v59 = vld [vmem:[#allocation7 + $0xab8] sm:$0xf0] }
 0x679   : > { %3319 = vmatpush.bf16.msrb.mxu0 %v5196_v6  ;;  %v5428_v55 = vor.u32 %v5888_v54, %v5427_v43  ;;  %3363 = vmatpush.bf16.msrb.mxu3 %v5248_v53  ;;  %v5357_v6 = vld [vmem:[#allocation7 + $0xa68] sm:$0xf0]  ;;  %v5395_v49 = vld [vmem:[#allocation7 + $0xab0] sm:$0xf]  ;;  %v5880_v43 = vld [vmem:[#allocation7 + $0xab4] sm:$0xf0] }
 0x67a   : > { %3578 = vmatpush.bf16.msra.mxu2 %v5368_v58  ;;  %v5360_v9 = vor.u32 %v5869_v2, %v5357_v6  ;;  %v5863_v54 = vld [vmem:[#allocation7 + $0xa34] sm:$0xf]  ;;  %v5396_v56 = vor.u32 %v5880_v43, %v5395_v49  ;;  %v5861_v6 = vld [vmem:[#allocation7 + $0xa24] sm:$0xf]  ;;  %v5371_v40 = vld [vmem:[#allocation7 + $0xa80] sm:$0xf] }
 0x67b   : > { %3333 = vmatpush.bf16.msrb.mxu1 %v5260_v18  ;;  %v5424_v18 = vor.u32 %v5885_v5, %v5421_v7  ;;  %v5879_v58 = vld [vmem:[#allocation7 + $0xab4] sm:$0xf]  ;;  %v5325_v5 = vld [vmem:[#allocation7 + $0xa28] sm:$0xf0] }
 0x67c   : > { %v5400_v60 = vor.u32 %v5879_v58, %v5397_v59  ;;  %v5328_v16 = vor.u32 %v5861_v6, %v5325_v5  ;;  %v3063_v5 = vld [vmem:[#allocation5 + $0x12] ss:$8 sm:$0x3] }
 0x67d   : > { %3320 = vmatpush.bf16.msrb.mxu0 %v5188_v25  ;;  %3592 = vmatpush.bf16.msra.mxu3 %v5432_v62  ;;  %v5412_v25 = vor.u32 %v5884_v39, %v5411_v12  ;;  %v5389_v12 = vld [vmem:[#allocation7 + $0xaa8] sm:$0xf0] }
 0x67e   : > { %3579 = vmatpush.bf16.msra.mxu2 %v5360_v9 }
 0x67f   : > { %3334 = vmatpush.bf16.msrb.mxu1 %v5252_v19  ;;  %v5416_v19 = vor.u32 %v5883_v27, %v5413_v29  ;;  %v5876_v29 = vld [vmem:[#allocation7 + $0xa94] sm:$0xf0] }
 0x681   : > { %3321 = vmatpush.bf16.msrb.mxu0 %v5180_v34  ;;  %3593 = vmatpush.bf16.msra.mxu3 %v5424_v18  ;;  %v5404_v34 = vor.u32 %v5882_v32, %v5403_v26 }
 0x682   : > { %3580 = vmatpush.bf16.msra.mxu2 %v5352_v23  ;;  %v5379_v23 = vld [vmem:[#allocation7 + $0xa90] sm:$0xf] }
 0x683   : > { %3335 = vmatpush.bf16.msrb.mxu1 %v5244_v20  ;;  %v5408_v20 = vor.u32 %v5881_v37, %v5405_v51  ;;  %v5307_v51 = vld [vmem:[#allocation7 + $0xa00] sm:$0xf] }
 0x685   : > { %3550 = vmatpush.bf16.msra.mxu0 %v5364_v21  ;;  %3594 = vmatpush.bf16.msra.mxu3 %v5416_v19  ;;  %v5333_v21 = vld [vmem:[#allocation7 + $0xa38] sm:$0xf0]  ;;  %v5859_v19 = vld [vmem:[#allocation7 + $0xa14] sm:$0xf] }
 0x686   : > { %3581 = vmatpush.bf16.msra.mxu2 %v5344_v35  ;;  %v5336_v57 = vor.u32 %v5863_v54, %v5333_v21  ;;  %v5320_v32 = vor.u32 %v5859_v19, %v5317_v24  ;;  %v5309_v54 = vld [vmem:[#allocation7 + $0xa08] sm:$0xf0]  ;;  %v5873_v21 = vld [vmem:[#allocation7 + $0xa84] sm:$0xf] }
 0x687   : > { %3564 = vmatpush.bf16.msra.mxu1 %v5428_v55 }
 0x689   : > { %3551 = vmatpush.bf16.msra.mxu0 %v5356_v63  ;;  %3595 = vmatpush.bf16.msra.mxu3 %v5408_v20  ;;  %v5323_v63 = vld [vmem:[#allocation7 + $0xa20] sm:$0xf]  ;;  %v5858_v20 = vld [vmem:[#allocation7 + $0xa04] sm:$0xf0] }
 0x68a   : > { %v5324_v2 = vor.u32 %v5862_v0, %v5323_v63  ;;  %3582 = vmatpush.bf16.msra.mxu2 %v5336_v57 }
 0x68b   : > { %3565 = vmatpush.bf16.msra.mxu1 %v5420_v3  ;;  %v5878_v3 = vld [vmem:[#allocation7 + $0xaa4] sm:$0xf0] }
 0x68c   : > { %v5388_v18 = vor.u32 %v5878_v3, %v5387_v1  ;;  %v3061_v3 = vld [vmem:[#allocation5 + $0x11] ss:$8 sm:$0x3] }
 0x68d   : > { %3552 = vmatpush.bf16.msra.mxu0 %v5348_v17  ;;  %3596 = vmatpush.bf16.msra.mxu3 %v5400_v60  ;;  %v5392_v17 = vor.u32 %v5877_v4, %v5389_v12  ;;  %v3074_v12 = vperm.slane %v3063_v5, 0 }
 0x68e   : > { %3583 = vmatpush.bf16.msra.mxu2 %v5328_v16  ;;  %v3066_v16 = vperm.slane %v3061_v3, 1 }
 0x68f   : > { %3566 = vmatpush.bf16.msra.mxu1 %v5412_v25  ;;  %v5860_v25 = vld [vmem:[#allocation7 + $0xa14] sm:$0xf0] }
 0x690   : > { %v5316_v27 = vor.u32 %v5860_v25, %v5315_v28 }
 0x691   : > { %3553 = vmatpush.bf16.msra.mxu0 %v5340_v31  ;;  %v5380_v31 = vor.u32 %v5876_v29, %v5379_v23  ;;  %3597 = vmatpush.bf16.msra.mxu3 %v5392_v17 }
 0x692   : > { %3584 = vmatpush.bf16.msra.mxu2 %v5320_v32  ;;  %v5491_v32 = vld [vmem:[#allocation7 + $0xb70] sm:$0xf] }
 0x693   : > { %3567 = vmatpush.bf16.msra.mxu1 %v5404_v34  ;;  %v5384_v34 = vor.u32 %v5875_v22, %v5381_v33 }
 0x695   : > { %3554 = vmatpush.bf16.msra.mxu0 %v5332_v30  ;;  %v5857_v30 = vld [vmem:[#allocation7 + $0xa04] sm:$0xf]  ;;  %3598 = vmatpush.bf16.msra.mxu3 %v5384_v34  ;;  %v5936_v34 = vld [vmem:[#allocation7 + $0xb74] sm:$0xf0] }
 0x696   : > { %v5312_v57 = vor.u32 %v5857_v30, %v5309_v54  ;;  %v5934_v54 = vld [vmem:[#allocation7 + $0xb64] sm:$0xf0] }
 0x697   : > { %3568 = vmatpush.bf16.msra.mxu1 %v5396_v56 }
 0x698   : > { %3585 = vmatpush.bf16.msra.mxu2 %v5312_v57  ;;  %v5933_v57 = vld [vmem:[#allocation7 + $0xb64] sm:$0xf] }
 0x699   : > { %3555 = vmatpush.bf16.msra.mxu0 %v5324_v2 }
 0x69b   : > { %3569 = vmatpush.bf16.msra.mxu1 %v5388_v18  ;;  %v3065_v18 = vperm.slane %v3061_v3, 0  ;;  %v5539_v3 = vld [vmem:[#allocation7 + $0xbd0] sm:$0xf] }
 0x69d   : > { %3556 = vmatpush.bf16.msra.mxu0 %v5316_v27 }
 0x69f   : > { %3570 = vmatpush.bf16.msra.mxu1 %v5380_v31 }
 0x6eb   : > { %v3016_v50 = vpop.xlane.xlu2 %3015  ;;  %v3019_v53 = vpop.xlane.xlu0 %3018 }
 0x6ec   : > { %v3020_v55 = vrot.slane %v3016_v50, 4  ;;  %v3026_v14 = vrot.slane %v3019_v53, 4 }
 0x6ee   : > { %v3021_v61 = vadd.f32 %v3020_v55, %v3016_v50  ;;  %v3027_v62 = vadd.f32 %v3026_v14, %v3019_v53  ;;  %v5308_v50 = vor.u32 %v5858_v20, %v5307_v51  ;;  %v5874_v53 = vld [vmem:[#allocation7 + $0xa84] sm:$0xf0]  ;;  %v5373_v55 = vld [vmem:[#allocation7 + $0xa88] sm:$0xf0]  ;;  %v5493_v20 = vld [vmem:[#allocation7 + $0xb78] sm:$0xf0] }
 0x6ef   : > { %v5372_v43 = vor.u32 %v5874_v53, %v5371_v40  ;;  %v5376_v58 = vor.u32 %v5873_v21, %v5373_v55  ;;  %v5492_v53 = vor.u32 %v5936_v34, %v5491_v32  ;;  %v5944_v34 = vld [vmem:[#allocation7 + $0xbb4] sm:$0xf0] }
 0x6f0   : > { %v3022_v7 = vrot.slane %v3021_v61, 2  ;;  %v3028_v9 = vrot.slane %v3027_v62, 2  ;;  %3557 = vmatpush.bf16.msra.mxu0 %v5308_v50 }
 0x6f1   : > { %3571 = vmatpush.bf16.msra.mxu1 %v5372_v43  ;;  %3599 = vmatpush.bf16.msra.mxu3 %v5376_v58  ;;  %v5483_v43 = vld [vmem:[#allocation7 + $0xb60] sm:$0xf]  ;;  %v5485_v58 = vld [vmem:[#allocation7 + $0xb68] sm:$0xf0] }
 0x6f2   : > { %v3023_v39 = vadd.f32 %v3022_v7, %v3021_v61  ;;  %v3029_v15 = vadd.f32 %v3028_v9, %v3027_v62 }
 0x6f4   : > { %v3024_v52 = vrot.slane %v3023_v39, 1  ;;  %v3030_v26 = vrot.slane %v3029_v15, 1 }
 0x6f6   : > { %v3025_v35 = vadd.f32 %v3024_v52, %v3023_v39  ;;  %v3031_v37 = vadd.f32 %v3030_v26, %v3029_v15  ;;  %v3075_v39 = vperm.slane %v3063_v5, 1  ;;  %v5931_v5 = vld [vmem:[#allocation7 + $0xb54] sm:$0xf] }
 0x6f8   : > { %v3032_v41 = vmul.f32 0.00048828125, %v3025_v35  ;;  %v3033_v49 = vmul.f32 0.00048828125, %v3031_v37  ;;  %v5555_v35 = vld [vmem:[#allocation7 + $0xbf0] sm:$0xf]  ;;  %v5952_v37 = vld [vmem:[#allocation7 + $0xbf4] sm:$0xf0] }
 0x6f9   : > { %v5556_v30 = vor.u32 %v5952_v37, %v5555_v35  ;;  %v5927_v35 = vld [vmem:[#allocation7 + $0xb34] sm:$0xf]  ;;  %v5461_v37 = vld [vmem:[#allocation7 + $0xb38] sm:$0xf0] }
 0x6fa   : > { %v3034_v14 = vadd.f32 1e-05, %v3032_v41  ;;  %v3035_v56 = vadd.f32 1e-05, %v3033_v49  ;;  %v5951_v41 = vld [vmem:[#allocation7 + $0xbf4] sm:$0xf] }
 0x6fc   : > { %6041 = vrsqrt.f32 %v3034_v14  ;;  %vm3042_vm12 = vweird.f32 %v3034_v14  ;;  %vm3052_vm14 = vweird.f32 %v3035_v56 }
 0x6fd   : > { %6043 = vrsqrt.f32 %v3035_v56 }
 0x702   : > { %v6042_v59 = vpop.eup %6041 }
 0x703   : > { %v6044_v60 = vpop.eup %6043  ;;  %v3037_v61 = vmul.f32 %v6042_v59, %v3034_v14  ;;  %vm3043_vm8 = vweird.f32 %v6042_v59  ;;  %v5547_v14 = vld [vmem:[#allocation7 + $0xbe0] sm:$0xf] }
 0x704   : > { %v3047_v62 = vmul.f32 %v6044_v60, %v3035_v56  ;;  %vm3053_vm9 = vweird.f32 %v6044_v60  ;;  %vm3044_vm13 = vmor %vm3042_vm12, %vm3043_vm8  ;;  %v5950_v56 = vld [vmem:[#allocation7 + $0xbe4] sm:$0xf0] }
 0x705   : > { %v3038_v63 = vmul.f32 %v6042_v59, %v3037_v61  ;;  %vm3054_vm15 = vmor %vm3052_vm14, %vm3053_vm9  ;;  %v5484_v61 = vor.u32 %v5934_v54, %v5483_v43  ;;  %v5925_v43 = vld [vmem:[#allocation7 + $0xb24] sm:$0xf]  ;;  %v5453_v54 = vld [vmem:[#allocation7 + $0xb28] sm:$0xf0] }
 0x706   : > { %v3048_v0 = vmul.f32 %v6044_v60, %v3047_v62  ;;  %v5548_v62 = vor.u32 %v5950_v56, %v5547_v14 }
 0x707   : > { %v3039_v1 = vmul.f32 0.5, %v3038_v63  ;;  %v5475_v63 = vld [vmem:[#allocation7 + $0xb50] sm:$0xf] }
 0x708   : > { %v3049_v2 = vmul.f32 0.5, %v3048_v0  ;;  %v5932_v0 = vld [vmem:[#allocation7 + $0xb54] sm:$0xf0] }
 0x709   : > { %v3040_v6 = vsub.f32 1.5, %v3039_v1  ;;  %v5488_v1 = vor.u32 %v5933_v57, %v5485_v58  ;;  %v5443_v57 = vld [vmem:[#allocation7 + $0xb10] sm:$0xf]  ;;  %v5924_v58 = vld [vmem:[#allocation7 + $0xb14] sm:$0xf0] }
 0x70a   : > { %v3050_v7 = vsub.f32 1.5, %v3049_v2 }
 0x70b   : > { %v3041_v9 = vmul.f32 %v6042_v59, %v3040_v6  ;;  %v5948_v6 = vld [vmem:[#allocation7 + $0xbd4] sm:$0xf0] }
 0x70c   : > { %v3051_v4 = vmul.f32 %v6044_v60, %v3050_v7  ;;  %v5477_v7 = vld [vmem:[#allocation7 + $0xb58] sm:$0xf0] }
 0x70d   : > { %v3045_v17 = vsel %vm3044_vm13, %v6042_v59, %v3041_v9  ;;  %v5949_v59 = vld [vmem:[#allocation7 + $0xbe4] sm:$0xf]  ;;  %v5947_v9 = vld [vmem:[#allocation7 + $0xbd4] sm:$0xf] }
 0x70e   : > { %v3056_v15 = vmul.f32 %v3045_v17, %v6568_v42  ;;  %v3057_v28 = vmul.f32 %v3045_v17, %v6571_v46  ;;  %v3055_v25 = vsel %vm3054_vm15, %v6044_v60, %v3051_v4  ;;  %v5935_v46 = vld [vmem:[#allocation7 + $0xb74] sm:$0xf]  ;;  %v5549_v60 = vld [vmem:[#allocation7 + $0xbe8] sm:$0xf0]  ;;  %v5540_v4 = vor.u32 %v5948_v6, %v5539_v3  ;;  %v5930_v17 = vld [vmem:[#allocation7 + $0xb44] sm:$0xf0] }
 0x70f   : > { %v3058_v23 = vmul.f32 %v3055_v25, %v6574_v47  ;;  %v3059_v27 = vmul.f32 %v3055_v25, %v6577_v48  ;;  %v5557_v48 = vld [vmem:[#allocation7 + $0xbf8] sm:$0xf0]  ;;  %v5496_v21 = vor.u32 %v5935_v46, %v5493_v20  ;;  %v5552_v2 = vor.u32 %v5949_v59, %v5549_v60  ;;  %v5946_v25 = vld [vmem:[#allocation7 + $0xbc4] sm:$0xf0] }
 0x710   : > { %v3069_v29 = vmul.f32 %v3065_v18, %v3056_v15  ;;  %v3070_v19 = vmul.f32 %v3066_v16, %v3057_v28  ;;  %v5560_v55 = vor.u32 %v5951_v41, %v5557_v48  ;;  %v5531_v28 = vld [vmem:[#allocation7 + $0xbc0] sm:$0xf]  ;;  %v5464_v41 = vor.u32 %v5927_v35, %v5461_v37 }
 0x711   : > { %v3071_v24 = vmul.f32 %v3065_v18, %v3058_v23  ;;  %v3072_v52 = vmul.f32 %v3066_v16, %v3059_v27  ;;  %v5541_v18 = vld [vmem:[#allocation7 + $0xbd8] sm:$0xf0]  ;;  %v5476_v16 = vor.u32 %v5932_v0, %v5475_v63  ;;  %v5929_v23 = vld [vmem:[#allocation7 + $0xb44] sm:$0xf]  ;;  %v5469_v27 = vld [vmem:[#allocation7 + $0xb48] sm:$0xf0]  ;;  %v5456_v59 = vor.u32 %v5925_v43, %v5453_v54 }
 0x712   : > { %v3078_v26 = vadd.f32 %v3074_v12, %v3069_v29  ;;  %v3079_v31 = vadd.f32 %v3075_v39, %v3070_v19  ;;  %v5544_v15 = vor.u32 %v5947_v9, %v5541_v18  ;;  %v5945_v29 = vld [vmem:[#allocation7 + $0xbc4] sm:$0xf]  ;;  %v5533_v19 = vld [vmem:[#allocation7 + $0xbc8] sm:$0xf0]  ;;  %v5472_v32 = vor.u32 %v5929_v23, %v5469_v27  ;;  %v5923_v63 = vld [vmem:[#allocation7 + $0xb14] sm:$0xf] }
 0x713   : > { %v3080_v22 = vadd.f32 %v3074_v12, %v3071_v24  ;;  %v3081_v33 = vadd.f32 %v3075_v39, %v3072_v52  ;;  %v5467_v12 = vld [vmem:[#allocation7 + $0xb40] sm:$0xf]  ;;  %v5480_v39 = vor.u32 %v5931_v5, %v5477_v7  ;;  %v5532_v52 = vor.u32 %v5946_v25, %v5531_v28  ;;  %v5445_v0 = vld [vmem:[#allocation7 + $0xb18] sm:$0xf0]  ;;  %v5922_v7 = vld [vmem:[#allocation7 + $0xb04] sm:$0xf0] }
 0x714   : > { %v3082_v42 = vmax.f32 %v3078_v26, 0.0  ;;  %v3083_v51 = vmax.f32 %v3079_v31, 0.0  ;;  %v5468_v24 = vor.u32 %v5930_v17, %v5467_v12  ;;  %v5459_v26 = vld [vmem:[#allocation7 + $0xb30] sm:$0xf]  ;;  %v5928_v31 = vld [vmem:[#allocation7 + $0xb34] sm:$0xf0]  ;;  %v5444_v3 = vor.u32 %v5924_v58, %v5443_v57 }
 0x715   : > { %v3084_v40 = vmax.f32 %v3080_v22, 0.0  ;;  %v3085_v47 = vmax.f32 %v3081_v33, 0.0  ;;  %v5536_v22 = vor.u32 %v5945_v29, %v5533_v19  ;;  %v5523_v33 = vld [vmem:[#allocation7 + $0xbb0] sm:$0xf]  ;;  %v5460_v46 = vor.u32 %v5928_v31, %v5459_v26  ;;  %v5435_v5 = vld [vmem:[#allocation7 + $0xb00] sm:$0xf] }
 0x716   : > { %v5524_v20 = vor.u32 %v5944_v34, %v5523_v33  ;;  %v5448_v9 = vor.u32 %v5923_v63, %v5445_v0  ;;  %v5921_v12 = vld [vmem:[#allocation7 + $0xb04] sm:$0xf]  ;;  %v5437_v17 = vld [vmem:[#allocation7 + $0xb08] sm:$0xf0]  ;;  %v5436_v28 = vor.u32 %v5922_v7, %v5435_v5 }
 0x717   : > { %v6591_v49 = vpack.c.bf16 %v3084_v40, %v3082_v42  ;;  %v6593_v50 = vpack.c.bf16 %v3085_v47, %v3083_v51  ;;  %v5943_v42 = vld [vmem:[#allocation7 + $0xbb4] sm:$0xf]  ;;  %v5525_v51 = vld [vmem:[#allocation7 + $0xbb8] sm:$0xf0]  ;;  %v5451_v40 = vld [vmem:[#allocation7 + $0xb20] sm:$0xf]  ;;  %v5440_v23 = vor.u32 %v5921_v12, %v5437_v17 }
 0x718   : > { %v5926_v47 = vld [vmem:[#allocation7 + $0xb24] sm:$0xf0]  ;;  %v5528_v48 = vor.u32 %v5943_v42, %v5525_v51 }
 0x719   : > { %3322 = vmatmul.bf16.vlgmr.msrb.gmra.mxu0 %v6591_v49  ;;  %3336 = vmatmul.bf16.vlgmr.msrb.gmra.mxu1 %v6593_v50  ;;  %v5452_v14 = vor.u32 %v5926_v47, %v5451_v40 }
 0x71a   : > { %3350 = vmatmul.bf16.vlgmr.msrb.gmra.mxu2 %v6591_v49  ;;  %3364 = vmatmul.bf16.vlgmr.msrb.gmra.mxu3 %v6593_v50 }
 0x71b   : > { %3799 = vmatpush.bf16.msrb.mxu0 %v5492_v53  ;;  %3813 = vmatpush.bf16.msrb.mxu1 %v5556_v30  ;;  %v5515_v53 = vld [vmem:[#allocation7 + $0xba0] sm:$0xf]  ;;  %v5942_v30 = vld [vmem:[#allocation7 + $0xba4] sm:$0xf0] }
 0x71c   : > { %3827 = vmatpush.bf16.msrb.mxu2 %v5496_v21  ;;  %3841 = vmatpush.bf16.msrb.mxu3 %v5560_v55  ;;  %v5941_v21 = vld [vmem:[#allocation7 + $0xba4] sm:$0xf]  ;;  %v5517_v55 = vld [vmem:[#allocation7 + $0xba8] sm:$0xf0]  ;;  %v5516_v56 = vor.u32 %v5942_v30, %v5515_v53 }
 0x71d   : > { %v5520_v60 = vor.u32 %v5941_v21, %v5517_v55 }
 0x71f   : > { %3800 = vmatpush.bf16.msrb.mxu0 %v5484_v61  ;;  %3814 = vmatpush.bf16.msrb.mxu1 %v5548_v62  ;;  %v5507_v61 = vld [vmem:[#allocation7 + $0xb90] sm:$0xf]  ;;  %v5940_v62 = vld [vmem:[#allocation7 + $0xb94] sm:$0xf0] }
 0x720   : > { %3828 = vmatpush.bf16.msrb.mxu2 %v5488_v1  ;;  %3842 = vmatpush.bf16.msrb.mxu3 %v5552_v2  ;;  %v5939_v1 = vld [vmem:[#allocation7 + $0xb94] sm:$0xf]  ;;  %v5509_v2 = vld [vmem:[#allocation7 + $0xb98] sm:$0xf0]  ;;  %v5508_v6 = vor.u32 %v5940_v62, %v5507_v61 }
 0x721   : > { %v5512_v18 = vor.u32 %v5939_v1, %v5509_v2 }
 0x723   : > { %3801 = vmatpush.bf16.msrb.mxu0 %v5476_v16  ;;  %3815 = vmatpush.bf16.msrb.mxu1 %v5540_v4  ;;  %v5499_v16 = vld [vmem:[#allocation7 + $0xb80] sm:$0xf]  ;;  %v5938_v4 = vld [vmem:[#allocation7 + $0xb84] sm:$0xf0] }
 0x724   : > { %3829 = vmatpush.bf16.msrb.mxu2 %v5480_v39  ;;  %3843 = vmatpush.bf16.msrb.mxu3 %v5544_v15  ;;  %v5937_v39 = vld [vmem:[#allocation7 + $0xb84] sm:$0xf]  ;;  %v5501_v15 = vld [vmem:[#allocation7 + $0xb88] sm:$0xf0]  ;;  %v5500_v25 = vor.u32 %v5938_v4, %v5499_v16 }
 0x725   : > { %v5504_v27 = vor.u32 %v5937_v39, %v5501_v15 }
 0x727   : > { %3802 = vmatpush.bf16.msrb.mxu0 %v5468_v24  ;;  %3816 = vmatpush.bf16.msrb.mxu1 %v5532_v52 }
 0x728   : > { %3830 = vmatpush.bf16.msrb.mxu2 %v5472_v32  ;;  %3844 = vmatpush.bf16.msrb.mxu3 %v5536_v22 }
 0x729   : > { %3558 = vmatmul.bf16.vlgmr.msra.gmra.mxu0 %v6591_v49  ;;  %3572 = vmatmul.bf16.vlgmr.msra.gmra.mxu1 %v6593_v50 }
 0x72a   : > { %3586 = vmatmul.bf16.vlgmr.msra.gmra.mxu2 %v6591_v49  ;;  %3600 = vmatmul.bf16.vlgmr.msra.gmra.mxu3 %v6593_v50 }
 0x72b   : > { %3803 = vmatpush.bf16.msrb.mxu0 %v5460_v46  ;;  %3817 = vmatpush.bf16.msrb.mxu1 %v5524_v20 }
 0x72c   : > { %3831 = vmatpush.bf16.msrb.mxu2 %v5464_v41  ;;  %3845 = vmatpush.bf16.msrb.mxu3 %v5528_v48 }
 0x72f   : > { %3804 = vmatpush.bf16.msrb.mxu0 %v5452_v14  ;;  %3818 = vmatpush.bf16.msrb.mxu1 %v5516_v56 }
 0x730   : > { %3832 = vmatpush.bf16.msrb.mxu2 %v5456_v59  ;;  %3846 = vmatpush.bf16.msrb.mxu3 %v5520_v60 }
 0x733   : > { %3805 = vmatpush.bf16.msrb.mxu0 %v5444_v3  ;;  %3819 = vmatpush.bf16.msrb.mxu1 %v5508_v6 }
 0x734   : > { %3833 = vmatpush.bf16.msrb.mxu2 %v5448_v9  ;;  %3847 = vmatpush.bf16.msrb.mxu3 %v5512_v18 }
 0x737   : > { %3806 = vmatpush.bf16.msrb.mxu0 %v5436_v28  ;;  %3820 = vmatpush.bf16.msrb.mxu1 %v5500_v25 }
 0x738   : > { %3834 = vmatpush.bf16.msrb.mxu2 %v5440_v23  ;;  %3848 = vmatpush.bf16.msrb.mxu3 %v5504_v27 }
 0x73a   : > { %3807 = vmatmul.bf16.vlgmr.msrb.gmra.mxu0 %v6591_v49  ;;  %3821 = vmatmul.bf16.vlgmr.msrb.gmra.mxu1 %v6593_v50 }
 0x73b   : > { %3835 = vmatmul.bf16.vlgmr.msrb.gmra.mxu2 %v6591_v49  ;;  %3849 = vmatmul.bf16.vlgmr.msrb.gmra.mxu3 %v6593_v50 }
 0x796   : > { %v3323_v29 = vpop.f32.mrf.mxu0  ;;  %v3337_v19 = vpop.f32.mrf.mxu1 }
 0x797   : > { %v3338_v46 = vadd.f32 %v3337_v19, %v3323_v29 }
 0x799   : > { %v3370_v41 = vmul.f32 %v6404_v44, %v3338_v46 }
 0x79b   : > { %v3378_v43 = vrot.slane %v3370_v41, 7 }
 0x79d   : > { %v3351_v24 = vpop.f32.mrf.mxu2  ;;  %v3365_v52 = vpop.f32.mrf.mxu3  ;;  %v3388_v60 = vsel %vm660_vm10, 0.0, %v3378_v43 }
 0x79e   : > { %v3325_v26 = vpop.f32.mrf.mxu0  ;;  %v3339_v31 = vpop.f32.mrf.mxu1  ;;  %v3366_v53 = vadd.f32 %v3365_v52, %v3351_v24 }
 0x79f   : > { %v3340_v20 = vadd.f32 %v3339_v31, %v3325_v26 }
 0x7a0   : > { %v3371_v55 = vmul.f32 %v6404_v44, %v3366_v53  ;;  %v3880_v44 = vld [vmem:[#allocation5 + $0x13] ss:$8 sm:$0x3] }
 0x7a1   : > { %v3372_v48 = vmul.f32 %v6412_v45, %v3340_v20  ;;  %v3882_v16 = vperm.slane %v3880_v44, 0 }
 0x7a2   : > { %v3379_v2 = vrot.slane %v3371_v55, 7 }
 0x7a3   : > { %v3380_v54 = vrot.slane %v3372_v48, 7 }
 0x7a4   : > { %v3389_v4 = vsel %vm660_vm10, 0.0, %v3379_v2 }
 0x7a5   : > { %v3353_v32 = vpop.f32.mrf.mxu2  ;;  %v3367_v22 = vpop.f32.mrf.mxu3  ;;  %v3381_v61 = vsel %vm660_vm10, %v3378_v43, %v3380_v54 }
 0x7a6   : > { %v3559_v33 = vpop.f32.mrf.mxu0  ;;  %v3573_v34 = vpop.f32.mrf.mxu1  ;;  %v3368_v30 = vadd.f32 %v3367_v22, %v3353_v32 }
 0x7a7   : > { %v3560_v0 = vadd.f32 %v3559_v33, %v3388_v60 }
 0x7a8   : > { %v3373_v14 = vmul.f32 %v6412_v45, %v3368_v30 }
 0x7a9   : > { %v3574_v9 = vadd.f32 %v3573_v34, %v3560_v0 }
 0x7aa   : > { %v3382_v3 = vrot.slane %v3373_v14, 7 }
 0x7ac   : > { %v3383_v12 = vsel %vm660_vm10, %v3379_v2, %v3382_v3 }
 0x7ad   : > { %v3587_v35 = vpop.f32.mrf.mxu2  ;;  %v3601_v37 = vpop.f32.mrf.mxu3 }
 0x7ae   : > { %v3561_v42 = vpop.f32.mrf.mxu0  ;;  %v3575_v51 = vpop.f32.mrf.mxu1  ;;  %v3588_v19 = vadd.f32 %v3587_v35, %v3389_v4 }
 0x7af   : > { %v3562_v1 = vadd.f32 %v3561_v42, %v3381_v61 }
 0x7b0   : > { %v3602_v42 = vadd.f32 %v3601_v37, %v3588_v19 }
 0x7b1   : > { %v3576_v18 = vadd.f32 %v3575_v51, %v3562_v1 }
 0x7b5   : > { %v3589_v40 = vpop.f32.mrf.mxu2  ;;  %v3603_v49 = vpop.f32.mrf.mxu3 }
 0x7b6   : > { %v3590_v24 = vadd.f32 %v3589_v40, %v3383_v12 }
 0x7b7   : > { %v3808_v47 = vpop.f32.mrf.mxu0  ;;  %v3822_v50 = vpop.f32.mrf.mxu1 }
 0x7b8   : > { %v3823_v21 = vadd.f32 %v3822_v50, %v3808_v47  ;;  %v3604_v51 = vadd.f32 %v3603_v49, %v3590_v24 }
 0x7ba   : > { %v3855_v62 = vmul.f32 %v6410_v38, %v3823_v21 }
 0x7bc   : > { %v3863_v45 = vrot.slane %v3855_v62, 1 }
 0x7be   : > { %v3836_v56 = vpop.f32.mrf.mxu2  ;;  %v3850_v57 = vpop.f32.mrf.mxu3 }
 0x7bf   : > { %v3810_v58 = vpop.f32.mrf.mxu0  ;;  %v3824_v59 = vpop.f32.mrf.mxu1  ;;  %v3851_v5 = vadd.f32 %v3850_v57, %v3836_v56 }
 0x7c0   : > { %v3825_v63 = vadd.f32 %v3824_v59, %v3810_v58 }
 0x7c1   : > { %v3856_v25 = vmul.f32 %v6410_v38, %v3851_v5  ;;  %v3883_v38 = vperm.slane %v3880_v44, 1 }
 0x7c2   : > { %v3857_v6 = vmul.f32 %v6408_v36, %v3825_v63 }
 0x7c3   : > { %v3866_v32 = vrot.slane %v3856_v25, 1 }
 0x7c4   : > { %v3864_v7 = vrot.slane %v3857_v6, 1 }
 0x7c6   : > { %v3865_v17 = vsel %vm1146_vm11, %v3863_v45, %v3864_v7  ;;  %v3873_v39 = vsel %vm1146_vm11, %v3864_v7, 0.0  ;;  %v3838_v15 = vpop.f32.mrf.mxu2  ;;  %v3852_v28 = vpop.f32.mrf.mxu3 }
 0x7c7   : > { %v3875_v23 = vadd.f32 %v3865_v17, %v3574_v9  ;;  %v3877_v27 = vadd.f32 %v3873_v39, %v3576_v18  ;;  %v3853_v29 = vadd.f32 %v3852_v28, %v3838_v15 }
 0x7c9   : > { %v3886_v52 = vadd.f32 %v3882_v16, %v3875_v23  ;;  %v3888_v26 = vadd.f32 %v3882_v16, %v3877_v27  ;;  %v3858_v31 = vmul.f32 %v6408_v36, %v3853_v29 }
 0x7cb   : > { %v3890_v22 = vadd.f32 %v3886_v52, %v6484_v10  ;;  %v3892_v33 = vadd.f32 %v3888_v26, %v6490_v8  ;;  %v3867_v34 = vrot.slane %v3858_v31, 1 }
 0x7cd   : > { %3894 = vst [vmem:[%s224_s28] sm:$0xff] %v3890_v22  ;;  %v3868_v36 = vsel %vm1146_vm11, %v3866_v32, %v3867_v34  ;;  %v3874_v35 = vsel %vm1146_vm11, %v3867_v34, 0.0 }
 0x7ce   : > { %3896 = vst [vmem:[%s224_s28 + $0x10] sm:$0xff] %v3892_v33  ;;  %v3876_v10 = vadd.f32 %v3868_v36, %v3602_v42  ;;  %v3878_v46 = vadd.f32 %v3874_v35, %v3604_v51 }
 0x7d0   : > { %v3887_v8 = vadd.f32 %v3883_v38, %v3876_v10  ;;  %v3889_v37 = vadd.f32 %v3883_v38, %v3878_v46 }
 0x7d2   : > { %v3891_v20 = vadd.f32 %v3887_v8, %v6487_v11  ;;  %v3893_v40 = vadd.f32 %v3889_v37, %v6493_v13 }
 0x7d4   : > { %3895 = vst [vmem:[%s224_s28 + $0x8] sm:$0xff] %v3891_v20 }
 0x7d5   : > { %3897 = vst [vmem:[%s224_s28 + $0x18] sm:$0xff] %v3893_v40 }
 0x7d6   : > { %6166 = shalt.err (!%p6163_p10)
}
 0x7d7   : > { %s6218_s20 = smov 256   ;;  %s6219_s26 = smov 16  }
 0x7d8   : > { %5965 = dma.vmem_to_hbm [thread:$0]  (%p6312_p5), %s3913_s16, 512, %s3915_s4, %s3899_s5, %s6218_s20, %s6218_s20, %s6219_s26  }
 0x7d9 PF: > { %s3929_s27 = sand.u32 1, %s6197_s12   ;;  %p6671_p12 = scmp.ge.s32.totalorder %s6209_s15, 2 }
 0x7da   : > { %s3930_s7 = scalar_lea.sflag [#allocation4], %s3929_s27 }
 0x7db   : > { %p5979_p13 = pnand %p6671_p12, %p6275_p6 }
 0x7dd   : > { %p5980_p0 = pneg %p5979_p13 }
 0x7df   : > { %6192 = dma.done.wait (%p5980_p0), %s3930_s7, 512  }
 0x7e0   : > { %6194 = vsyncadd (%p5980_p0), %s3930_s7, 4294966784  ;;  %p17_p3 = scmp.ge.s32.totalorder %s6299_s8, 4   ;;  %s6672_s12 = smov %s6201_s13 }
 0x7e1   : > { %s6673_s13 = smov %s6205_s14  ;;  %s6674_s14 = smov %s6308_s11 }
 0x7e2   : > { %s6675_s15 = smov %s6299_s8  ;;  %19 = sbr.rel (!%p17_p3) target bundleno = 6 (0x6), region = 107 }
 0x7e7   :  { %3936 = vsyncpa [#allocation3], 1 }
 0x7e8   :  { %3938 = vsyncpa [#allocation3 + $0x1], 1 }
 0x7e9   :  { %3939 = vsyncpa [#allocation6], 1 }
 0x7ea   :  { %3940 = vsyncpa [#allocation4], 1 }
 0x7eb   :  { %3942 = vsyncpa [#allocation4 + $0x1], 1 }

</bundles_post_ra>
